<compile_context>
chip_gen: v7x
topology: tpu7x:2x2x1
jax: 0.10.0
libtpu: 0.0.40
codegen_flags: <defaults>
</compile_context>

<pallas_src>
import functools

import jax
import jax.numpy as jnp
from jax import lax
from jax.experimental import pallas as pl
from jax.experimental.pallas import tpu as pltpu

_LANE = 128   # lane width: cin is processed in 128-wide, lane-aligned groups
_SUB = 8      # sublane width (batch alignment)


def _aap_kernel(x_ref, wt_ref, o_ref, acc_ref, *, cin_tile):
    # x_ref:   (TB, TCIN)     batch on sublanes, in_channels on lanes
    # wt_ref:  (TCIN, TCOUT)  in_channels on sublanes, out_channels on lanes
    # o_ref:   (TB, TCOUT)    lane-dense output tile
    # acc_ref: (TB, TCOUT) f32 scratch, resident across the cin grid axis
    k = pl.program_id(2)
    nk = pl.num_programs(2)
    tb, tcout = acc_ref.shape
    n_groups = cin_tile // _LANE

    def group_body(g, acc):
        base = pl.multiple_of(g * _LANE, _LANE)
        # One aligned 128-wide slice per group, upcast to f32 once so the hot
        # loop below has no per-element converts on any TPU generation.
        xg = x_ref[:, pl.ds(base, _LANE)].astype(jnp.float32)    # (TB, 128)
        wg = wt_ref[pl.ds(base, _LANE), :].astype(jnp.float32)   # (128, TCOUT)
        # Static unroll over the 128 cin elements of this lane group.
        # Per element: lane-splat of x column (XLU), sublane-broadcast of the
        # w row, then add + max(.,0) + accumulate = 3 VALU ops per out vreg.
        # `acc` stays a register-resident loop-carried value; no VMEM RMW here.
        for c in range(_LANE):
            s = xg[:, c:c + 1] + wg[c:c + 1, :]        # (TB, TCOUT)
            acc = acc + jnp.maximum(s, 0.0)            # relu via immediate 0
        return acc

    acc = lax.fori_loop(0, n_groups, group_body,
                        jnp.zeros((tb, tcout), jnp.float32))

    # Exactly one accumulator-scratch access per grid step.
    @pl.when(k == 0)
    def _():
        acc_ref[...] = acc

    @pl.when(k > 0)
    def _():
        acc_ref[...] += acc

    @pl.when(k == nk - 1)
    def _():
        o_ref[...] = acc_ref[...].astype(o_ref.dtype)


def _cdiv(a, b):
    return -(-a // b)


def _round_up(n, m):
    return _cdiv(n, m) * m


def _tight_tile(dim, align, max_tile):
    """Multiple-of-`align` tile that covers the padded dim in the same number
    of blocks as a `max_tile` would, but with minimal padding waste."""
    padded = _round_up(max(dim, 1), align)
    n_blocks = _cdiv(padded, max_tile)
    return _round_up(_cdiv(padded, n_blocks), align)


def addition_activation_linear(x, weight, *, batch_tile=None, cout_tile=None,
                               cin_tile=None):
    """relu(x[:, None, :] + weight[None, :, :]).sum(-1)

    x: (B, Cin), weight: (Cout, Cin)  ->  (B, Cout)
    (weight is the torch parameter with its leading broadcast dim squeezed)
    """
    B, Cin = x.shape
    Cout, Cin_w = weight.shape
    assert Cin == Cin_w
    out_dtype = x.dtype

    # Tile defaults: sized for vreg residency of the f32 accumulator
    # (128x256 f32 = 32 vregs), not for VMEM (working set is ~1-2 MiB).
    if batch_tile is None:
        batch_tile = _tight_tile(B, _SUB, 128)
    if cout_tile is None:
        cout_tile = _tight_tile(Cout, _LANE, 256)
    if cin_tile is None:
        cin_tile = _tight_tile(Cin, _LANE, 512)

    assert batch_tile % _SUB == 0, "batch_tile must be a multiple of 8"
    assert cout_tile % _LANE == 0, "cout_tile must be a multiple of 128"
    assert cin_tile % _LANE == 0, "cin_tile must be a multiple of 128"

    Bp = _round_up(_round_up(B, _SUB), batch_tile)
    Coutp = _round_up(_round_up(Cout, _LANE), cout_tile)
    Cinp = _round_up(_round_up(Cin, _LANE), cin_tile)

    # v7x has 2 TensorCores and shards "parallel" grid axes across them:
    # make sure (batch, cout) yields >= 2 tiles whenever the shapes allow it.
    if (Bp // batch_tile) * (Coutp // cout_tile) == 1:
        if cout_tile % (2 * _LANE) == 0:
            cout_tile //= 2
        elif batch_tile % (2 * _SUB) == 0:
            batch_tile //= 2

    # Zero padding is semantically neutral: relu(0 + 0) = 0 adds nothing to
    # the sum, and padded batch rows / cout columns are sliced off below.
    if (Bp, Cinp) == (B, Cin):
        xp = x
    else:
        xp = jnp.zeros((Bp, Cinp), x.dtype).at[:B, :Cin].set(x)
    # Transposed weight: cout on lanes (lane-dense output), cin (the
    # reduction) on sublanes.  Shape-static transform — cacheable across calls.
    wtp = jnp.zeros((Cinp, Coutp), weight.dtype).at[:Cin, :Cout].set(weight.T)

    grid = (Bp // batch_tile, Coutp // cout_tile, Cinp // cin_tile)
    kernel = functools.partial(_aap_kernel, cin_tile=cin_tile)

    out = pl.pallas_call(
        kernel,
        out_shape=jax.ShapeDtypeStruct((Bp, Coutp), out_dtype),
        grid_spec=pltpu.PrefetchScalarGridSpec(
            num_scalar_prefetch=0,
            grid=grid,
            in_specs=[
                # x tile: varies with (batch, cin), constant along cout.
                pl.BlockSpec((batch_tile, cin_tile), lambda i, j, k: (i, k)),
                # weight tile: varies with (cin, cout), constant along batch.
                pl.BlockSpec((cin_tile, cout_tile), lambda i, j, k: (k, j)),
            ],
            # Output tile constant along the cin (reduction) axis ->
            # f32 accumulator scratch resident across it.
            out_specs=pl.BlockSpec((batch_tile, cout_tile),
                                   lambda i, j, k: (i, j)),
            scratch_shapes=[pltpu.VMEM((batch_tile, cout_tile), jnp.float32)],
        ),
        compiler_params=pltpu.CompilerParams(
            dimension_semantics=("parallel", "parallel", "arbitrary"),
        ),
    )(xp, wtp)

    return out[:B, :Cout]


if __name__ == "__main__":
    # Small, deterministic setup consistent with the module's shapes.
    batch, in_channels, out_channels = 8, 32, 16

    key = jax.random.PRNGKey(0)
    kx, kw = jax.random.split(key)
    x = jax.random.normal(kx, (batch, in_channels), dtype=jnp.float32)
    # torch.randn(1, out_channels, in_channels) equivalent, leading 1 squeezed.
    weight = jax.random.normal(kw, (out_channels, in_channels),
                               dtype=jnp.float32)

    out = addition_activation_linear(x, weight)
    out = jax.block_until_ready(out)

    # Pure-JAX reference for correctness.
    ref = jnp.sum(
        jnp.maximum(x[:, None, :] + weight[None, :, :], 0.0), axis=2
    )
    assert out.shape == (batch, out_channels)
    assert jnp.allclose(out, ref, atol=1e-5, rtol=1e-5)

    print("KERNEL_OK")
</pallas_src>

<mosaic_0001>
module attributes {stable_mosaic.version = 11 : i64} {
  func.func @_aap_kernel(%arg0: i32, %arg1: i32, %arg2: i32, %arg3: memref<8x128xf32, #tpu.memory_space<vmem>>, %arg4: memref<128x128xf32, #tpu.memory_space<vmem>>, %arg5: memref<8x128xf32, #tpu.memory_space<vmem>>, %arg6: memref<8x128xf32, #tpu.memory_space<vmem>>) attributes {dimension_semantics = [#tpu.dimension_semantics<parallel>, #tpu.dimension_semantics<parallel>, #tpu.dimension_semantics<arbitrary>], iteration_bounds = array<i64: 1, 1, 1>, scalar_prefetch = 0 : i64, scratch_operands = 1 : i64, tpu.core_type = #tpu.core_type<tc>, window_params = [{transform_indices = @transform_0, window_bounds = array<i64: 8, 128>}, {transform_indices = @transform_1, window_bounds = array<i64: 128, 128>}, {transform_indices = @transform_2, window_bounds = array<i64: 8, 128>}]} {
    %cst = arith.constant 0.000000e+00 : f32
    %0 = vector.broadcast %cst : f32 to vector<8x128xf32>
    %c0_i32 = arith.constant 0 : i32
    %c128_i32 = arith.constant 128 : i32
    %1 = arith.muli %c0_i32, %c128_i32 : i32
    %2 = tpu.assume_multiple %1, 128 : i32
    %c0 = arith.constant 0 : index
    %3 = arith.index_cast %2 : i32 to index
    %4 = vector.load %arg3[%c0, %3] : memref<8x128xf32, #tpu.memory_space<vmem>>, vector<8x128xf32>
    %5 = arith.index_cast %2 : i32 to index
    %c0_0 = arith.constant 0 : index
    %6 = vector.load %arg4[%5, %c0_0] : memref<128x128xf32, #tpu.memory_space<vmem>>, vector<128x128xf32>
    %7 = vector.extract_strided_slice %4 {offsets = [0, 0], sizes = [8, 1], strides = [1, 1]} : vector<8x128xf32> to vector<8x1xf32>
    %8 = vector.extract_strided_slice %6 {offsets = [0, 0], sizes = [1, 128], strides = [1, 1]} : vector<128x128xf32> to vector<1x128xf32>
    %9 = vector.broadcast %7 : vector<8x1xf32> to vector<8x128xf32>
    %10 = vector.broadcast %8 : vector<1x128xf32> to vector<8x128xf32>
    %11 = arith.addf %9, %10 : vector<8x128xf32>
    %cst_1 = arith.constant 0.000000e+00 : f32
    %12 = vector.broadcast %cst_1 : f32 to vector<8x128xf32>
    %13 = arith.maximumf %11, %12 : vector<8x128xf32>
    %14 = arith.addf %0, %13 : vector<8x128xf32>
    %15 = vector.extract_strided_slice %4 {offsets = [0, 1], sizes = [8, 1], strides = [1, 1]} : vector<8x128xf32> to vector<8x1xf32>
    %16 = vector.extract_strided_slice %6 {offsets = [1, 0], sizes = [1, 128], strides = [1, 1]} : vector<128x128xf32> to vector<1x128xf32>
    %17 = vector.broadcast %15 : vector<8x1xf32> to vector<8x128xf32>
    %18 = vector.broadcast %16 : vector<1x128xf32> to vector<8x128xf32>
    %19 = arith.addf %17, %18 : vector<8x128xf32>
    %cst_2 = arith.constant 0.000000e+00 : f32
    %20 = vector.broadcast %cst_2 : f32 to vector<8x128xf32>
    %21 = arith.maximumf %19, %20 : vector<8x128xf32>
    %22 = arith.addf %14, %21 : vector<8x128xf32>
    %23 = vector.extract_strided_slice %4 {offsets = [0, 2], sizes = [8, 1], strides = [1, 1]} : vector<8x128xf32> to vector<8x1xf32>
    %24 = vector.extract_strided_slice %6 {offsets = [2, 0], sizes = [1, 128], strides = [1, 1]} : vector<128x128xf32> to vector<1x128xf32>
    %25 = vector.broadcast %23 : vector<8x1xf32> to vector<8x128xf32>
    %26 = vector.broadcast %24 : vector<1x128xf32> to vector<8x128xf32>
    %27 = arith.addf %25, %26 : vector<8x128xf32>
    %cst_3 = arith.constant 0.000000e+00 : f32
    %28 = vector.broadcast %cst_3 : f32 to vector<8x128xf32>
    %29 = arith.maximumf %27, %28 : vector<8x128xf32>
    %30 = arith.addf %22, %29 : vector<8x128xf32>
    %31 = vector.extract_strided_slice %4 {offsets = [0, 3], sizes = [8, 1], strides = [1, 1]} : vector<8x128xf32> to vector<8x1xf32>
    %32 = vector.extract_strided_slice %6 {offsets = [3, 0], sizes = [1, 128], strides = [1, 1]} : vector<128x128xf32> to vector<1x128xf32>
    %33 = vector.broadcast %31 : vector<8x1xf32> to vector<8x128xf32>
    %34 = vector.broadcast %32 : vector<1x128xf32> to vector<8x128xf32>
    %35 = arith.addf %33, %34 : vector<8x128xf32>
    %cst_4 = arith.constant 0.000000e+00 : f32
    %36 = vector.broadcast %cst_4 : f32 to vector<8x128xf32>
    %37 = arith.maximumf %35, %36 : vector<8x128xf32>
    %38 = arith.addf %30, %37 : vector<8x128xf32>
    %39 = vector.extract_strided_slice %4 {offsets = [0, 4], sizes = [8, 1], strides = [1, 1]} : vector<8x128xf32> to vector<8x1xf32>
    %40 = vector.extract_strided_slice %6 {offsets = [4, 0], sizes = [1, 128], strides = [1, 1]} : vector<128x128xf32> to vector<1x128xf32>
    %41 = vector.broadcast %39 : vector<8x1xf32> to vector<8x128xf32>
    %42 = vector.broadcast %40 : vector<1x128xf32> to vector<8x128xf32>
    %43 = arith.addf %41, %42 : vector<8x128xf32>
    %cst_5 = arith.constant 0.000000e+00 : f32
    %44 = vector.broadcast %cst_5 : f32 to vector<8x128xf32>
    %45 = arith.maximumf %43, %44 : vector<8x128xf32>
    %46 = arith.addf %38, %45 : vector<8x128xf32>
    %47 = vector.extract_strided_slice %4 {offsets = [0, 5], sizes = [8, 1], strides = [1, 1]} : vector<8x128xf32> to vector<8x1xf32>
    %48 = vector.extract_strided_slice %6 {offsets = [5, 0], sizes = [1, 128], strides = [1, 1]} : vector<128x128xf32> to vector<1x128xf32>
    %49 = vector.broadcast %47 : vector<8x1xf32> to vector<8x128xf32>
    %50 = vector.broadcast %48 : vector<1x128xf32> to vector<8x128xf32>
    %51 = arith.addf %49, %50 : vector<8x128xf32>
    %cst_6 = arith.constant 0.000000e+00 : f32
    %52 = vector.broadcast %cst_6 : f32 to vector<8x128xf32>
    %53 = arith.maximumf %51, %52 : vector<8x128xf32>
    %54 = arith.addf %46, %53 : vector<8x128xf32>
    %55 = vector.extract_strided_slice %4 {offsets = [0, 6], sizes = [8, 1], strides = [1, 1]} : vector<8x128xf32> to vector<8x1xf32>
    %56 = vector.extract_strided_slice %6 {offsets = [6, 0], sizes = [1, 128], strides = [1, 1]} : vector<128x128xf32> to vector<1x128xf32>
    %57 = vector.broadcast %55 : vector<8x1xf32> to vector<8x128xf32>
    %58 = vector.broadcast %56 : vector<1x128xf32> to vector<8x128xf32>
    %59 = arith.addf %57, %58 : vector<8x128xf32>
    %cst_7 = arith.constant 0.000000e+00 : f32
    %60 = vector.broadcast %cst_7 : f32 to vector<8x128xf32>
    %61 = arith.maximumf %59, %60 : vector<8x128xf32>
    %62 = arith.addf %54, %61 : vector<8x128xf32>
    %63 = vector.extract_strided_slice %4 {offsets = [0, 7], sizes = [8, 1], strides = [1, 1]} : vector<8x128xf32> to vector<8x1xf32>
    %64 = vector.extract_strided_slice %6 {offsets = [7, 0], sizes = [1, 128], strides = [1, 1]} : vector<128x128xf32> to vector<1x128xf32>
    %65 = vector.broadcast %63 : vector<8x1xf32> to vector<8x128xf32>
    %66 = vector.broadcast %64 : vector<1x128xf32> to vector<8x128xf32>
    %67 = arith.addf %65, %66 : vector<8x128xf32>
    %cst_8 = arith.constant 0.000000e+00 : f32
    %68 = vector.broadcast %cst_8 : f32 to vector<8x128xf32>
    %69 = arith.maximumf %67, %68 : vector<8x128xf32>
    %70 = arith.addf %62, %69 : vector<8x128xf32>
    %71 = vector.extract_strided_slice %4 {offsets = [0, 8], sizes = [8, 1], strides = [1, 1]} : vector<8x128xf32> to vector<8x1xf32>
    %72 = vector.extract_strided_slice %6 {offsets = [8, 0], sizes = [1, 128], strides = [1, 1]} : vector<128x128xf32> to vector<1x128xf32>
    %73 = vector.broadcast %71 : vector<8x1xf32> to vector<8x128xf32>
    %74 = vector.broadcast %72 : vector<1x128xf32> to vector<8x128xf32>
    %75 = arith.addf %73, %74 : vector<8x128xf32>
    %cst_9 = arith.constant 0.000000e+00 : f32
    %76 = vector.broadcast %cst_9 : f32 to vector<8x128xf32>
    %77 = arith.maximumf %75, %76 : vector<8x128xf32>
    %78 = arith.addf %70, %77 : vector<8x128xf32>
    %79 = vector.extract_strided_slice %4 {offsets = [0, 9], sizes = [8, 1], strides = [1, 1]} : vector<8x128xf32> to vector<8x1xf32>
    %80 = vector.extract_strided_slice %6 {offsets = [9, 0], sizes = [1, 128], strides = [1, 1]} : vector<128x128xf32> to vector<1x128xf32>
    %81 = vector.broadcast %79 : vector<8x1xf32> to vector<8x128xf32>
    %82 = vector.broadcast %80 : vector<1x128xf32> to vector<8x128xf32>
    %83 = arith.addf %81, %82 : vector<8x128xf32>
    %cst_10 = arith.constant 0.000000e+00 : f32
    %84 = vector.broadcast %cst_10 : f32 to vector<8x128xf32>
    %85 = arith.maximumf %83, %84 : vector<8x128xf32>
    %86 = arith.addf %78, %85 : vector<8x128xf32>
    %87 = vector.extract_strided_slice %4 {offsets = [0, 10], sizes = [8, 1], strides = [1, 1]} : vector<8x128xf32> to vector<8x1xf32>
    %88 = vector.extract_strided_slice %6 {offsets = [10, 0], sizes = [1, 128], strides = [1, 1]} : vector<128x128xf32> to vector<1x128xf32>
    %89 = vector.broadcast %87 : vector<8x1xf32> to vector<8x128xf32>
    %90 = vector.broadcast %88 : vector<1x128xf32> to vector<8x128xf32>
    %91 = arith.addf %89, %90 : vector<8x128xf32>
    %cst_11 = arith.constant 0.000000e+00 : f32
    %92 = vector.broadcast %cst_11 : f32 to vector<8x128xf32>
    %93 = arith.maximumf %91, %92 : vector<8x128xf32>
    %94 = arith.addf %86, %93 : vector<8x128xf32>
    %95 = vector.extract_strided_slice %4 {offsets = [0, 11], sizes = [8, 1], strides = [1, 1]} : vector<8x128xf32> to vector<8x1xf32>
    %96 = vector.extract_strided_slice %6 {offsets = [11, 0], sizes = [1, 128], strides = [1, 1]} : vector<128x128xf32> to vector<1x128xf32>
    %97 = vector.broadcast %95 : vector<8x1xf32> to vector<8x128xf32>
    %98 = vector.broadcast %96 : vector<1x128xf32> to vector<8x128xf32>
    %99 = arith.addf %97, %98 : vector<8x128xf32>
    %cst_12 = arith.constant 0.000000e+00 : f32
    %100 = vector.broadcast %cst_12 : f32 to vector<8x128xf32>
    %101 = arith.maximumf %99, %100 : vector<8x128xf32>
    %102 = arith.addf %94, %101 : vector<8x128xf32>
    %103 = vector.extract_strided_slice %4 {offsets = [0, 12], sizes = [8, 1], strides = [1, 1]} : vector<8x128xf32> to vector<8x1xf32>
    %104 = vector.extract_strided_slice %6 {offsets = [12, 0], sizes = [1, 128], strides = [1, 1]} : vector<128x128xf32> to vector<1x128xf32>
    %105 = vector.broadcast %103 : vector<8x1xf32> to vector<8x128xf32>
    %106 = vector.broadcast %104 : vector<1x128xf32> to vector<8x128xf32>
    %107 = arith.addf %105, %106 : vector<8x128xf32>
    %cst_13 = arith.constant 0.000000e+00 : f32
    %108 = vector.broadcast %cst_13 : f32 to vector<8x128xf32>
    %109 = arith.maximumf %107, %108 : vector<8x128xf32>
    %110 = arith.addf %102, %109 : vector<8x128xf32>
    %111 = vector.extract_strided_slice %4 {offsets = [0, 13], sizes = [8, 1], strides = [1, 1]} : vector<8x128xf32> to vector<8x1xf32>
    %112 = vector.extract_strided_slice %6 {offsets = [13, 0], sizes = [1, 128], strides = [1, 1]} : vector<128x128xf32> to vector<1x128xf32>
    %113 = vector.broadcast %111 : vector<8x1xf32> to vector<8x128xf32>
    %114 = vector.broadcast %112 : vector<1x128xf32> to vector<8x128xf32>
    %115 = arith.addf %113, %114 : vector<8x128xf32>
    %cst_14 = arith.constant 0.000000e+00 : f32
    %116 = vector.broadcast %cst_14 : f32 to vector<8x128xf32>
    %117 = arith.maximumf %115, %116 : vector<8x128xf32>
    %118 = arith.addf %110, %117 : vector<8x128xf32>
    %119 = vector.extract_strided_slice %4 {offsets = [0, 14], sizes = [8, 1], strides = [1, 1]} : vector<8x128xf32> to vector<8x1xf32>
    %120 = vector.extract_strided_slice %6 {offsets = [14, 0], sizes = [1, 128], strides = [1, 1]} : vector<128x128xf32> to vector<1x128xf32>
    %121 = vector.broadcast %119 : vector<8x1xf32> to vector<8x128xf32>
    %122 = vector.broadcast %120 : vector<1x128xf32> to vector<8x128xf32>
    %123 = arith.addf %121, %122 : vector<8x128xf32>
    %cst_15 = arith.constant 0.000000e+00 : f32
    %124 = vector.broadcast %cst_15 : f32 to vector<8x128xf32>
    %125 = arith.maximumf %123, %124 : vector<8x128xf32>
    %126 = arith.addf %118, %125 : vector<8x128xf32>
    %127 = vector.extract_strided_slice %4 {offsets = [0, 15], sizes = [8, 1], strides = [1, 1]} : vector<8x128xf32> to vector<8x1xf32>
    %128 = vector.extract_strided_slice %6 {offsets = [15, 0], sizes = [1, 128], strides = [1, 1]} : vector<128x128xf32> to vector<1x128xf32>
    %129 = vector.broadcast %127 : vector<8x1xf32> to vector<8x128xf32>
    %130 = vector.broadcast %128 : vector<1x128xf32> to vector<8x128xf32>
    %131 = arith.addf %129, %130 : vector<8x128xf32>
    %cst_16 = arith.constant 0.000000e+00 : f32
    %132 = vector.broadcast %cst_16 : f32 to vector<8x128xf32>
    %133 = arith.maximumf %131, %132 : vector<8x128xf32>
    %134 = arith.addf %126, %133 : vector<8x128xf32>
    %135 = vector.extract_strided_slice %4 {offsets = [0, 16], sizes = [8, 1], strides = [1, 1]} : vector<8x128xf32> to vector<8x1xf32>
    %136 = vector.extract_strided_slice %6 {offsets = [16, 0], sizes = [1, 128], strides = [1, 1]} : vector<128x128xf32> to vector<1x128xf32>
    %137 = vector.broadcast %135 : vector<8x1xf32> to vector<8x128xf32>
    %138 = vector.broadcast %136 : vector<1x128xf32> to vector<8x128xf32>
    %139 = arith.addf %137, %138 : vector<8x128xf32>
    %cst_17 = arith.constant 0.000000e+00 : f32
    %140 = vector.broadcast %cst_17 : f32 to vector<8x128xf32>
    %141 = arith.maximumf %139, %140 : vector<8x128xf32>
    %142 = arith.addf %134, %141 : vector<8x128xf32>
    %143 = vector.extract_strided_slice %4 {offsets = [0, 17], sizes = [8, 1], strides = [1, 1]} : vector<8x128xf32> to vector<8x1xf32>
    %144 = vector.extract_strided_slice %6 {offsets = [17, 0], sizes = [1, 128], strides = [1, 1]} : vector<128x128xf32> to vector<1x128xf32>
    %145 = vector.broadcast %143 : vector<8x1xf32> to vector<8x128xf32>
    %146 = vector.broadcast %144 : vector<1x128xf32> to vector<8x128xf32>
    %147 = arith.addf %145, %146 : vector<8x128xf32>
    %cst_18 = arith.constant 0.000000e+00 : f32
    %148 = vector.broadcast %cst_18 : f32 to vector<8x128xf32>
    %149 = arith.maximumf %147, %148 : vector<8x128xf32>
    %150 = arith.addf %142, %149 : vector<8x128xf32>
    %151 = vector.extract_strided_slice %4 {offsets = [0, 18], sizes = [8, 1], strides = [1, 1]} : vector<8x128xf32> to vector<8x1xf32>
    %152 = vector.extract_strided_slice %6 {offsets = [18, 0], sizes = [1, 128], strides = [1, 1]} : vector<128x128xf32> to vector<1x128xf32>
    %153 = vector.broadcast %151 : vector<8x1xf32> to vector<8x128xf32>
    %154 = vector.broadcast %152 : vector<1x128xf32> to vector<8x128xf32>
    %155 = arith.addf %153, %154 : vector<8x128xf32>
    %cst_19 = arith.constant 0.000000e+00 : f32
    %156 = vector.broadcast %cst_19 : f32 to vector<8x128xf32>
    %157 = arith.maximumf %155, %156 : vector<8x128xf32>
    %158 = arith.addf %150, %157 : vector<8x128xf32>
    %159 = vector.extract_strided_slice %4 {offsets = [0, 19], sizes = [8, 1], strides = [1, 1]} : vector<8x128xf32> to vector<8x1xf32>
    %160 = vector.extract_strided_slice %6 {offsets = [19, 0], sizes = [1, 128], strides = [1, 1]} : vector<128x128xf32> to vector<1x128xf32>
    %161 = vector.broadcast %159 : vector<8x1xf32> to vector<8x128xf32>
    %162 = vector.broadcast %160 : vector<1x128xf32> to vector<8x128xf32>
    %163 = arith.addf %161, %162 : vector<8x128xf32>
    %cst_20 = arith.constant 0.000000e+00 : f32
    %164 = vector.broadcast %cst_20 : f32 to vector<8x128xf32>
    %165 = arith.maximumf %163, %164 : vector<8x128xf32>
    %166 = arith.addf %158, %165 : vector<8x128xf32>
    %167 = vector.extract_strided_slice %4 {offsets = [0, 20], sizes = [8, 1], strides = [1, 1]} : vector<8x128xf32> to vector<8x1xf32>
    %168 = vector.extract_strided_slice %6 {offsets = [20, 0], sizes = [1, 128], strides = [1, 1]} : vector<128x128xf32> to vector<1x128xf32>
    %169 = vector.broadcast %167 : vector<8x1xf32> to vector<8x128xf32>
    %170 = vector.broadcast %168 : vector<1x128xf32> to vector<8x128xf32>
    %171 = arith.addf %169, %170 : vector<8x128xf32>
    %cst_21 = arith.constant 0.000000e+00 : f32
    %172 = vector.broadcast %cst_21 : f32 to vector<8x128xf32>
    %173 = arith.maximumf %171, %172 : vector<8x128xf32>
    %174 = arith.addf %166, %173 : vector<8x128xf32>
    %175 = vector.extract_strided_slice %4 {offsets = [0, 21], sizes = [8, 1], strides = [1, 1]} : vector<8x128xf32> to vector<8x1xf32>
    %176 = vector.extract_strided_slice %6 {offsets = [21, 0], sizes = [1, 128], strides = [1, 1]} : vector<128x128xf32> to vector<1x128xf32>
    %177 = vector.broadcast %175 : vector<8x1xf32> to vector<8x128xf32>
    %178 = vector.broadcast %176 : vector<1x128xf32> to vector<8x128xf32>
    %179 = arith.addf %177, %178 : vector<8x128xf32>
    %cst_22 = arith.constant 0.000000e+00 : f32
    %180 = vector.broadcast %cst_22 : f32 to vector<8x128xf32>
    %181 = arith.maximumf %179, %180 : vector<8x128xf32>
    %182 = arith.addf %174, %181 : vector<8x128xf32>
    %183 = vector.extract_strided_slice %4 {offsets = [0, 22], sizes = [8, 1], strides = [1, 1]} : vector<8x128xf32> to vector<8x1xf32>
    %184 = vector.extract_strided_slice %6 {offsets = [22, 0], sizes = [1, 128], strides = [1, 1]} : vector<128x128xf32> to vector<1x128xf32>
    %185 = vector.broadcast %183 : vector<8x1xf32> to vector<8x128xf32>
    %186 = vector.broadcast %184 : vector<1x128xf32> to vector<8x128xf32>
    %187 = arith.addf %185, %186 : vector<8x128xf32>
    %cst_23 = arith.constant 0.000000e+00 : f32
    %188 = vector.broadcast %cst_23 : f32 to vector<8x128xf32>
    %189 = arith.maximumf %187, %188 : vector<8x128xf32>
    %190 = arith.addf %182, %189 : vector<8x128xf32>
    %191 = vector.extract_strided_slice %4 {offsets = [0, 23], sizes = [8, 1], strides = [1, 1]} : vector<8x128xf32> to vector<8x1xf32>
    %192 = vector.extract_strided_slice %6 {offsets = [23, 0], sizes = [1, 128], strides = [1, 1]} : vector<128x128xf32> to vector<1x128xf32>
    %193 = vector.broadcast %191 : vector<8x1xf32> to vector<8x128xf32>
    %194 = vector.broadcast %192 : vector<1x128xf32> to vector<8x128xf32>
    %195 = arith.addf %193, %194 : vector<8x128xf32>
    %cst_24 = arith.constant 0.000000e+00 : f32
    %196 = vector.broadcast %cst_24 : f32 to vector<8x128xf32>
    %197 = arith.maximumf %195, %196 : vector<8x128xf32>
    %198 = arith.addf %190, %197 : vector<8x128xf32>
    %199 = vector.extract_strided_slice %4 {offsets = [0, 24], sizes = [8, 1], strides = [1, 1]} : vector<8x128xf32> to vector<8x1xf32>
    %200 = vector.extract_strided_slice %6 {offsets = [24, 0], sizes = [1, 128], strides = [1, 1]} : vector<128x128xf32> to vector<1x128xf32>
    %201 = vector.broadcast %199 : vector<8x1xf32> to vector<8x128xf32>
    %202 = vector.broadcast %200 : vector<1x128xf32> to vector<8x128xf32>
    %203 = arith.addf %201, %202 : vector<8x128xf32>
    %cst_25 = arith.constant 0.000000e+00 : f32
    %204 = vector.broadcast %cst_25 : f32 to vector<8x128xf32>
    %205 = arith.maximumf %203, %204 : vector<8x128xf32>
    %206 = arith.addf %198, %205 : vector<8x128xf32>
    %207 = vector.extract_strided_slice %4 {offsets = [0, 25], sizes = [8, 1], strides = [1, 1]} : vector<8x128xf32> to vector<8x1xf32>
    %208 = vector.extract_strided_slice %6 {offsets = [25, 0], sizes = [1, 128], strides = [1, 1]} : vector<128x128xf32> to vector<1x128xf32>
    %209 = vector.broadcast %207 : vector<8x1xf32> to vector<8x128xf32>
    %210 = vector.broadcast %208 : vector<1x128xf32> to vector<8x128xf32>
    %211 = arith.addf %209, %210 : vector<8x128xf32>
    %cst_26 = arith.constant 0.000000e+00 : f32
    %212 = vector.broadcast %cst_26 : f32 to vector<8x128xf32>
    %213 = arith.maximumf %211, %212 : vector<8x128xf32>
    %214 = arith.addf %206, %213 : vector<8x128xf32>
    %215 = vector.extract_strided_slice %4 {offsets = [0, 26], sizes = [8, 1], strides = [1, 1]} : vector<8x128xf32> to vector<8x1xf32>
    %216 = vector.extract_strided_slice %6 {offsets = [26, 0], sizes = [1, 128], strides = [1, 1]} : vector<128x128xf32> to vector<1x128xf32>
    %217 = vector.broadcast %215 : vector<8x1xf32> to vector<8x128xf32>
    %218 = vector.broadcast %216 : vector<1x128xf32> to vector<8x128xf32>
    %219 = arith.addf %217, %218 : vector<8x128xf32>
    %cst_27 = arith.constant 0.000000e+00 : f32
    %220 = vector.broadcast %cst_27 : f32 to vector<8x128xf32>
    %221 = arith.maximumf %219, %220 : vector<8x128xf32>
    %222 = arith.addf %214, %221 : vector<8x128xf32>
    %223 = vector.extract_strided_slice %4 {offsets = [0, 27], sizes = [8, 1], strides = [1, 1]} : vector<8x128xf32> to vector<8x1xf32>
    %224 = vector.extract_strided_slice %6 {offsets = [27, 0], sizes = [1, 128], strides = [1, 1]} : vector<128x128xf32> to vector<1x128xf32>
    %225 = vector.broadcast %223 : vector<8x1xf32> to vector<8x128xf32>
    %226 = vector.broadcast %224 : vector<1x128xf32> to vector<8x128xf32>
    %227 = arith.addf %225, %226 : vector<8x128xf32>
    %cst_28 = arith.constant 0.000000e+00 : f32
    %228 = vector.broadcast %cst_28 : f32 to vector<8x128xf32>
    %229 = arith.maximumf %227, %228 : vector<8x128xf32>
    %230 = arith.addf %222, %229 : vector<8x128xf32>
    %231 = vector.extract_strided_slice %4 {offsets = [0, 28], sizes = [8, 1], strides = [1, 1]} : vector<8x128xf32> to vector<8x1xf32>
    %232 = vector.extract_strided_slice %6 {offsets = [28, 0], sizes = [1, 128], strides = [1, 1]} : vector<128x128xf32> to vector<1x128xf32>
    %233 = vector.broadcast %231 : vector<8x1xf32> to vector<8x128xf32>
    %234 = vector.broadcast %232 : vector<1x128xf32> to vector<8x128xf32>
    %235 = arith.addf %233, %234 : vector<8x128xf32>
    %cst_29 = arith.constant 0.000000e+00 : f32
    %236 = vector.broadcast %cst_29 : f32 to vector<8x128xf32>
    %237 = arith.maximumf %235, %236 : vector<8x128xf32>
    %238 = arith.addf %230, %237 : vector<8x128xf32>
    %239 = vector.extract_strided_slice %4 {offsets = [0, 29], sizes = [8, 1], strides = [1, 1]} : vector<8x128xf32> to vector<8x1xf32>
    %240 = vector.extract_strided_slice %6 {offsets = [29, 0], sizes = [1, 128], strides = [1, 1]} : vector<128x128xf32> to vector<1x128xf32>
    %241 = vector.broadcast %239 : vector<8x1xf32> to vector<8x128xf32>
    %242 = vector.broadcast %240 : vector<1x128xf32> to vector<8x128xf32>
    %243 = arith.addf %241, %242 : vector<8x128xf32>
    %cst_30 = arith.constant 0.000000e+00 : f32
    %244 = vector.broadcast %cst_30 : f32 to vector<8x128xf32>
    %245 = arith.maximumf %243, %244 : vector<8x128xf32>
    %246 = arith.addf %238, %245 : vector<8x128xf32>
    %247 = vector.extract_strided_slice %4 {offsets = [0, 30], sizes = [8, 1], strides = [1, 1]} : vector<8x128xf32> to vector<8x1xf32>
    %248 = vector.extract_strided_slice %6 {offsets = [30, 0], sizes = [1, 128], strides = [1, 1]} : vector<128x128xf32> to vector<1x128xf32>
    %249 = vector.broadcast %247 : vector<8x1xf32> to vector<8x128xf32>
    %250 = vector.broadcast %248 : vector<1x128xf32> to vector<8x128xf32>
    %251 = arith.addf %249, %250 : vector<8x128xf32>
    %cst_31 = arith.constant 0.000000e+00 : f32
    %252 = vector.broadcast %cst_31 : f32 to vector<8x128xf32>
    %253 = arith.maximumf %251, %252 : vector<8x128xf32>
    %254 = arith.addf %246, %253 : vector<8x128xf32>
    %255 = vector.extract_strided_slice %4 {offsets = [0, 31], sizes = [8, 1], strides = [1, 1]} : vector<8x128xf32> to vector<8x1xf32>
    %256 = vector.extract_strided_slice %6 {offsets = [31, 0], sizes = [1, 128], strides = [1, 1]} : vector<128x128xf32> to vector<1x128xf32>
    %257 = vector.broadcast %255 : vector<8x1xf32> to vector<8x128xf32>
    %258 = vector.broadcast %256 : vector<1x128xf32> to vector<8x128xf32>
    %259 = arith.addf %257, %258 : vector<8x128xf32>
    %cst_32 = arith.constant 0.000000e+00 : f32
    %260 = vector.broadcast %cst_32 : f32 to vector<8x128xf32>
    %261 = arith.maximumf %259, %260 : vector<8x128xf32>
    %262 = arith.addf %254, %261 : vector<8x128xf32>
    %263 = vector.extract_strided_slice %4 {offsets = [0, 32], sizes = [8, 1], strides = [1, 1]} : vector<8x128xf32> to vector<8x1xf32>
    %264 = vector.extract_strided_slice %6 {offsets = [32, 0], sizes = [1, 128], strides = [1, 1]} : vector<128x128xf32> to vector<1x128xf32>
    %265 = vector.broadcast %263 : vector<8x1xf32> to vector<8x128xf32>
    %266 = vector.broadcast %264 : vector<1x128xf32> to vector<8x128xf32>
    %267 = arith.addf %265, %266 : vector<8x128xf32>
    %cst_33 = arith.constant 0.000000e+00 : f32
    %268 = vector.broadcast %cst_33 : f32 to vector<8x128xf32>
    %269 = arith.maximumf %267, %268 : vector<8x128xf32>
    %270 = arith.addf %262, %269 : vector<8x128xf32>
    %271 = vector.extract_strided_slice %4 {offsets = [0, 33], sizes = [8, 1], strides = [1, 1]} : vector<8x128xf32> to vector<8x1xf32>
    %272 = vector.extract_strided_slice %6 {offsets = [33, 0], sizes = [1, 128], strides = [1, 1]} : vector<128x128xf32> to vector<1x128xf32>
    %273 = vector.broadcast %271 : vector<8x1xf32> to vector<8x128xf32>
    %274 = vector.broadcast %272 : vector<1x128xf32> to vector<8x128xf32>
    %275 = arith.addf %273, %274 : vector<8x128xf32>
    %cst_34 = arith.constant 0.000000e+00 : f32
    %276 = vector.broadcast %cst_34 : f32 to vector<8x128xf32>
    %277 = arith.maximumf %275, %276 : vector<8x128xf32>
    %278 = arith.addf %270, %277 : vector<8x128xf32>
    %279 = vector.extract_strided_slice %4 {offsets = [0, 34], sizes = [8, 1], strides = [1, 1]} : vector<8x128xf32> to vector<8x1xf32>
    %280 = vector.extract_strided_slice %6 {offsets = [34, 0], sizes = [1, 128], strides = [1, 1]} : vector<128x128xf32> to vector<1x128xf32>
    %281 = vector.broadcast %279 : vector<8x1xf32> to vector<8x128xf32>
    %282 = vector.broadcast %280 : vector<1x128xf32> to vector<8x128xf32>
    %283 = arith.addf %281, %282 : vector<8x128xf32>
    %cst_35 = arith.constant 0.000000e+00 : f32
    %284 = vector.broadcast %cst_35 : f32 to vector<8x128xf32>
    %285 = arith.maximumf %283, %284 : vector<8x128xf32>
    %286 = arith.addf %278, %285 : vector<8x128xf32>
    %287 = vector.extract_strided_slice %4 {offsets = [0, 35], sizes = [8, 1], strides = [1, 1]} : vector<8x128xf32> to vector<8x1xf32>
    %288 = vector.extract_strided_slice %6 {offsets = [35, 0], sizes = [1, 128], strides = [1, 1]} : vector<128x128xf32> to vector<1x128xf32>
    %289 = vector.broadcast %287 : vector<8x1xf32> to vector<8x128xf32>
    %290 = vector.broadcast %288 : vector<1x128xf32> to vector<8x128xf32>
    %291 = arith.addf %289, %290 : vector<8x128xf32>
    %cst_36 = arith.constant 0.000000e+00 : f32
    %292 = vector.broadcast %cst_36 : f32 to vector<8x128xf32>
    %293 = arith.maximumf %291, %292 : vector<8x128xf32>
    %294 = arith.addf %286, %293 : vector<8x128xf32>
    %295 = vector.extract_strided_slice %4 {offsets = [0, 36], sizes = [8, 1], strides = [1, 1]} : vector<8x128xf32> to vector<8x1xf32>
    %296 = vector.extract_strided_slice %6 {offsets = [36, 0], sizes = [1, 128], strides = [1, 1]} : vector<128x128xf32> to vector<1x128xf32>
    %297 = vector.broadcast %295 : vector<8x1xf32> to vector<8x128xf32>
    %298 = vector.broadcast %296 : vector<1x128xf32> to vector<8x128xf32>
    %299 = arith.addf %297, %298 : vector<8x128xf32>
    %cst_37 = arith.constant 0.000000e+00 : f32
    %300 = vector.broadcast %cst_37 : f32 to vector<8x128xf32>
    %301 = arith.maximumf %299, %300 : vector<8x128xf32>
    %302 = arith.addf %294, %301 : vector<8x128xf32>
    %303 = vector.extract_strided_slice %4 {offsets = [0, 37], sizes = [8, 1], strides = [1, 1]} : vector<8x128xf32> to vector<8x1xf32>
    %304 = vector.extract_strided_slice %6 {offsets = [37, 0], sizes = [1, 128], strides = [1, 1]} : vector<128x128xf32> to vector<1x128xf32>
    %305 = vector.broadcast %303 : vector<8x1xf32> to vector<8x128xf32>
    %306 = vector.broadcast %304 : vector<1x128xf32> to vector<8x128xf32>
    %307 = arith.addf %305, %306 : vector<8x128xf32>
    %cst_38 = arith.constant 0.000000e+00 : f32
    %308 = vector.broadcast %cst_38 : f32 to vector<8x128xf32>
    %309 = arith.maximumf %307, %308 : vector<8x128xf32>
    %310 = arith.addf %302, %309 : vector<8x128xf32>
    %311 = vector.extract_strided_slice %4 {offsets = [0, 38], sizes = [8, 1], strides = [1, 1]} : vector<8x128xf32> to vector<8x1xf32>
    %312 = vector.extract_strided_slice %6 {offsets = [38, 0], sizes = [1, 128], strides = [1, 1]} : vector<128x128xf32> to vector<1x128xf32>
    %313 = vector.broadcast %311 : vector<8x1xf32> to vector<8x128xf32>
    %314 = vector.broadcast %312 : vector<1x128xf32> to vector<8x128xf32>
    %315 = arith.addf %313, %314 : vector<8x128xf32>
    %cst_39 = arith.constant 0.000000e+00 : f32
    %316 = vector.broadcast %cst_39 : f32 to vector<8x128xf32>
    %317 = arith.maximumf %315, %316 : vector<8x128xf32>
    %318 = arith.addf %310, %317 : vector<8x128xf32>
    %319 = vector.extract_strided_slice %4 {offsets = [0, 39], sizes = [8, 1], strides = [1, 1]} : vector<8x128xf32> to vector<8x1xf32>
    %320 = vector.extract_strided_slice %6 {offsets = [39, 0], sizes = [1, 128], strides = [1, 1]} : vector<128x128xf32> to vector<1x128xf32>
    %321 = vector.broadcast %319 : vector<8x1xf32> to vector<8x128xf32>
    %322 = vector.broadcast %320 : vector<1x128xf32> to vector<8x128xf32>
    %323 = arith.addf %321, %322 : vector<8x128xf32>
    %cst_40 = arith.constant 0.000000e+00 : f32
    %324 = vector.broadcast %cst_40 : f32 to vector<8x128xf32>
    %325 = arith.maximumf %323, %324 : vector<8x128xf32>
    %326 = arith.addf %318, %325 : vector<8x128xf32>
    %327 = vector.extract_strided_slice %4 {offsets = [0, 40], sizes = [8, 1], strides = [1, 1]} : vector<8x128xf32> to vector<8x1xf32>
    %328 = vector.extract_strided_slice %6 {offsets = [40, 0], sizes = [1, 128], strides = [1, 1]} : vector<128x128xf32> to vector<1x128xf32>
    %329 = vector.broadcast %327 : vector<8x1xf32> to vector<8x128xf32>
    %330 = vector.broadcast %328 : vector<1x128xf32> to vector<8x128xf32>
    %331 = arith.addf %329, %330 : vector<8x128xf32>
    %cst_41 = arith.constant 0.000000e+00 : f32
    %332 = vector.broadcast %cst_41 : f32 to vector<8x128xf32>
    %333 = arith.maximumf %331, %332 : vector<8x128xf32>
    %334 = arith.addf %326, %333 : vector<8x128xf32>
    %335 = vector.extract_strided_slice %4 {offsets = [0, 41], sizes = [8, 1], strides = [1, 1]} : vector<8x128xf32> to vector<8x1xf32>
    %336 = vector.extract_strided_slice %6 {offsets = [41, 0], sizes = [1, 128], strides = [1, 1]} : vector<128x128xf32> to vector<1x128xf32>
    %337 = vector.broadcast %335 : vector<8x1xf32> to vector<8x128xf32>
    %338 = vector.broadcast %336 : vector<1x128xf32> to vector<8x128xf32>
    %339 = arith.addf %337, %338 : vector<8x128xf32>
    %cst_42 = arith.constant 0.000000e+00 : f32
    %340 = vector.broadcast %cst_42 : f32 to vector<8x128xf32>
    %341 = arith.maximumf %339, %340 : vector<8x128xf32>
    %342 = arith.addf %334, %341 : vector<8x128xf32>
    %343 = vector.extract_strided_slice %4 {offsets = [0, 42], sizes = [8, 1], strides = [1, 1]} : vector<8x128xf32> to vector<8x1xf32>
    %344 = vector.extract_strided_slice %6 {offsets = [42, 0], sizes = [1, 128], strides = [1, 1]} : vector<128x128xf32> to vector<1x128xf32>
    %345 = vector.broadcast %343 : vector<8x1xf32> to vector<8x128xf32>
    %346 = vector.broadcast %344 : vector<1x128xf32> to vector<8x128xf32>
    %347 = arith.addf %345, %346 : vector<8x128xf32>
    %cst_43 = arith.constant 0.000000e+00 : f32
    %348 = vector.broadcast %cst_43 : f32 to vector<8x128xf32>
    %349 = arith.maximumf %347, %348 : vector<8x128xf32>
    %350 = arith.addf %342, %349 : vector<8x128xf32>
    %351 = vector.extract_strided_slice %4 {offsets = [0, 43], sizes = [8, 1], strides = [1, 1]} : vector<8x128xf32> to vector<8x1xf32>
    %352 = vector.extract_strided_slice %6 {offsets = [43, 0], sizes = [1, 128], strides = [1, 1]} : vector<128x128xf32> to vector<1x128xf32>
    %353 = vector.broadcast %351 : vector<8x1xf32> to vector<8x128xf32>
    %354 = vector.broadcast %352 : vector<1x128xf32> to vector<8x128xf32>
    %355 = arith.addf %353, %354 : vector<8x128xf32>
    %cst_44 = arith.constant 0.000000e+00 : f32
    %356 = vector.broadcast %cst_44 : f32 to vector<8x128xf32>
    %357 = arith.maximumf %355, %356 : vector<8x128xf32>
    %358 = arith.addf %350, %357 : vector<8x128xf32>
    %359 = vector.extract_strided_slice %4 {offsets = [0, 44], sizes = [8, 1], strides = [1, 1]} : vector<8x128xf32> to vector<8x1xf32>
    %360 = vector.extract_strided_slice %6 {offsets = [44, 0], sizes = [1, 128], strides = [1, 1]} : vector<128x128xf32> to vector<1x128xf32>
    %361 = vector.broadcast %359 : vector<8x1xf32> to vector<8x128xf32>
    %362 = vector.broadcast %360 : vector<1x128xf32> to vector<8x128xf32>
    %363 = arith.addf %361, %362 : vector<8x128xf32>
    %cst_45 = arith.constant 0.000000e+00 : f32
    %364 = vector.broadcast %cst_45 : f32 to vector<8x128xf32>
    %365 = arith.maximumf %363, %364 : vector<8x128xf32>
    %366 = arith.addf %358, %365 : vector<8x128xf32>
    %367 = vector.extract_strided_slice %4 {offsets = [0, 45], sizes = [8, 1], strides = [1, 1]} : vector<8x128xf32> to vector<8x1xf32>
    %368 = vector.extract_strided_slice %6 {offsets = [45, 0], sizes = [1, 128], strides = [1, 1]} : vector<128x128xf32> to vector<1x128xf32>
    %369 = vector.broadcast %367 : vector<8x1xf32> to vector<8x128xf32>
    %370 = vector.broadcast %368 : vector<1x128xf32> to vector<8x128xf32>
    %371 = arith.addf %369, %370 : vector<8x128xf32>
    %cst_46 = arith.constant 0.000000e+00 : f32
    %372 = vector.broadcast %cst_46 : f32 to vector<8x128xf32>
    %373 = arith.maximumf %371, %372 : vector<8x128xf32>
    %374 = arith.addf %366, %373 : vector<8x128xf32>
    %375 = vector.extract_strided_slice %4 {offsets = [0, 46], sizes = [8, 1], strides = [1, 1]} : vector<8x128xf32> to vector<8x1xf32>
    %376 = vector.extract_strided_slice %6 {offsets = [46, 0], sizes = [1, 128], strides = [1, 1]} : vector<128x128xf32> to vector<1x128xf32>
    %377 = vector.broadcast %375 : vector<8x1xf32> to vector<8x128xf32>
    %378 = vector.broadcast %376 : vector<1x128xf32> to vector<8x128xf32>
    %379 = arith.addf %377, %378 : vector<8x128xf32>
    %cst_47 = arith.constant 0.000000e+00 : f32
    %380 = vector.broadcast %cst_47 : f32 to vector<8x128xf32>
    %381 = arith.maximumf %379, %380 : vector<8x128xf32>
    %382 = arith.addf %374, %381 : vector<8x128xf32>
    %383 = vector.extract_strided_slice %4 {offsets = [0, 47], sizes = [8, 1], strides = [1, 1]} : vector<8x128xf32> to vector<8x1xf32>
    %384 = vector.extract_strided_slice %6 {offsets = [47, 0], sizes = [1, 128], strides = [1, 1]} : vector<128x128xf32> to vector<1x128xf32>
    %385 = vector.broadcast %383 : vector<8x1xf32> to vector<8x128xf32>
    %386 = vector.broadcast %384 : vector<1x128xf32> to vector<8x128xf32>
    %387 = arith.addf %385, %386 : vector<8x128xf32>
    %cst_48 = arith.constant 0.000000e+00 : f32
    %388 = vector.broadcast %cst_48 : f32 to vector<8x128xf32>
    %389 = arith.maximumf %387, %388 : vector<8x128xf32>
    %390 = arith.addf %382, %389 : vector<8x128xf32>
    %391 = vector.extract_strided_slice %4 {offsets = [0, 48], sizes = [8, 1], strides = [1, 1]} : vector<8x128xf32> to vector<8x1xf32>
    %392 = vector.extract_strided_slice %6 {offsets = [48, 0], sizes = [1, 128], strides = [1, 1]} : vector<128x128xf32> to vector<1x128xf32>
    %393 = vector.broadcast %391 : vector<8x1xf32> to vector<8x128xf32>
    %394 = vector.broadcast %392 : vector<1x128xf32> to vector<8x128xf32>
    %395 = arith.addf %393, %394 : vector<8x128xf32>
    %cst_49 = arith.constant 0.000000e+00 : f32
    %396 = vector.broadcast %cst_49 : f32 to vector<8x128xf32>
    %397 = arith.maximumf %395, %396 : vector<8x128xf32>
    %398 = arith.addf %390, %397 : vector<8x128xf32>
    %399 = vector.extract_strided_slice %4 {offsets = [0, 49], sizes = [8, 1], strides = [1, 1]} : vector<8x128xf32> to vector<8x1xf32>
    %400 = vector.extract_strided_slice %6 {offsets = [49, 0], sizes = [1, 128], strides = [1, 1]} : vector<128x128xf32> to vector<1x128xf32>
    %401 = vector.broadcast %399 : vector<8x1xf32> to vector<8x128xf32>
    %402 = vector.broadcast %400 : vector<1x128xf32> to vector<8x128xf32>
    %403 = arith.addf %401, %402 : vector<8x128xf32>
    %cst_50 = arith.constant 0.000000e+00 : f32
    %404 = vector.broadcast %cst_50 : f32 to vector<8x128xf32>
    %405 = arith.maximumf %403, %404 : vector<8x128xf32>
    %406 = arith.addf %398, %405 : vector<8x128xf32>
    %407 = vector.extract_strided_slice %4 {offsets = [0, 50], sizes = [8, 1], strides = [1, 1]} : vector<8x128xf32> to vector<8x1xf32>
    %408 = vector.extract_strided_slice %6 {offsets = [50, 0], sizes = [1, 128], strides = [1, 1]} : vector<128x128xf32> to vector<1x128xf32>
    %409 = vector.broadcast %407 : vector<8x1xf32> to vector<8x128xf32>
    %410 = vector.broadcast %408 : vector<1x128xf32> to vector<8x128xf32>
    %411 = arith.addf %409, %410 : vector<8x128xf32>
    %cst_51 = arith.constant 0.000000e+00 : f32
    %412 = vector.broadcast %cst_51 : f32 to vector<8x128xf32>
    %413 = arith.maximumf %411, %412 : vector<8x128xf32>
    %414 = arith.addf %406, %413 : vector<8x128xf32>
    %415 = vector.extract_strided_slice %4 {offsets = [0, 51], sizes = [8, 1], strides = [1, 1]} : vector<8x128xf32> to vector<8x1xf32>
    %416 = vector.extract_strided_slice %6 {offsets = [51, 0], sizes = [1, 128], strides = [1, 1]} : vector<128x128xf32> to vector<1x128xf32>
    %417 = vector.broadcast %415 : vector<8x1xf32> to vector<8x128xf32>
    %418 = vector.broadcast %416 : vector<1x128xf32> to vector<8x128xf32>
    %419 = arith.addf %417, %418 : vector<8x128xf32>
    %cst_52 = arith.constant 0.000000e+00 : f32
    %420 = vector.broadcast %cst_52 : f32 to vector<8x128xf32>
    %421 = arith.maximumf %419, %420 : vector<8x128xf32>
    %422 = arith.addf %414, %421 : vector<8x128xf32>
    %423 = vector.extract_strided_slice %4 {offsets = [0, 52], sizes = [8, 1], strides = [1, 1]} : vector<8x128xf32> to vector<8x1xf32>
    %424 = vector.extract_strided_slice %6 {offsets = [52, 0], sizes = [1, 128], strides = [1, 1]} : vector<128x128xf32> to vector<1x128xf32>
    %425 = vector.broadcast %423 : vector<8x1xf32> to vector<8x128xf32>
    %426 = vector.broadcast %424 : vector<1x128xf32> to vector<8x128xf32>
    %427 = arith.addf %425, %426 : vector<8x128xf32>
    %cst_53 = arith.constant 0.000000e+00 : f32
    %428 = vector.broadcast %cst_53 : f32 to vector<8x128xf32>
    %429 = arith.maximumf %427, %428 : vector<8x128xf32>
    %430 = arith.addf %422, %429 : vector<8x128xf32>
    %431 = vector.extract_strided_slice %4 {offsets = [0, 53], sizes = [8, 1], strides = [1, 1]} : vector<8x128xf32> to vector<8x1xf32>
    %432 = vector.extract_strided_slice %6 {offsets = [53, 0], sizes = [1, 128], strides = [1, 1]} : vector<128x128xf32> to vector<1x128xf32>
    %433 = vector.broadcast %431 : vector<8x1xf32> to vector<8x128xf32>
    %434 = vector.broadcast %432 : vector<1x128xf32> to vector<8x128xf32>
    %435 = arith.addf %433, %434 : vector<8x128xf32>
    %cst_54 = arith.constant 0.000000e+00 : f32
    %436 = vector.broadcast %cst_54 : f32 to vector<8x128xf32>
    %437 = arith.maximumf %435, %436 : vector<8x128xf32>
    %438 = arith.addf %430, %437 : vector<8x128xf32>
    %439 = vector.extract_strided_slice %4 {offsets = [0, 54], sizes = [8, 1], strides = [1, 1]} : vector<8x128xf32> to vector<8x1xf32>
    %440 = vector.extract_strided_slice %6 {offsets = [54, 0], sizes = [1, 128], strides = [1, 1]} : vector<128x128xf32> to vector<1x128xf32>
    %441 = vector.broadcast %439 : vector<8x1xf32> to vector<8x128xf32>
    %442 = vector.broadcast %440 : vector<1x128xf32> to vector<8x128xf32>
    %443 = arith.addf %441, %442 : vector<8x128xf32>
    %cst_55 = arith.constant 0.000000e+00 : f32
    %444 = vector.broadcast %cst_55 : f32 to vector<8x128xf32>
    %445 = arith.maximumf %443, %444 : vector<8x128xf32>
    %446 = arith.addf %438, %445 : vector<8x128xf32>
    %447 = vector.extract_strided_slice %4 {offsets = [0, 55], sizes = [8, 1], strides = [1, 1]} : vector<8x128xf32> to vector<8x1xf32>
    %448 = vector.extract_strided_slice %6 {offsets = [55, 0], sizes = [1, 128], strides = [1, 1]} : vector<128x128xf32> to vector<1x128xf32>
    %449 = vector.broadcast %447 : vector<8x1xf32> to vector<8x128xf32>
    %450 = vector.broadcast %448 : vector<1x128xf32> to vector<8x128xf32>
    %451 = arith.addf %449, %450 : vector<8x128xf32>
    %cst_56 = arith.constant 0.000000e+00 : f32
    %452 = vector.broadcast %cst_56 : f32 to vector<8x128xf32>
    %453 = arith.maximumf %451, %452 : vector<8x128xf32>
    %454 = arith.addf %446, %453 : vector<8x128xf32>
    %455 = vector.extract_strided_slice %4 {offsets = [0, 56], sizes = [8, 1], strides = [1, 1]} : vector<8x128xf32> to vector<8x1xf32>
    %456 = vector.extract_strided_slice %6 {offsets = [56, 0], sizes = [1, 128], strides = [1, 1]} : vector<128x128xf32> to vector<1x128xf32>
    %457 = vector.broadcast %455 : vector<8x1xf32> to vector<8x128xf32>
    %458 = vector.broadcast %456 : vector<1x128xf32> to vector<8x128xf32>
    %459 = arith.addf %457, %458 : vector<8x128xf32>
    %cst_57 = arith.constant 0.000000e+00 : f32
    %460 = vector.broadcast %cst_57 : f32 to vector<8x128xf32>
    %461 = arith.maximumf %459, %460 : vector<8x128xf32>
    %462 = arith.addf %454, %461 : vector<8x128xf32>
    %463 = vector.extract_strided_slice %4 {offsets = [0, 57], sizes = [8, 1], strides = [1, 1]} : vector<8x128xf32> to vector<8x1xf32>
    %464 = vector.extract_strided_slice %6 {offsets = [57, 0], sizes = [1, 128], strides = [1, 1]} : vector<128x128xf32> to vector<1x128xf32>
    %465 = vector.broadcast %463 : vector<8x1xf32> to vector<8x128xf32>
    %466 = vector.broadcast %464 : vector<1x128xf32> to vector<8x128xf32>
    %467 = arith.addf %465, %466 : vector<8x128xf32>
    %cst_58 = arith.constant 0.000000e+00 : f32
    %468 = vector.broadcast %cst_58 : f32 to vector<8x128xf32>
    %469 = arith.maximumf %467, %468 : vector<8x128xf32>
    %470 = arith.addf %462, %469 : vector<8x128xf32>
    %471 = vector.extract_strided_slice %4 {offsets = [0, 58], sizes = [8, 1], strides = [1, 1]} : vector<8x128xf32> to vector<8x1xf32>
    %472 = vector.extract_strided_slice %6 {offsets = [58, 0], sizes = [1, 128], strides = [1, 1]} : vector<128x128xf32> to vector<1x128xf32>
    %473 = vector.broadcast %471 : vector<8x1xf32> to vector<8x128xf32>
    %474 = vector.broadcast %472 : vector<1x128xf32> to vector<8x128xf32>
    %475 = arith.addf %473, %474 : vector<8x128xf32>
    %cst_59 = arith.constant 0.000000e+00 : f32
    %476 = vector.broadcast %cst_59 : f32 to vector<8x128xf32>
    %477 = arith.maximumf %475, %476 : vector<8x128xf32>
    %478 = arith.addf %470, %477 : vector<8x128xf32>
    %479 = vector.extract_strided_slice %4 {offsets = [0, 59], sizes = [8, 1], strides = [1, 1]} : vector<8x128xf32> to vector<8x1xf32>
    %480 = vector.extract_strided_slice %6 {offsets = [59, 0], sizes = [1, 128], strides = [1, 1]} : vector<128x128xf32> to vector<1x128xf32>
    %481 = vector.broadcast %479 : vector<8x1xf32> to vector<8x128xf32>
    %482 = vector.broadcast %480 : vector<1x128xf32> to vector<8x128xf32>
    %483 = arith.addf %481, %482 : vector<8x128xf32>
    %cst_60 = arith.constant 0.000000e+00 : f32
    %484 = vector.broadcast %cst_60 : f32 to vector<8x128xf32>
    %485 = arith.maximumf %483, %484 : vector<8x128xf32>
    %486 = arith.addf %478, %485 : vector<8x128xf32>
    %487 = vector.extract_strided_slice %4 {offsets = [0, 60], sizes = [8, 1], strides = [1, 1]} : vector<8x128xf32> to vector<8x1xf32>
    %488 = vector.extract_strided_slice %6 {offsets = [60, 0], sizes = [1, 128], strides = [1, 1]} : vector<128x128xf32> to vector<1x128xf32>
    %489 = vector.broadcast %487 : vector<8x1xf32> to vector<8x128xf32>
    %490 = vector.broadcast %488 : vector<1x128xf32> to vector<8x128xf32>
    %491 = arith.addf %489, %490 : vector<8x128xf32>
    %cst_61 = arith.constant 0.000000e+00 : f32
    %492 = vector.broadcast %cst_61 : f32 to vector<8x128xf32>
    %493 = arith.maximumf %491, %492 : vector<8x128xf32>
    %494 = arith.addf %486, %493 : vector<8x128xf32>
    %495 = vector.extract_strided_slice %4 {offsets = [0, 61], sizes = [8, 1], strides = [1, 1]} : vector<8x128xf32> to vector<8x1xf32>
    %496 = vector.extract_strided_slice %6 {offsets = [61, 0], sizes = [1, 128], strides = [1, 1]} : vector<128x128xf32> to vector<1x128xf32>
    %497 = vector.broadcast %495 : vector<8x1xf32> to vector<8x128xf32>
    %498 = vector.broadcast %496 : vector<1x128xf32> to vector<8x128xf32>
    %499 = arith.addf %497, %498 : vector<8x128xf32>
    %cst_62 = arith.constant 0.000000e+00 : f32
    %500 = vector.broadcast %cst_62 : f32 to vector<8x128xf32>
    %501 = arith.maximumf %499, %500 : vector<8x128xf32>
    %502 = arith.addf %494, %501 : vector<8x128xf32>
    %503 = vector.extract_strided_slice %4 {offsets = [0, 62], sizes = [8, 1], strides = [1, 1]} : vector<8x128xf32> to vector<8x1xf32>
    %504 = vector.extract_strided_slice %6 {offsets = [62, 0], sizes = [1, 128], strides = [1, 1]} : vector<128x128xf32> to vector<1x128xf32>
    %505 = vector.broadcast %503 : vector<8x1xf32> to vector<8x128xf32>
    %506 = vector.broadcast %504 : vector<1x128xf32> to vector<8x128xf32>
    %507 = arith.addf %505, %506 : vector<8x128xf32>
    %cst_63 = arith.constant 0.000000e+00 : f32
    %508 = vector.broadcast %cst_63 : f32 to vector<8x128xf32>
    %509 = arith.maximumf %507, %508 : vector<8x128xf32>
    %510 = arith.addf %502, %509 : vector<8x128xf32>
    %511 = vector.extract_strided_slice %4 {offsets = [0, 63], sizes = [8, 1], strides = [1, 1]} : vector<8x128xf32> to vector<8x1xf32>
    %512 = vector.extract_strided_slice %6 {offsets = [63, 0], sizes = [1, 128], strides = [1, 1]} : vector<128x128xf32> to vector<1x128xf32>
    %513 = vector.broadcast %511 : vector<8x1xf32> to vector<8x128xf32>
    %514 = vector.broadcast %512 : vector<1x128xf32> to vector<8x128xf32>
    %515 = arith.addf %513, %514 : vector<8x128xf32>
    %cst_64 = arith.constant 0.000000e+00 : f32
    %516 = vector.broadcast %cst_64 : f32 to vector<8x128xf32>
    %517 = arith.maximumf %515, %516 : vector<8x128xf32>
    %518 = arith.addf %510, %517 : vector<8x128xf32>
    %519 = vector.extract_strided_slice %4 {offsets = [0, 64], sizes = [8, 1], strides = [1, 1]} : vector<8x128xf32> to vector<8x1xf32>
    %520 = vector.extract_strided_slice %6 {offsets = [64, 0], sizes = [1, 128], strides = [1, 1]} : vector<128x128xf32> to vector<1x128xf32>
    %521 = vector.broadcast %519 : vector<8x1xf32> to vector<8x128xf32>
    %522 = vector.broadcast %520 : vector<1x128xf32> to vector<8x128xf32>
    %523 = arith.addf %521, %522 : vector<8x128xf32>
    %cst_65 = arith.constant 0.000000e+00 : f32
    %524 = vector.broadcast %cst_65 : f32 to vector<8x128xf32>
    %525 = arith.maximumf %523, %524 : vector<8x128xf32>
    %526 = arith.addf %518, %525 : vector<8x128xf32>
    %527 = vector.extract_strided_slice %4 {offsets = [0, 65], sizes = [8, 1], strides = [1, 1]} : vector<8x128xf32> to vector<8x1xf32>
    %528 = vector.extract_strided_slice %6 {offsets = [65, 0], sizes = [1, 128], strides = [1, 1]} : vector<128x128xf32> to vector<1x128xf32>
    %529 = vector.broadcast %527 : vector<8x1xf32> to vector<8x128xf32>
    %530 = vector.broadcast %528 : vector<1x128xf32> to vector<8x128xf32>
    %531 = arith.addf %529, %530 : vector<8x128xf32>
    %cst_66 = arith.constant 0.000000e+00 : f32
    %532 = vector.broadcast %cst_66 : f32 to vector<8x128xf32>
    %533 = arith.maximumf %531, %532 : vector<8x128xf32>
    %534 = arith.addf %526, %533 : vector<8x128xf32>
    %535 = vector.extract_strided_slice %4 {offsets = [0, 66], sizes = [8, 1], strides = [1, 1]} : vector<8x128xf32> to vector<8x1xf32>
    %536 = vector.extract_strided_slice %6 {offsets = [66, 0], sizes = [1, 128], strides = [1, 1]} : vector<128x128xf32> to vector<1x128xf32>
    %537 = vector.broadcast %535 : vector<8x1xf32> to vector<8x128xf32>
    %538 = vector.broadcast %536 : vector<1x128xf32> to vector<8x128xf32>
    %539 = arith.addf %537, %538 : vector<8x128xf32>
    %cst_67 = arith.constant 0.000000e+00 : f32
    %540 = vector.broadcast %cst_67 : f32 to vector<8x128xf32>
    %541 = arith.maximumf %539, %540 : vector<8x128xf32>
    %542 = arith.addf %534, %541 : vector<8x128xf32>
    %543 = vector.extract_strided_slice %4 {offsets = [0, 67], sizes = [8, 1], strides = [1, 1]} : vector<8x128xf32> to vector<8x1xf32>
    %544 = vector.extract_strided_slice %6 {offsets = [67, 0], sizes = [1, 128], strides = [1, 1]} : vector<128x128xf32> to vector<1x128xf32>
    %545 = vector.broadcast %543 : vector<8x1xf32> to vector<8x128xf32>
    %546 = vector.broadcast %544 : vector<1x128xf32> to vector<8x128xf32>
    %547 = arith.addf %545, %546 : vector<8x128xf32>
    %cst_68 = arith.constant 0.000000e+00 : f32
    %548 = vector.broadcast %cst_68 : f32 to vector<8x128xf32>
    %549 = arith.maximumf %547, %548 : vector<8x128xf32>
    %550 = arith.addf %542, %549 : vector<8x128xf32>
    %551 = vector.extract_strided_slice %4 {offsets = [0, 68], sizes = [8, 1], strides = [1, 1]} : vector<8x128xf32> to vector<8x1xf32>
    %552 = vector.extract_strided_slice %6 {offsets = [68, 0], sizes = [1, 128], strides = [1, 1]} : vector<128x128xf32> to vector<1x128xf32>
    %553 = vector.broadcast %551 : vector<8x1xf32> to vector<8x128xf32>
    %554 = vector.broadcast %552 : vector<1x128xf32> to vector<8x128xf32>
    %555 = arith.addf %553, %554 : vector<8x128xf32>
    %cst_69 = arith.constant 0.000000e+00 : f32
    %556 = vector.broadcast %cst_69 : f32 to vector<8x128xf32>
    %557 = arith.maximumf %555, %556 : vector<8x128xf32>
    %558 = arith.addf %550, %557 : vector<8x128xf32>
    %559 = vector.extract_strided_slice %4 {offsets = [0, 69], sizes = [8, 1], strides = [1, 1]} : vector<8x128xf32> to vector<8x1xf32>
    %560 = vector.extract_strided_slice %6 {offsets = [69, 0], sizes = [1, 128], strides = [1, 1]} : vector<128x128xf32> to vector<1x128xf32>
    %561 = vector.broadcast %559 : vector<8x1xf32> to vector<8x128xf32>
    %562 = vector.broadcast %560 : vector<1x128xf32> to vector<8x128xf32>
    %563 = arith.addf %561, %562 : vector<8x128xf32>
    %cst_70 = arith.constant 0.000000e+00 : f32
    %564 = vector.broadcast %cst_70 : f32 to vector<8x128xf32>
    %565 = arith.maximumf %563, %564 : vector<8x128xf32>
    %566 = arith.addf %558, %565 : vector<8x128xf32>
    %567 = vector.extract_strided_slice %4 {offsets = [0, 70], sizes = [8, 1], strides = [1, 1]} : vector<8x128xf32> to vector<8x1xf32>
    %568 = vector.extract_strided_slice %6 {offsets = [70, 0], sizes = [1, 128], strides = [1, 1]} : vector<128x128xf32> to vector<1x128xf32>
    %569 = vector.broadcast %567 : vector<8x1xf32> to vector<8x128xf32>
    %570 = vector.broadcast %568 : vector<1x128xf32> to vector<8x128xf32>
    %571 = arith.addf %569, %570 : vector<8x128xf32>
    %cst_71 = arith.constant 0.000000e+00 : f32
    %572 = vector.broadcast %cst_71 : f32 to vector<8x128xf32>
    %573 = arith.maximumf %571, %572 : vector<8x128xf32>
    %574 = arith.addf %566, %573 : vector<8x128xf32>
    %575 = vector.extract_strided_slice %4 {offsets = [0, 71], sizes = [8, 1], strides = [1, 1]} : vector<8x128xf32> to vector<8x1xf32>
    %576 = vector.extract_strided_slice %6 {offsets = [71, 0], sizes = [1, 128], strides = [1, 1]} : vector<128x128xf32> to vector<1x128xf32>
    %577 = vector.broadcast %575 : vector<8x1xf32> to vector<8x128xf32>
    %578 = vector.broadcast %576 : vector<1x128xf32> to vector<8x128xf32>
    %579 = arith.addf %577, %578 : vector<8x128xf32>
    %cst_72 = arith.constant 0.000000e+00 : f32
    %580 = vector.broadcast %cst_72 : f32 to vector<8x128xf32>
    %581 = arith.maximumf %579, %580 : vector<8x128xf32>
    %582 = arith.addf %574, %581 : vector<8x128xf32>
    %583 = vector.extract_strided_slice %4 {offsets = [0, 72], sizes = [8, 1], strides = [1, 1]} : vector<8x128xf32> to vector<8x1xf32>
    %584 = vector.extract_strided_slice %6 {offsets = [72, 0], sizes = [1, 128], strides = [1, 1]} : vector<128x128xf32> to vector<1x128xf32>
    %585 = vector.broadcast %583 : vector<8x1xf32> to vector<8x128xf32>
    %586 = vector.broadcast %584 : vector<1x128xf32> to vector<8x128xf32>
    %587 = arith.addf %585, %586 : vector<8x128xf32>
    %cst_73 = arith.constant 0.000000e+00 : f32
    %588 = vector.broadcast %cst_73 : f32 to vector<8x128xf32>
    %589 = arith.maximumf %587, %588 : vector<8x128xf32>
    %590 = arith.addf %582, %589 : vector<8x128xf32>
    %591 = vector.extract_strided_slice %4 {offsets = [0, 73], sizes = [8, 1], strides = [1, 1]} : vector<8x128xf32> to vector<8x1xf32>
    %592 = vector.extract_strided_slice %6 {offsets = [73, 0], sizes = [1, 128], strides = [1, 1]} : vector<128x128xf32> to vector<1x128xf32>
    %593 = vector.broadcast %591 : vector<8x1xf32> to vector<8x128xf32>
    %594 = vector.broadcast %592 : vector<1x128xf32> to vector<8x128xf32>
    %595 = arith.addf %593, %594 : vector<8x128xf32>
    %cst_74 = arith.constant 0.000000e+00 : f32
    %596 = vector.broadcast %cst_74 : f32 to vector<8x128xf32>
    %597 = arith.maximumf %595, %596 : vector<8x128xf32>
    %598 = arith.addf %590, %597 : vector<8x128xf32>
    %599 = vector.extract_strided_slice %4 {offsets = [0, 74], sizes = [8, 1], strides = [1, 1]} : vector<8x128xf32> to vector<8x1xf32>
    %600 = vector.extract_strided_slice %6 {offsets = [74, 0], sizes = [1, 128], strides = [1, 1]} : vector<128x128xf32> to vector<1x128xf32>
    %601 = vector.broadcast %599 : vector<8x1xf32> to vector<8x128xf32>
    %602 = vector.broadcast %600 : vector<1x128xf32> to vector<8x128xf32>
    %603 = arith.addf %601, %602 : vector<8x128xf32>
    %cst_75 = arith.constant 0.000000e+00 : f32
    %604 = vector.broadcast %cst_75 : f32 to vector<8x128xf32>
    %605 = arith.maximumf %603, %604 : vector<8x128xf32>
    %606 = arith.addf %598, %605 : vector<8x128xf32>
    %607 = vector.extract_strided_slice %4 {offsets = [0, 75], sizes = [8, 1], strides = [1, 1]} : vector<8x128xf32> to vector<8x1xf32>
    %608 = vector.extract_strided_slice %6 {offsets = [75, 0], sizes = [1, 128], strides = [1, 1]} : vector<128x128xf32> to vector<1x128xf32>
    %609 = vector.broadcast %607 : vector<8x1xf32> to vector<8x128xf32>
    %610 = vector.broadcast %608 : vector<1x128xf32> to vector<8x128xf32>
    %611 = arith.addf %609, %610 : vector<8x128xf32>
    %cst_76 = arith.constant 0.000000e+00 : f32
    %612 = vector.broadcast %cst_76 : f32 to vector<8x128xf32>
    %613 = arith.maximumf %611, %612 : vector<8x128xf32>
    %614 = arith.addf %606, %613 : vector<8x128xf32>
    %615 = vector.extract_strided_slice %4 {offsets = [0, 76], sizes = [8, 1], strides = [1, 1]} : vector<8x128xf32> to vector<8x1xf32>
    %616 = vector.extract_strided_slice %6 {offsets = [76, 0], sizes = [1, 128], strides = [1, 1]} : vector<128x128xf32> to vector<1x128xf32>
    %617 = vector.broadcast %615 : vector<8x1xf32> to vector<8x128xf32>
    %618 = vector.broadcast %616 : vector<1x128xf32> to vector<8x128xf32>
    %619 = arith.addf %617, %618 : vector<8x128xf32>
    %cst_77 = arith.constant 0.000000e+00 : f32
    %620 = vector.broadcast %cst_77 : f32 to vector<8x128xf32>
    %621 = arith.maximumf %619, %620 : vector<8x128xf32>
    %622 = arith.addf %614, %621 : vector<8x128xf32>
    %623 = vector.extract_strided_slice %4 {offsets = [0, 77], sizes = [8, 1], strides = [1, 1]} : vector<8x128xf32> to vector<8x1xf32>
    %624 = vector.extract_strided_slice %6 {offsets = [77, 0], sizes = [1, 128], strides = [1, 1]} : vector<128x128xf32> to vector<1x128xf32>
    %625 = vector.broadcast %623 : vector<8x1xf32> to vector<8x128xf32>
    %626 = vector.broadcast %624 : vector<1x128xf32> to vector<8x128xf32>
    %627 = arith.addf %625, %626 : vector<8x128xf32>
    %cst_78 = arith.constant 0.000000e+00 : f32
    %628 = vector.broadcast %cst_78 : f32 to vector<8x128xf32>
    %629 = arith.maximumf %627, %628 : vector<8x128xf32>
    %630 = arith.addf %622, %629 : vector<8x128xf32>
    %631 = vector.extract_strided_slice %4 {offsets = [0, 78], sizes = [8, 1], strides = [1, 1]} : vector<8x128xf32> to vector<8x1xf32>
    %632 = vector.extract_strided_slice %6 {offsets = [78, 0], sizes = [1, 128], strides = [1, 1]} : vector<128x128xf32> to vector<1x128xf32>
    %633 = vector.broadcast %631 : vector<8x1xf32> to vector<8x128xf32>
    %634 = vector.broadcast %632 : vector<1x128xf32> to vector<8x128xf32>
    %635 = arith.addf %633, %634 : vector<8x128xf32>
    %cst_79 = arith.constant 0.000000e+00 : f32
    %636 = vector.broadcast %cst_79 : f32 to vector<8x128xf32>
    %637 = arith.maximumf %635, %636 : vector<8x128xf32>
    %638 = arith.addf %630, %637 : vector<8x128xf32>
    %639 = vector.extract_strided_slice %4 {offsets = [0, 79], sizes = [8, 1], strides = [1, 1]} : vector<8x128xf32> to vector<8x1xf32>
    %640 = vector.extract_strided_slice %6 {offsets = [79, 0], sizes = [1, 128], strides = [1, 1]} : vector<128x128xf32> to vector<1x128xf32>
    %641 = vector.broadcast %639 : vector<8x1xf32> to vector<8x128xf32>
    %642 = vector.broadcast %640 : vector<1x128xf32> to vector<8x128xf32>
    %643 = arith.addf %641, %642 : vector<8x128xf32>
    %cst_80 = arith.constant 0.000000e+00 : f32
    %644 = vector.broadcast %cst_80 : f32 to vector<8x128xf32>
    %645 = arith.maximumf %643, %644 : vector<8x128xf32>
    %646 = arith.addf %638, %645 : vector<8x128xf32>
    %647 = vector.extract_strided_slice %4 {offsets = [0, 80], sizes = [8, 1], strides = [1, 1]} : vector<8x128xf32> to vector<8x1xf32>
    %648 = vector.extract_strided_slice %6 {offsets = [80, 0], sizes = [1, 128], strides = [1, 1]} : vector<128x128xf32> to vector<1x128xf32>
    %649 = vector.broadcast %647 : vector<8x1xf32> to vector<8x128xf32>
    %650 = vector.broadcast %648 : vector<1x128xf32> to vector<8x128xf32>
    %651 = arith.addf %649, %650 : vector<8x128xf32>
    %cst_81 = arith.constant 0.000000e+00 : f32
    %652 = vector.broadcast %cst_81 : f32 to vector<8x128xf32>
    %653 = arith.maximumf %651, %652 : vector<8x128xf32>
    %654 = arith.addf %646, %653 : vector<8x128xf32>
    %655 = vector.extract_strided_slice %4 {offsets = [0, 81], sizes = [8, 1], strides = [1, 1]} : vector<8x128xf32> to vector<8x1xf32>
    %656 = vector.extract_strided_slice %6 {offsets = [81, 0], sizes = [1, 128], strides = [1, 1]} : vector<128x128xf32> to vector<1x128xf32>
    %657 = vector.broadcast %655 : vector<8x1xf32> to vector<8x128xf32>
    %658 = vector.broadcast %656 : vector<1x128xf32> to vector<8x128xf32>
    %659 = arith.addf %657, %658 : vector<8x128xf32>
    %cst_82 = arith.constant 0.000000e+00 : f32
    %660 = vector.broadcast %cst_82 : f32 to vector<8x128xf32>
    %661 = arith.maximumf %659, %660 : vector<8x128xf32>
    %662 = arith.addf %654, %661 : vector<8x128xf32>
    %663 = vector.extract_strided_slice %4 {offsets = [0, 82], sizes = [8, 1], strides = [1, 1]} : vector<8x128xf32> to vector<8x1xf32>
    %664 = vector.extract_strided_slice %6 {offsets = [82, 0], sizes = [1, 128], strides = [1, 1]} : vector<128x128xf32> to vector<1x128xf32>
    %665 = vector.broadcast %663 : vector<8x1xf32> to vector<8x128xf32>
    %666 = vector.broadcast %664 : vector<1x128xf32> to vector<8x128xf32>
    %667 = arith.addf %665, %666 : vector<8x128xf32>
    %cst_83 = arith.constant 0.000000e+00 : f32
    %668 = vector.broadcast %cst_83 : f32 to vector<8x128xf32>
    %669 = arith.maximumf %667, %668 : vector<8x128xf32>
    %670 = arith.addf %662, %669 : vector<8x128xf32>
    %671 = vector.extract_strided_slice %4 {offsets = [0, 83], sizes = [8, 1], strides = [1, 1]} : vector<8x128xf32> to vector<8x1xf32>
    %672 = vector.extract_strided_slice %6 {offsets = [83, 0], sizes = [1, 128], strides = [1, 1]} : vector<128x128xf32> to vector<1x128xf32>
    %673 = vector.broadcast %671 : vector<8x1xf32> to vector<8x128xf32>
    %674 = vector.broadcast %672 : vector<1x128xf32> to vector<8x128xf32>
    %675 = arith.addf %673, %674 : vector<8x128xf32>
    %cst_84 = arith.constant 0.000000e+00 : f32
    %676 = vector.broadcast %cst_84 : f32 to vector<8x128xf32>
    %677 = arith.maximumf %675, %676 : vector<8x128xf32>
    %678 = arith.addf %670, %677 : vector<8x128xf32>
    %679 = vector.extract_strided_slice %4 {offsets = [0, 84], sizes = [8, 1], strides = [1, 1]} : vector<8x128xf32> to vector<8x1xf32>
    %680 = vector.extract_strided_slice %6 {offsets = [84, 0], sizes = [1, 128], strides = [1, 1]} : vector<128x128xf32> to vector<1x128xf32>
    %681 = vector.broadcast %679 : vector<8x1xf32> to vector<8x128xf32>
    %682 = vector.broadcast %680 : vector<1x128xf32> to vector<8x128xf32>
    %683 = arith.addf %681, %682 : vector<8x128xf32>
    %cst_85 = arith.constant 0.000000e+00 : f32
    %684 = vector.broadcast %cst_85 : f32 to vector<8x128xf32>
    %685 = arith.maximumf %683, %684 : vector<8x128xf32>
    %686 = arith.addf %678, %685 : vector<8x128xf32>
    %687 = vector.extract_strided_slice %4 {offsets = [0, 85], sizes = [8, 1], strides = [1, 1]} : vector<8x128xf32> to vector<8x1xf32>
    %688 = vector.extract_strided_slice %6 {offsets = [85, 0], sizes = [1, 128], strides = [1, 1]} : vector<128x128xf32> to vector<1x128xf32>
    %689 = vector.broadcast %687 : vector<8x1xf32> to vector<8x128xf32>
    %690 = vector.broadcast %688 : vector<1x128xf32> to vector<8x128xf32>
    %691 = arith.addf %689, %690 : vector<8x128xf32>
    %cst_86 = arith.constant 0.000000e+00 : f32
    %692 = vector.broadcast %cst_86 : f32 to vector<8x128xf32>
    %693 = arith.maximumf %691, %692 : vector<8x128xf32>
    %694 = arith.addf %686, %693 : vector<8x128xf32>
    %695 = vector.extract_strided_slice %4 {offsets = [0, 86], sizes = [8, 1], strides = [1, 1]} : vector<8x128xf32> to vector<8x1xf32>
    %696 = vector.extract_strided_slice %6 {offsets = [86, 0], sizes = [1, 128], strides = [1, 1]} : vector<128x128xf32> to vector<1x128xf32>
    %697 = vector.broadcast %695 : vector<8x1xf32> to vector<8x128xf32>
    %698 = vector.broadcast %696 : vector<1x128xf32> to vector<8x128xf32>
    %699 = arith.addf %697, %698 : vector<8x128xf32>
    %cst_87 = arith.constant 0.000000e+00 : f32
    %700 = vector.broadcast %cst_87 : f32 to vector<8x128xf32>
    %701 = arith.maximumf %699, %700 : vector<8x128xf32>
    %702 = arith.addf %694, %701 : vector<8x128xf32>
    %703 = vector.extract_strided_slice %4 {offsets = [0, 87], sizes = [8, 1], strides = [1, 1]} : vector<8x128xf32> to vector<8x1xf32>
    %704 = vector.extract_strided_slice %6 {offsets = [87, 0], sizes = [1, 128], strides = [1, 1]} : vector<128x128xf32> to vector<1x128xf32>
    %705 = vector.broadcast %703 : vector<8x1xf32> to vector<8x128xf32>
    %706 = vector.broadcast %704 : vector<1x128xf32> to vector<8x128xf32>
    %707 = arith.addf %705, %706 : vector<8x128xf32>
    %cst_88 = arith.constant 0.000000e+00 : f32
    %708 = vector.broadcast %cst_88 : f32 to vector<8x128xf32>
    %709 = arith.maximumf %707, %708 : vector<8x128xf32>
    %710 = arith.addf %702, %709 : vector<8x128xf32>
    %711 = vector.extract_strided_slice %4 {offsets = [0, 88], sizes = [8, 1], strides = [1, 1]} : vector<8x128xf32> to vector<8x1xf32>
    %712 = vector.extract_strided_slice %6 {offsets = [88, 0], sizes = [1, 128], strides = [1, 1]} : vector<128x128xf32> to vector<1x128xf32>
    %713 = vector.broadcast %711 : vector<8x1xf32> to vector<8x128xf32>
    %714 = vector.broadcast %712 : vector<1x128xf32> to vector<8x128xf32>
    %715 = arith.addf %713, %714 : vector<8x128xf32>
    %cst_89 = arith.constant 0.000000e+00 : f32
    %716 = vector.broadcast %cst_89 : f32 to vector<8x128xf32>
    %717 = arith.maximumf %715, %716 : vector<8x128xf32>
    %718 = arith.addf %710, %717 : vector<8x128xf32>
    %719 = vector.extract_strided_slice %4 {offsets = [0, 89], sizes = [8, 1], strides = [1, 1]} : vector<8x128xf32> to vector<8x1xf32>
    %720 = vector.extract_strided_slice %6 {offsets = [89, 0], sizes = [1, 128], strides = [1, 1]} : vector<128x128xf32> to vector<1x128xf32>
    %721 = vector.broadcast %719 : vector<8x1xf32> to vector<8x128xf32>
    %722 = vector.broadcast %720 : vector<1x128xf32> to vector<8x128xf32>
    %723 = arith.addf %721, %722 : vector<8x128xf32>
    %cst_90 = arith.constant 0.000000e+00 : f32
    %724 = vector.broadcast %cst_90 : f32 to vector<8x128xf32>
    %725 = arith.maximumf %723, %724 : vector<8x128xf32>
    %726 = arith.addf %718, %725 : vector<8x128xf32>
    %727 = vector.extract_strided_slice %4 {offsets = [0, 90], sizes = [8, 1], strides = [1, 1]} : vector<8x128xf32> to vector<8x1xf32>
    %728 = vector.extract_strided_slice %6 {offsets = [90, 0], sizes = [1, 128], strides = [1, 1]} : vector<128x128xf32> to vector<1x128xf32>
    %729 = vector.broadcast %727 : vector<8x1xf32> to vector<8x128xf32>
    %730 = vector.broadcast %728 : vector<1x128xf32> to vector<8x128xf32>
    %731 = arith.addf %729, %730 : vector<8x128xf32>
    %cst_91 = arith.constant 0.000000e+00 : f32
    %732 = vector.broadcast %cst_91 : f32 to vector<8x128xf32>
    %733 = arith.maximumf %731, %732 : vector<8x128xf32>
    %734 = arith.addf %726, %733 : vector<8x128xf32>
    %735 = vector.extract_strided_slice %4 {offsets = [0, 91], sizes = [8, 1], strides = [1, 1]} : vector<8x128xf32> to vector<8x1xf32>
    %736 = vector.extract_strided_slice %6 {offsets = [91, 0], sizes = [1, 128], strides = [1, 1]} : vector<128x128xf32> to vector<1x128xf32>
    %737 = vector.broadcast %735 : vector<8x1xf32> to vector<8x128xf32>
    %738 = vector.broadcast %736 : vector<1x128xf32> to vector<8x128xf32>
    %739 = arith.addf %737, %738 : vector<8x128xf32>
    %cst_92 = arith.constant 0.000000e+00 : f32
    %740 = vector.broadcast %cst_92 : f32 to vector<8x128xf32>
    %741 = arith.maximumf %739, %740 : vector<8x128xf32>
    %742 = arith.addf %734, %741 : vector<8x128xf32>
    %743 = vector.extract_strided_slice %4 {offsets = [0, 92], sizes = [8, 1], strides = [1, 1]} : vector<8x128xf32> to vector<8x1xf32>
    %744 = vector.extract_strided_slice %6 {offsets = [92, 0], sizes = [1, 128], strides = [1, 1]} : vector<128x128xf32> to vector<1x128xf32>
    %745 = vector.broadcast %743 : vector<8x1xf32> to vector<8x128xf32>
    %746 = vector.broadcast %744 : vector<1x128xf32> to vector<8x128xf32>
    %747 = arith.addf %745, %746 : vector<8x128xf32>
    %cst_93 = arith.constant 0.000000e+00 : f32
    %748 = vector.broadcast %cst_93 : f32 to vector<8x128xf32>
    %749 = arith.maximumf %747, %748 : vector<8x128xf32>
    %750 = arith.addf %742, %749 : vector<8x128xf32>
    %751 = vector.extract_strided_slice %4 {offsets = [0, 93], sizes = [8, 1], strides = [1, 1]} : vector<8x128xf32> to vector<8x1xf32>
    %752 = vector.extract_strided_slice %6 {offsets = [93, 0], sizes = [1, 128], strides = [1, 1]} : vector<128x128xf32> to vector<1x128xf32>
    %753 = vector.broadcast %751 : vector<8x1xf32> to vector<8x128xf32>
    %754 = vector.broadcast %752 : vector<1x128xf32> to vector<8x128xf32>
    %755 = arith.addf %753, %754 : vector<8x128xf32>
    %cst_94 = arith.constant 0.000000e+00 : f32
    %756 = vector.broadcast %cst_94 : f32 to vector<8x128xf32>
    %757 = arith.maximumf %755, %756 : vector<8x128xf32>
    %758 = arith.addf %750, %757 : vector<8x128xf32>
    %759 = vector.extract_strided_slice %4 {offsets = [0, 94], sizes = [8, 1], strides = [1, 1]} : vector<8x128xf32> to vector<8x1xf32>
    %760 = vector.extract_strided_slice %6 {offsets = [94, 0], sizes = [1, 128], strides = [1, 1]} : vector<128x128xf32> to vector<1x128xf32>
    %761 = vector.broadcast %759 : vector<8x1xf32> to vector<8x128xf32>
    %762 = vector.broadcast %760 : vector<1x128xf32> to vector<8x128xf32>
    %763 = arith.addf %761, %762 : vector<8x128xf32>
    %cst_95 = arith.constant 0.000000e+00 : f32
    %764 = vector.broadcast %cst_95 : f32 to vector<8x128xf32>
    %765 = arith.maximumf %763, %764 : vector<8x128xf32>
    %766 = arith.addf %758, %765 : vector<8x128xf32>
    %767 = vector.extract_strided_slice %4 {offsets = [0, 95], sizes = [8, 1], strides = [1, 1]} : vector<8x128xf32> to vector<8x1xf32>
    %768 = vector.extract_strided_slice %6 {offsets = [95, 0], sizes = [1, 128], strides = [1, 1]} : vector<128x128xf32> to vector<1x128xf32>
    %769 = vector.broadcast %767 : vector<8x1xf32> to vector<8x128xf32>
    %770 = vector.broadcast %768 : vector<1x128xf32> to vector<8x128xf32>
    %771 = arith.addf %769, %770 : vector<8x128xf32>
    %cst_96 = arith.constant 0.000000e+00 : f32
    %772 = vector.broadcast %cst_96 : f32 to vector<8x128xf32>
    %773 = arith.maximumf %771, %772 : vector<8x128xf32>
    %774 = arith.addf %766, %773 : vector<8x128xf32>
    %775 = vector.extract_strided_slice %4 {offsets = [0, 96], sizes = [8, 1], strides = [1, 1]} : vector<8x128xf32> to vector<8x1xf32>
    %776 = vector.extract_strided_slice %6 {offsets = [96, 0], sizes = [1, 128], strides = [1, 1]} : vector<128x128xf32> to vector<1x128xf32>
    %777 = vector.broadcast %775 : vector<8x1xf32> to vector<8x128xf32>
    %778 = vector.broadcast %776 : vector<1x128xf32> to vector<8x128xf32>
    %779 = arith.addf %777, %778 : vector<8x128xf32>
    %cst_97 = arith.constant 0.000000e+00 : f32
    %780 = vector.broadcast %cst_97 : f32 to vector<8x128xf32>
    %781 = arith.maximumf %779, %780 : vector<8x128xf32>
    %782 = arith.addf %774, %781 : vector<8x128xf32>
    %783 = vector.extract_strided_slice %4 {offsets = [0, 97], sizes = [8, 1], strides = [1, 1]} : vector<8x128xf32> to vector<8x1xf32>
    %784 = vector.extract_strided_slice %6 {offsets = [97, 0], sizes = [1, 128], strides = [1, 1]} : vector<128x128xf32> to vector<1x128xf32>
    %785 = vector.broadcast %783 : vector<8x1xf32> to vector<8x128xf32>
    %786 = vector.broadcast %784 : vector<1x128xf32> to vector<8x128xf32>
    %787 = arith.addf %785, %786 : vector<8x128xf32>
    %cst_98 = arith.constant 0.000000e+00 : f32
    %788 = vector.broadcast %cst_98 : f32 to vector<8x128xf32>
    %789 = arith.maximumf %787, %788 : vector<8x128xf32>
    %790 = arith.addf %782, %789 : vector<8x128xf32>
    %791 = vector.extract_strided_slice %4 {offsets = [0, 98], sizes = [8, 1], strides = [1, 1]} : vector<8x128xf32> to vector<8x1xf32>
    %792 = vector.extract_strided_slice %6 {offsets = [98, 0], sizes = [1, 128], strides = [1, 1]} : vector<128x128xf32> to vector<1x128xf32>
    %793 = vector.broadcast %791 : vector<8x1xf32> to vector<8x128xf32>
    %794 = vector.broadcast %792 : vector<1x128xf32> to vector<8x128xf32>
    %795 = arith.addf %793, %794 : vector<8x128xf32>
    %cst_99 = arith.constant 0.000000e+00 : f32
    %796 = vector.broadcast %cst_99 : f32 to vector<8x128xf32>
    %797 = arith.maximumf %795, %796 : vector<8x128xf32>
    %798 = arith.addf %790, %797 : vector<8x128xf32>
    %799 = vector.extract_strided_slice %4 {offsets = [0, 99], sizes = [8, 1], strides = [1, 1]} : vector<8x128xf32> to vector<8x1xf32>
    %800 = vector.extract_strided_slice %6 {offsets = [99, 0], sizes = [1, 128], strides = [1, 1]} : vector<128x128xf32> to vector<1x128xf32>
    %801 = vector.broadcast %799 : vector<8x1xf32> to vector<8x128xf32>
    %802 = vector.broadcast %800 : vector<1x128xf32> to vector<8x128xf32>
    %803 = arith.addf %801, %802 : vector<8x128xf32>
    %cst_100 = arith.constant 0.000000e+00 : f32
    %804 = vector.broadcast %cst_100 : f32 to vector<8x128xf32>
    %805 = arith.maximumf %803, %804 : vector<8x128xf32>
    %806 = arith.addf %798, %805 : vector<8x128xf32>
    %807 = vector.extract_strided_slice %4 {offsets = [0, 100], sizes = [8, 1], strides = [1, 1]} : vector<8x128xf32> to vector<8x1xf32>
    %808 = vector.extract_strided_slice %6 {offsets = [100, 0], sizes = [1, 128], strides = [1, 1]} : vector<128x128xf32> to vector<1x128xf32>
    %809 = vector.broadcast %807 : vector<8x1xf32> to vector<8x128xf32>
    %810 = vector.broadcast %808 : vector<1x128xf32> to vector<8x128xf32>
    %811 = arith.addf %809, %810 : vector<8x128xf32>
    %cst_101 = arith.constant 0.000000e+00 : f32
    %812 = vector.broadcast %cst_101 : f32 to vector<8x128xf32>
    %813 = arith.maximumf %811, %812 : vector<8x128xf32>
    %814 = arith.addf %806, %813 : vector<8x128xf32>
    %815 = vector.extract_strided_slice %4 {offsets = [0, 101], sizes = [8, 1], strides = [1, 1]} : vector<8x128xf32> to vector<8x1xf32>
    %816 = vector.extract_strided_slice %6 {offsets = [101, 0], sizes = [1, 128], strides = [1, 1]} : vector<128x128xf32> to vector<1x128xf32>
    %817 = vector.broadcast %815 : vector<8x1xf32> to vector<8x128xf32>
    %818 = vector.broadcast %816 : vector<1x128xf32> to vector<8x128xf32>
    %819 = arith.addf %817, %818 : vector<8x128xf32>
    %cst_102 = arith.constant 0.000000e+00 : f32
    %820 = vector.broadcast %cst_102 : f32 to vector<8x128xf32>
    %821 = arith.maximumf %819, %820 : vector<8x128xf32>
    %822 = arith.addf %814, %821 : vector<8x128xf32>
    %823 = vector.extract_strided_slice %4 {offsets = [0, 102], sizes = [8, 1], strides = [1, 1]} : vector<8x128xf32> to vector<8x1xf32>
    %824 = vector.extract_strided_slice %6 {offsets = [102, 0], sizes = [1, 128], strides = [1, 1]} : vector<128x128xf32> to vector<1x128xf32>
    %825 = vector.broadcast %823 : vector<8x1xf32> to vector<8x128xf32>
    %826 = vector.broadcast %824 : vector<1x128xf32> to vector<8x128xf32>
    %827 = arith.addf %825, %826 : vector<8x128xf32>
    %cst_103 = arith.constant 0.000000e+00 : f32
    %828 = vector.broadcast %cst_103 : f32 to vector<8x128xf32>
    %829 = arith.maximumf %827, %828 : vector<8x128xf32>
    %830 = arith.addf %822, %829 : vector<8x128xf32>
    %831 = vector.extract_strided_slice %4 {offsets = [0, 103], sizes = [8, 1], strides = [1, 1]} : vector<8x128xf32> to vector<8x1xf32>
    %832 = vector.extract_strided_slice %6 {offsets = [103, 0], sizes = [1, 128], strides = [1, 1]} : vector<128x128xf32> to vector<1x128xf32>
    %833 = vector.broadcast %831 : vector<8x1xf32> to vector<8x128xf32>
    %834 = vector.broadcast %832 : vector<1x128xf32> to vector<8x128xf32>
    %835 = arith.addf %833, %834 : vector<8x128xf32>
    %cst_104 = arith.constant 0.000000e+00 : f32
    %836 = vector.broadcast %cst_104 : f32 to vector<8x128xf32>
    %837 = arith.maximumf %835, %836 : vector<8x128xf32>
    %838 = arith.addf %830, %837 : vector<8x128xf32>
    %839 = vector.extract_strided_slice %4 {offsets = [0, 104], sizes = [8, 1], strides = [1, 1]} : vector<8x128xf32> to vector<8x1xf32>
    %840 = vector.extract_strided_slice %6 {offsets = [104, 0], sizes = [1, 128], strides = [1, 1]} : vector<128x128xf32> to vector<1x128xf32>
    %841 = vector.broadcast %839 : vector<8x1xf32> to vector<8x128xf32>
    %842 = vector.broadcast %840 : vector<1x128xf32> to vector<8x128xf32>
    %843 = arith.addf %841, %842 : vector<8x128xf32>
    %cst_105 = arith.constant 0.000000e+00 : f32
    %844 = vector.broadcast %cst_105 : f32 to vector<8x128xf32>
    %845 = arith.maximumf %843, %844 : vector<8x128xf32>
    %846 = arith.addf %838, %845 : vector<8x128xf32>
    %847 = vector.extract_strided_slice %4 {offsets = [0, 105], sizes = [8, 1], strides = [1, 1]} : vector<8x128xf32> to vector<8x1xf32>
    %848 = vector.extract_strided_slice %6 {offsets = [105, 0], sizes = [1, 128], strides = [1, 1]} : vector<128x128xf32> to vector<1x128xf32>
    %849 = vector.broadcast %847 : vector<8x1xf32> to vector<8x128xf32>
    %850 = vector.broadcast %848 : vector<1x128xf32> to vector<8x128xf32>
    %851 = arith.addf %849, %850 : vector<8x128xf32>
    %cst_106 = arith.constant 0.000000e+00 : f32
    %852 = vector.broadcast %cst_106 : f32 to vector<8x128xf32>
    %853 = arith.maximumf %851, %852 : vector<8x128xf32>
    %854 = arith.addf %846, %853 : vector<8x128xf32>
    %855 = vector.extract_strided_slice %4 {offsets = [0, 106], sizes = [8, 1], strides = [1, 1]} : vector<8x128xf32> to vector<8x1xf32>
    %856 = vector.extract_strided_slice %6 {offsets = [106, 0], sizes = [1, 128], strides = [1, 1]} : vector<128x128xf32> to vector<1x128xf32>
    %857 = vector.broadcast %855 : vector<8x1xf32> to vector<8x128xf32>
    %858 = vector.broadcast %856 : vector<1x128xf32> to vector<8x128xf32>
    %859 = arith.addf %857, %858 : vector<8x128xf32>
    %cst_107 = arith.constant 0.000000e+00 : f32
    %860 = vector.broadcast %cst_107 : f32 to vector<8x128xf32>
    %861 = arith.maximumf %859, %860 : vector<8x128xf32>
    %862 = arith.addf %854, %861 : vector<8x128xf32>
    %863 = vector.extract_strided_slice %4 {offsets = [0, 107], sizes = [8, 1], strides = [1, 1]} : vector<8x128xf32> to vector<8x1xf32>
    %864 = vector.extract_strided_slice %6 {offsets = [107, 0], sizes = [1, 128], strides = [1, 1]} : vector<128x128xf32> to vector<1x128xf32>
    %865 = vector.broadcast %863 : vector<8x1xf32> to vector<8x128xf32>
    %866 = vector.broadcast %864 : vector<1x128xf32> to vector<8x128xf32>
    %867 = arith.addf %865, %866 : vector<8x128xf32>
    %cst_108 = arith.constant 0.000000e+00 : f32
    %868 = vector.broadcast %cst_108 : f32 to vector<8x128xf32>
    %869 = arith.maximumf %867, %868 : vector<8x128xf32>
    %870 = arith.addf %862, %869 : vector<8x128xf32>
    %871 = vector.extract_strided_slice %4 {offsets = [0, 108], sizes = [8, 1], strides = [1, 1]} : vector<8x128xf32> to vector<8x1xf32>
    %872 = vector.extract_strided_slice %6 {offsets = [108, 0], sizes = [1, 128], strides = [1, 1]} : vector<128x128xf32> to vector<1x128xf32>
    %873 = vector.broadcast %871 : vector<8x1xf32> to vector<8x128xf32>
    %874 = vector.broadcast %872 : vector<1x128xf32> to vector<8x128xf32>
    %875 = arith.addf %873, %874 : vector<8x128xf32>
    %cst_109 = arith.constant 0.000000e+00 : f32
    %876 = vector.broadcast %cst_109 : f32 to vector<8x128xf32>
    %877 = arith.maximumf %875, %876 : vector<8x128xf32>
    %878 = arith.addf %870, %877 : vector<8x128xf32>
    %879 = vector.extract_strided_slice %4 {offsets = [0, 109], sizes = [8, 1], strides = [1, 1]} : vector<8x128xf32> to vector<8x1xf32>
    %880 = vector.extract_strided_slice %6 {offsets = [109, 0], sizes = [1, 128], strides = [1, 1]} : vector<128x128xf32> to vector<1x128xf32>
    %881 = vector.broadcast %879 : vector<8x1xf32> to vector<8x128xf32>
    %882 = vector.broadcast %880 : vector<1x128xf32> to vector<8x128xf32>
    %883 = arith.addf %881, %882 : vector<8x128xf32>
    %cst_110 = arith.constant 0.000000e+00 : f32
    %884 = vector.broadcast %cst_110 : f32 to vector<8x128xf32>
    %885 = arith.maximumf %883, %884 : vector<8x128xf32>
    %886 = arith.addf %878, %885 : vector<8x128xf32>
    %887 = vector.extract_strided_slice %4 {offsets = [0, 110], sizes = [8, 1], strides = [1, 1]} : vector<8x128xf32> to vector<8x1xf32>
    %888 = vector.extract_strided_slice %6 {offsets = [110, 0], sizes = [1, 128], strides = [1, 1]} : vector<128x128xf32> to vector<1x128xf32>
    %889 = vector.broadcast %887 : vector<8x1xf32> to vector<8x128xf32>
    %890 = vector.broadcast %888 : vector<1x128xf32> to vector<8x128xf32>
    %891 = arith.addf %889, %890 : vector<8x128xf32>
    %cst_111 = arith.constant 0.000000e+00 : f32
    %892 = vector.broadcast %cst_111 : f32 to vector<8x128xf32>
    %893 = arith.maximumf %891, %892 : vector<8x128xf32>
    %894 = arith.addf %886, %893 : vector<8x128xf32>
    %895 = vector.extract_strided_slice %4 {offsets = [0, 111], sizes = [8, 1], strides = [1, 1]} : vector<8x128xf32> to vector<8x1xf32>
    %896 = vector.extract_strided_slice %6 {offsets = [111, 0], sizes = [1, 128], strides = [1, 1]} : vector<128x128xf32> to vector<1x128xf32>
    %897 = vector.broadcast %895 : vector<8x1xf32> to vector<8x128xf32>
    %898 = vector.broadcast %896 : vector<1x128xf32> to vector<8x128xf32>
    %899 = arith.addf %897, %898 : vector<8x128xf32>
    %cst_112 = arith.constant 0.000000e+00 : f32
    %900 = vector.broadcast %cst_112 : f32 to vector<8x128xf32>
    %901 = arith.maximumf %899, %900 : vector<8x128xf32>
    %902 = arith.addf %894, %901 : vector<8x128xf32>
    %903 = vector.extract_strided_slice %4 {offsets = [0, 112], sizes = [8, 1], strides = [1, 1]} : vector<8x128xf32> to vector<8x1xf32>
    %904 = vector.extract_strided_slice %6 {offsets = [112, 0], sizes = [1, 128], strides = [1, 1]} : vector<128x128xf32> to vector<1x128xf32>
    %905 = vector.broadcast %903 : vector<8x1xf32> to vector<8x128xf32>
    %906 = vector.broadcast %904 : vector<1x128xf32> to vector<8x128xf32>
    %907 = arith.addf %905, %906 : vector<8x128xf32>
    %cst_113 = arith.constant 0.000000e+00 : f32
    %908 = vector.broadcast %cst_113 : f32 to vector<8x128xf32>
    %909 = arith.maximumf %907, %908 : vector<8x128xf32>
    %910 = arith.addf %902, %909 : vector<8x128xf32>
    %911 = vector.extract_strided_slice %4 {offsets = [0, 113], sizes = [8, 1], strides = [1, 1]} : vector<8x128xf32> to vector<8x1xf32>
    %912 = vector.extract_strided_slice %6 {offsets = [113, 0], sizes = [1, 128], strides = [1, 1]} : vector<128x128xf32> to vector<1x128xf32>
    %913 = vector.broadcast %911 : vector<8x1xf32> to vector<8x128xf32>
    %914 = vector.broadcast %912 : vector<1x128xf32> to vector<8x128xf32>
    %915 = arith.addf %913, %914 : vector<8x128xf32>
    %cst_114 = arith.constant 0.000000e+00 : f32
    %916 = vector.broadcast %cst_114 : f32 to vector<8x128xf32>
    %917 = arith.maximumf %915, %916 : vector<8x128xf32>
    %918 = arith.addf %910, %917 : vector<8x128xf32>
    %919 = vector.extract_strided_slice %4 {offsets = [0, 114], sizes = [8, 1], strides = [1, 1]} : vector<8x128xf32> to vector<8x1xf32>
    %920 = vector.extract_strided_slice %6 {offsets = [114, 0], sizes = [1, 128], strides = [1, 1]} : vector<128x128xf32> to vector<1x128xf32>
    %921 = vector.broadcast %919 : vector<8x1xf32> to vector<8x128xf32>
    %922 = vector.broadcast %920 : vector<1x128xf32> to vector<8x128xf32>
    %923 = arith.addf %921, %922 : vector<8x128xf32>
    %cst_115 = arith.constant 0.000000e+00 : f32
    %924 = vector.broadcast %cst_115 : f32 to vector<8x128xf32>
    %925 = arith.maximumf %923, %924 : vector<8x128xf32>
    %926 = arith.addf %918, %925 : vector<8x128xf32>
    %927 = vector.extract_strided_slice %4 {offsets = [0, 115], sizes = [8, 1], strides = [1, 1]} : vector<8x128xf32> to vector<8x1xf32>
    %928 = vector.extract_strided_slice %6 {offsets = [115, 0], sizes = [1, 128], strides = [1, 1]} : vector<128x128xf32> to vector<1x128xf32>
    %929 = vector.broadcast %927 : vector<8x1xf32> to vector<8x128xf32>
    %930 = vector.broadcast %928 : vector<1x128xf32> to vector<8x128xf32>
    %931 = arith.addf %929, %930 : vector<8x128xf32>
    %cst_116 = arith.constant 0.000000e+00 : f32
    %932 = vector.broadcast %cst_116 : f32 to vector<8x128xf32>
    %933 = arith.maximumf %931, %932 : vector<8x128xf32>
    %934 = arith.addf %926, %933 : vector<8x128xf32>
    %935 = vector.extract_strided_slice %4 {offsets = [0, 116], sizes = [8, 1], strides = [1, 1]} : vector<8x128xf32> to vector<8x1xf32>
    %936 = vector.extract_strided_slice %6 {offsets = [116, 0], sizes = [1, 128], strides = [1, 1]} : vector<128x128xf32> to vector<1x128xf32>
    %937 = vector.broadcast %935 : vector<8x1xf32> to vector<8x128xf32>
    %938 = vector.broadcast %936 : vector<1x128xf32> to vector<8x128xf32>
    %939 = arith.addf %937, %938 : vector<8x128xf32>
    %cst_117 = arith.constant 0.000000e+00 : f32
    %940 = vector.broadcast %cst_117 : f32 to vector<8x128xf32>
    %941 = arith.maximumf %939, %940 : vector<8x128xf32>
    %942 = arith.addf %934, %941 : vector<8x128xf32>
    %943 = vector.extract_strided_slice %4 {offsets = [0, 117], sizes = [8, 1], strides = [1, 1]} : vector<8x128xf32> to vector<8x1xf32>
    %944 = vector.extract_strided_slice %6 {offsets = [117, 0], sizes = [1, 128], strides = [1, 1]} : vector<128x128xf32> to vector<1x128xf32>
    %945 = vector.broadcast %943 : vector<8x1xf32> to vector<8x128xf32>
    %946 = vector.broadcast %944 : vector<1x128xf32> to vector<8x128xf32>
    %947 = arith.addf %945, %946 : vector<8x128xf32>
    %cst_118 = arith.constant 0.000000e+00 : f32
    %948 = vector.broadcast %cst_118 : f32 to vector<8x128xf32>
    %949 = arith.maximumf %947, %948 : vector<8x128xf32>
    %950 = arith.addf %942, %949 : vector<8x128xf32>
    %951 = vector.extract_strided_slice %4 {offsets = [0, 118], sizes = [8, 1], strides = [1, 1]} : vector<8x128xf32> to vector<8x1xf32>
    %952 = vector.extract_strided_slice %6 {offsets = [118, 0], sizes = [1, 128], strides = [1, 1]} : vector<128x128xf32> to vector<1x128xf32>
    %953 = vector.broadcast %951 : vector<8x1xf32> to vector<8x128xf32>
    %954 = vector.broadcast %952 : vector<1x128xf32> to vector<8x128xf32>
    %955 = arith.addf %953, %954 : vector<8x128xf32>
    %cst_119 = arith.constant 0.000000e+00 : f32
    %956 = vector.broadcast %cst_119 : f32 to vector<8x128xf32>
    %957 = arith.maximumf %955, %956 : vector<8x128xf32>
    %958 = arith.addf %950, %957 : vector<8x128xf32>
    %959 = vector.extract_strided_slice %4 {offsets = [0, 119], sizes = [8, 1], strides = [1, 1]} : vector<8x128xf32> to vector<8x1xf32>
    %960 = vector.extract_strided_slice %6 {offsets = [119, 0], sizes = [1, 128], strides = [1, 1]} : vector<128x128xf32> to vector<1x128xf32>
    %961 = vector.broadcast %959 : vector<8x1xf32> to vector<8x128xf32>
    %962 = vector.broadcast %960 : vector<1x128xf32> to vector<8x128xf32>
    %963 = arith.addf %961, %962 : vector<8x128xf32>
    %cst_120 = arith.constant 0.000000e+00 : f32
    %964 = vector.broadcast %cst_120 : f32 to vector<8x128xf32>
    %965 = arith.maximumf %963, %964 : vector<8x128xf32>
    %966 = arith.addf %958, %965 : vector<8x128xf32>
    %967 = vector.extract_strided_slice %4 {offsets = [0, 120], sizes = [8, 1], strides = [1, 1]} : vector<8x128xf32> to vector<8x1xf32>
    %968 = vector.extract_strided_slice %6 {offsets = [120, 0], sizes = [1, 128], strides = [1, 1]} : vector<128x128xf32> to vector<1x128xf32>
    %969 = vector.broadcast %967 : vector<8x1xf32> to vector<8x128xf32>
    %970 = vector.broadcast %968 : vector<1x128xf32> to vector<8x128xf32>
    %971 = arith.addf %969, %970 : vector<8x128xf32>
    %cst_121 = arith.constant 0.000000e+00 : f32
    %972 = vector.broadcast %cst_121 : f32 to vector<8x128xf32>
    %973 = arith.maximumf %971, %972 : vector<8x128xf32>
    %974 = arith.addf %966, %973 : vector<8x128xf32>
    %975 = vector.extract_strided_slice %4 {offsets = [0, 121], sizes = [8, 1], strides = [1, 1]} : vector<8x128xf32> to vector<8x1xf32>
    %976 = vector.extract_strided_slice %6 {offsets = [121, 0], sizes = [1, 128], strides = [1, 1]} : vector<128x128xf32> to vector<1x128xf32>
    %977 = vector.broadcast %975 : vector<8x1xf32> to vector<8x128xf32>
    %978 = vector.broadcast %976 : vector<1x128xf32> to vector<8x128xf32>
    %979 = arith.addf %977, %978 : vector<8x128xf32>
    %cst_122 = arith.constant 0.000000e+00 : f32
    %980 = vector.broadcast %cst_122 : f32 to vector<8x128xf32>
    %981 = arith.maximumf %979, %980 : vector<8x128xf32>
    %982 = arith.addf %974, %981 : vector<8x128xf32>
    %983 = vector.extract_strided_slice %4 {offsets = [0, 122], sizes = [8, 1], strides = [1, 1]} : vector<8x128xf32> to vector<8x1xf32>
    %984 = vector.extract_strided_slice %6 {offsets = [122, 0], sizes = [1, 128], strides = [1, 1]} : vector<128x128xf32> to vector<1x128xf32>
    %985 = vector.broadcast %983 : vector<8x1xf32> to vector<8x128xf32>
    %986 = vector.broadcast %984 : vector<1x128xf32> to vector<8x128xf32>
    %987 = arith.addf %985, %986 : vector<8x128xf32>
    %cst_123 = arith.constant 0.000000e+00 : f32
    %988 = vector.broadcast %cst_123 : f32 to vector<8x128xf32>
    %989 = arith.maximumf %987, %988 : vector<8x128xf32>
    %990 = arith.addf %982, %989 : vector<8x128xf32>
    %991 = vector.extract_strided_slice %4 {offsets = [0, 123], sizes = [8, 1], strides = [1, 1]} : vector<8x128xf32> to vector<8x1xf32>
    %992 = vector.extract_strided_slice %6 {offsets = [123, 0], sizes = [1, 128], strides = [1, 1]} : vector<128x128xf32> to vector<1x128xf32>
    %993 = vector.broadcast %991 : vector<8x1xf32> to vector<8x128xf32>
    %994 = vector.broadcast %992 : vector<1x128xf32> to vector<8x128xf32>
    %995 = arith.addf %993, %994 : vector<8x128xf32>
    %cst_124 = arith.constant 0.000000e+00 : f32
    %996 = vector.broadcast %cst_124 : f32 to vector<8x128xf32>
    %997 = arith.maximumf %995, %996 : vector<8x128xf32>
    %998 = arith.addf %990, %997 : vector<8x128xf32>
    %999 = vector.extract_strided_slice %4 {offsets = [0, 124], sizes = [8, 1], strides = [1, 1]} : vector<8x128xf32> to vector<8x1xf32>
    %1000 = vector.extract_strided_slice %6 {offsets = [124, 0], sizes = [1, 128], strides = [1, 1]} : vector<128x128xf32> to vector<1x128xf32>
    %1001 = vector.broadcast %999 : vector<8x1xf32> to vector<8x128xf32>
    %1002 = vector.broadcast %1000 : vector<1x128xf32> to vector<8x128xf32>
    %1003 = arith.addf %1001, %1002 : vector<8x128xf32>
    %cst_125 = arith.constant 0.000000e+00 : f32
    %1004 = vector.broadcast %cst_125 : f32 to vector<8x128xf32>
    %1005 = arith.maximumf %1003, %1004 : vector<8x128xf32>
    %1006 = arith.addf %998, %1005 : vector<8x128xf32>
    %1007 = vector.extract_strided_slice %4 {offsets = [0, 125], sizes = [8, 1], strides = [1, 1]} : vector<8x128xf32> to vector<8x1xf32>
    %1008 = vector.extract_strided_slice %6 {offsets = [125, 0], sizes = [1, 128], strides = [1, 1]} : vector<128x128xf32> to vector<1x128xf32>
    %1009 = vector.broadcast %1007 : vector<8x1xf32> to vector<8x128xf32>
    %1010 = vector.broadcast %1008 : vector<1x128xf32> to vector<8x128xf32>
    %1011 = arith.addf %1009, %1010 : vector<8x128xf32>
    %cst_126 = arith.constant 0.000000e+00 : f32
    %1012 = vector.broadcast %cst_126 : f32 to vector<8x128xf32>
    %1013 = arith.maximumf %1011, %1012 : vector<8x128xf32>
    %1014 = arith.addf %1006, %1013 : vector<8x128xf32>
    %1015 = vector.extract_strided_slice %4 {offsets = [0, 126], sizes = [8, 1], strides = [1, 1]} : vector<8x128xf32> to vector<8x1xf32>
    %1016 = vector.extract_strided_slice %6 {offsets = [126, 0], sizes = [1, 128], strides = [1, 1]} : vector<128x128xf32> to vector<1x128xf32>
    %1017 = vector.broadcast %1015 : vector<8x1xf32> to vector<8x128xf32>
    %1018 = vector.broadcast %1016 : vector<1x128xf32> to vector<8x128xf32>
    %1019 = arith.addf %1017, %1018 : vector<8x128xf32>
    %cst_127 = arith.constant 0.000000e+00 : f32
    %1020 = vector.broadcast %cst_127 : f32 to vector<8x128xf32>
    %1021 = arith.maximumf %1019, %1020 : vector<8x128xf32>
    %1022 = arith.addf %1014, %1021 : vector<8x128xf32>
    %1023 = vector.extract_strided_slice %4 {offsets = [0, 127], sizes = [8, 1], strides = [1, 1]} : vector<8x128xf32> to vector<8x1xf32>
    %1024 = vector.extract_strided_slice %6 {offsets = [127, 0], sizes = [1, 128], strides = [1, 1]} : vector<128x128xf32> to vector<1x128xf32>
    %1025 = vector.broadcast %1023 : vector<8x1xf32> to vector<8x128xf32>
    %1026 = vector.broadcast %1024 : vector<1x128xf32> to vector<8x128xf32>
    %1027 = arith.addf %1025, %1026 : vector<8x128xf32>
    %cst_128 = arith.constant 0.000000e+00 : f32
    %1028 = vector.broadcast %cst_128 : f32 to vector<8x128xf32>
    %1029 = arith.maximumf %1027, %1028 : vector<8x128xf32>
    %1030 = arith.addf %1022, %1029 : vector<8x128xf32>
    %c1_i32 = arith.constant 1 : i32
    %c0_i32_129 = arith.constant 0 : i32
    %1031 = arith.cmpi eq, %arg2, %c0_i32_129 : i32
    %1032 = arith.extui %1031 : i1 to i32
    %c0_i32_130 = arith.constant 0 : i32
    %1033 = arith.cmpi ne, %1032, %c0_i32_130 : i32
    scf.if %1033 {
      %c0_135 = arith.constant 0 : index
      %c0_136 = arith.constant 0 : index
      %1040 = vector.load %arg6[%c0_135, %c0_136] : memref<8x128xf32, #tpu.memory_space<vmem>>, vector<8x128xf32>
      tpu.vector_store %arg6[%c0_135, %c0_136], %1030 {strides = array<i32>} : memref<8x128xf32, #tpu.memory_space<vmem>>, vector<8x128xf32>,
    } else {
    }
    %c0_i32_131 = arith.constant 0 : i32
    %1034 = arith.cmpi sgt, %arg2, %c0_i32_131 : i32
    %1035 = arith.extui %1034 : i1 to i32
    %c0_i32_132 = arith.constant 0 : i32
    %1036 = arith.cmpi ne, %1035, %c0_i32_132 : i32
    scf.if %1036 {
      %c0_135 = arith.constant 0 : index
      %c0_136 = arith.constant 0 : index
      %1040 = vector.load %arg6[%c0_135, %c0_136] : memref<8x128xf32, #tpu.memory_space<vmem>>, vector<8x128xf32>
      %1041 = arith.addf %1040, %1030 : vector<8x128xf32>
      %c0_137 = arith.constant 0 : index
      %c0_138 = arith.constant 0 : index
      %1042 = vector.load %arg6[%c0_137, %c0_138] : memref<8x128xf32, #tpu.memory_space<vmem>>, vector<8x128xf32>
      tpu.vector_store %arg6[%c0_137, %c0_138], %1041 {strides = array<i32>} : memref<8x128xf32, #tpu.memory_space<vmem>>, vector<8x128xf32>,
    } else {
    }
    %c0_i32_133 = arith.constant 0 : i32
    %1037 = arith.cmpi eq, %arg2, %c0_i32_133 : i32
    %1038 = arith.extui %1037 : i1 to i32
    %c0_i32_134 = arith.constant 0 : i32
    %1039 = arith.cmpi ne, %1038, %c0_i32_134 : i32
    scf.if %1039 {
      %c0_135 = arith.constant 0 : index
      %c0_136 = arith.constant 0 : index
      %1040 = vector.load %arg6[%c0_135, %c0_136] : memref<8x128xf32, #tpu.memory_space<vmem>>, vector<8x128xf32>
      %c0_137 = arith.constant 0 : index
      %c0_138 = arith.constant 0 : index
      %1041 = vector.load %arg5[%c0_137, %c0_138] : memref<8x128xf32, #tpu.memory_space<vmem>>, vector<8x128xf32>
      tpu.vector_store %arg5[%c0_137, %c0_138], %1040 {strides = array<i32>} : memref<8x128xf32, #tpu.memory_space<vmem>>, vector<8x128xf32>,
    } else {
    }
    return
  }
  func.func @transform_0(%arg0: i32, %arg1: i32, %arg2: i32) -> (i32, i32) {
    %c0_i32 = arith.constant 0 : i32
    return %arg0, %arg2 : i32, i32
  }
  func.func @transform_1(%arg0: i32, %arg1: i32, %arg2: i32) -> (i32, i32) {
    %c0_i32 = arith.constant 0 : i32
    return %arg2, %arg1 : i32, i32
  }
  func.func @transform_2(%arg0: i32, %arg1: i32, %arg2: i32) -> (i32, i32) {
    %c0_i32 = arith.constant 0 : i32
    return %arg0, %arg1 : i32, i32
  }
}

</mosaic_0001>

<bundles_post_ra>
// kernel: tpu_custom_call.1
= control target key start
LH: loop header
LB: loop body
LE: loop exit
PB: predicated region body
PF: predicated region fallthrough
CT: control target
= control target key end

     0   :  { %7 = vsyncpa [#allocation4], 0  ;;  %s2401_s0 = inlined_call_operand.hbm [shape: f32[8,128], index: 0, kind: input, shape index: {}]   ;;  %s2402_s1 = inlined_call_operand.hbm [shape: f32[128,128], index: 1, kind: input, shape index: {}]   ;;  %s2403_s2 = inlined_call_operand.hbm [shape: f32[8,128], index: 2, kind: output, shape index: {}]  }
   0x1   :  { %8 = vsyncpa [#allocation7], 0 }
   0x2   :  { %9 = vsyncpa [#allocation5], 0  ;;  %s1832_s9 = smov [#allocation3]   ;;  %s1833_s11 = smov [#allocation6]  }
   0x3   :  { %s16_s10 = sshll.u32 %s1832_s9, 4  ;;  %s25_s12 = sshll.u32 %s1833_s11, 4  ;;  %s17_s10 = int_to_ptr.vmem [resolvable:$true] %s16_s10  ;;  %s1980_s12 = int_to_ptr.vmem [resolvable:$true] %s25_s12 }
   0x4   :  { %s1760_s15 = scalar_lea.hbm %s2401_s0, 128 }
   0x5   :  { %p1761_p0 = scmp.ne.s32.totalorder %s2401_s0, %s1760_s15  ;;  %p1764_p1 = scmp.lt.u32.totalorder %s1760_s15, %s2401_s0 }
   0x7   :  { %p1766_p2 = pnand %p1764_p1, %p1761_p0 }
   0x9   :  { %1769 = shalt.err (!%p1766_p2)
}
   0xa   :  { %s1770_s20 = scalar_lea.vmem %s17_s10, 128  ;;  %p1775_p4 = scmp.lt.s32.totalorder %s17_s10, %s17_s10 }
   0xb   :  { %p1771_p3 = scmp.ne.s32.totalorder %s17_s10, %s1770_s20  ;;  %p1776_p5 = scmp.lt.s32.totalorder %s1770_s20, %s1770_s20 }
   0xd   :  { %p1777_p6 = por %p1776_p5, %p1775_p4 }
   0xf   :  { %p1778_p7 = pnand %p1777_p6, %p1771_p3 }
  0x11   :  { %1781 = shalt.err (!%p1778_p7)
}
  0x12   :  { %19 = dma.hbm_to_vmem [thread:$0]  %s2401_s0, 128, %s17_s10, [#allocation4]  }
  0x13   :  { %s1782_s25 = scalar_lea.hbm %s2402_s1, 2048 }
  0x14   :  { %p1783_p8 = scmp.ne.s32.totalorder %s2402_s1, %s1782_s25  ;;  %p1786_p9 = scmp.lt.u32.totalorder %s1782_s25, %s2402_s1 }
  0x16   :  { %p1788_p10 = pnand %p1786_p9, %p1783_p8 }
  0x18   :  { %1791 = shalt.err (!%p1788_p10)
}
  0x19   :  { %s1792_s30 = scalar_lea.vmem %s1980_s12, 2048  ;;  %p1797_p12 = scmp.lt.s32.totalorder %s1980_s12, %s1980_s12 }
  0x1a   :  { %p1793_p11 = scmp.ne.s32.totalorder %s1980_s12, %s1792_s30  ;;  %p1798_p13 = scmp.lt.s32.totalorder %s1792_s30, %s1792_s30 }
  0x1c   :  { %p1799_p0 = por %p1798_p13, %p1797_p12 }
  0x1e   :  { %p1800_p1 = pnand %p1799_p0, %p1793_p11 }
  0x20   :  { %1803 = shalt.err (!%p1800_p1)
}
  0x21   :  { %s1834_s0 = smov 128   ;;  %s1835_s3 = smov 8  }
  0x22   :  { %31 = dma.hbm_to_vmem [thread:$0]  %s2402_s1, 2048, %s1980_s12, [#allocation7], %s1834_s0, %s1834_s0, %s1835_s3  }
  0x23   :  { %1826 = dma.done.wait [#allocation4], 128  }
  0x24   :  { %1827 = vsyncadd [#allocation4], 4294967168 }
  0x25   :  { %1828 = dma.done.wait [#allocation7], 2048  }
  0x26   :  { %1829 = vsyncadd [#allocation7], 4294965248  ;;  %v1836_v0 = vmov 2   ;;  %v1837_v1 = vmov 0   ;;  %v2011_v2 = vld [vmem:[#allocation3] sm:$0xff]  ;;  %v1838_v3 = vmov 3   ;;  %v60_v49 = vlaneseq }
  0x27   :  { %1632 = vset.pattern.permute.xlu1 %v1836_v0  ;;  %1630 = vset.pattern.permute.xlu0 %v1837_v1  ;;  %v1839_v4 = vmov 1   ;;  %v1840_v5 = vmov 4   ;;  %v1841_v6 = vmov 5   ;;  %v1842_v7 = vmov 6   ;;  %v2065_v55 = vld [vmem:[#allocation6] sm:$0xff]  ;;  %s1964_s1 = smov [#allocation8]  }
  0x28   :  { %79 = vperm.xlu1 %1632, %v2011_v2   ;;  %57 = vperm.xlu0 %1630, %v2011_v2   ;;  %v1843_v8 = vmov 8   ;;  %v1844_v9 = vmov 7   ;;  %v1845_v10 = vmov 11   ;;  %v1846_v11 = vmov 9   ;;  %s1487_s6 = sshll.u32 %s1964_s1, 4  ;;  %s1488_s6 = int_to_ptr.vmem [resolvable:$true] %s1487_s6 }
  0x29   :  { %v1847_v12 = vmov 14   ;;  %v1848_v13 = vmov 10   ;;  %v1849_v14 = vmov 17   ;;  %v1850_v15 = vmov 12   ;;  %s1804_s7 = scalar_lea.vmem %s1488_s6, 128  ;;  %p1809_p3 = scmp.lt.s32.totalorder %s1488_s6, %s1488_s6 }
  0x2a   :  { %v1851_v16 = vmov 20   ;;  %v1852_v17 = vmov 13   ;;  %v1853_v18 = vmov 23   ;;  %v1854_v19 = vmov 15   ;;  %p1805_p2 = scmp.ne.s32.totalorder %s1488_s6, %s1804_s7  ;;  %p1810_p4 = scmp.lt.s32.totalorder %s1804_s7, %s1804_s7 }
  0x2b   :  { %v1855_v20 = vmov 26   ;;  %v1856_v21 = vmov 16   ;;  %v1857_v22 = vmov 29   ;;  %v1858_v23 = vmov 18  }
  0x2c   :  { %1633 = vset.pattern.permute.xlu1 %v1838_v3  ;;  %1631 = vset.pattern.permute.xlu0 %v1839_v4  ;;  %v1859_v24 = vmov 32   ;;  %v1860_v25 = vmov 19   ;;  %v1861_v26 = vmov 35   ;;  %v1862_v27 = vmov 21   ;;  %p1811_p5 = por %p1810_p4, %p1809_p3 }
  0x2d   :  { %90 = vperm.xlu1 %1633, %v2011_v2   ;;  %68 = vperm.xlu0 %1631, %v2011_v2   ;;  %v1863_v28 = vmov 38   ;;  %v1864_v29 = vmov 22   ;;  %v1865_v30 = vmov 41   ;;  %v1866_v31 = vmov 24  }
  0x2e   :  { %v1867_v32 = vmov 44   ;;  %v1868_v33 = vmov 25   ;;  %v1869_v34 = vmov 47   ;;  %v1870_v35 = vmov 27   ;;  %p1812_p6 = pnand %p1811_p5, %p1805_p2 }
  0x2f   :  { %v1871_v36 = vmov 50   ;;  %v1872_v37 = vmov 28   ;;  %v1873_v38 = vmov 53   ;;  %v1874_v39 = vmov 30  }
  0x30   :  { %v1875_v40 = vmov 56   ;;  %v1876_v41 = vmov 31   ;;  %v1877_v42 = vmov 59   ;;  %v1878_v43 = vmov 33  }
  0x31   :  { %1634 = vset.pattern.permute.xlu1 %v1840_v5  ;;  %1635 = vset.pattern.permute.xlu0 %v1841_v6  ;;  %v1879_v44 = vmov 62   ;;  %v1880_v45 = vmov 34   ;;  %v1881_v46 = vmov 65   ;;  %v1882_v47 = vmov 36  }
  0x32   :  { %101 = vperm.xlu1 %1634, %v2011_v2   ;;  %112 = vperm.xlu0 %1635, %v2011_v2   ;;  %v1883_v48 = vmov 68   ;;  %v1884_v50 = vmov 37   ;;  %v61_v51 = vshrl.u32 %v60_v49, 7  ;;  %v1885_v52 = vmov 71  }
  0x33   :  { %v1886_v54 = vmov 39   ;;  %v1887_v56 = vmov 74   ;;  %v1888_v1 = vmov 40   ;;  %v1889_v4 = vmov 77  }
  0x34   :  { %v2063_v53 = vsub.s32 0, %v61_v51  ;;  %v2068_v57 = vsub.s32 2, %v61_v51  ;;  %v2072_v59 = vsub.s32 1, %v61_v51  ;;  %v2075_v62 = vsub.s32 3, %v61_v51 }
  0x35   :  { %v2082_v5 = vsub.s32 4, %v61_v51  ;;  %v2084_v6 = vsub.s32 5, %v61_v51 }
  0x36   :  { %1636 = vset.pattern.permute.xlu1 %v1842_v7  ;;  %1638 = vset.pattern.permute.xlu0 %v1843_v8  ;;  %v63_v58 = vrot.slane %v2065_v55, %v2063_v53  ;;  %v85_v63 = vrot.slane %v2065_v55, %v2068_v57  ;;  %v74_v3 = vrot.slane %v2065_v55, %v2072_v59 }
  0x37   :  { %123 = vperm.xlu1 %1636, %v2011_v2   ;;  %145 = vperm.xlu0 %1638, %v2011_v2   ;;  %v96_v7 = vrot.slane %v2065_v55, %v2075_v62 }
  0x3b   :  { %1637 = vset.pattern.permute.xlu1 %v1844_v9  ;;  %1641 = vset.pattern.permute.xlu0 %v1845_v10 }
  0x3c   :  { %134 = vperm.xlu1 %1637, %v2011_v2   ;;  %178 = vperm.xlu0 %1641, %v2011_v2  }
  0x40   :  { %1639 = vset.pattern.permute.xlu1 %v1846_v11  ;;  %1644 = vset.pattern.permute.xlu0 %v1847_v12 }
  0x41   :  { %156 = vperm.xlu1 %1639, %v2011_v2   ;;  %211 = vperm.xlu0 %1644, %v2011_v2  }
  0x45   :  { %1640 = vset.pattern.permute.xlu1 %v1848_v13  ;;  %1647 = vset.pattern.permute.xlu0 %v1849_v14  ;;  %v1890_v13 = vmov 42   ;;  %v107_v14 = vrot.slane %v2065_v55, %v2082_v5 }
  0x46   :  { %167 = vperm.xlu1 %1640, %v2011_v2   ;;  %244 = vperm.xlu0 %1647, %v2011_v2  }
  0x4a   :  { %1642 = vset.pattern.permute.xlu1 %v1850_v15  ;;  %1650 = vset.pattern.permute.xlu0 %v1851_v16  ;;  %v118_v15 = vrot.slane %v2065_v55, %v2084_v6  ;;  %v1891_v16 = vmov 80  }
  0x4b   :  { %189 = vperm.xlu1 %1642, %v2011_v2   ;;  %277 = vperm.xlu0 %1650, %v2011_v2  }
  0x4f   :  { %1643 = vset.pattern.permute.xlu1 %v1852_v17  ;;  %1653 = vset.pattern.permute.xlu0 %v1853_v18 }
  0x50   :  { %200 = vperm.xlu1 %1643, %v2011_v2   ;;  %310 = vperm.xlu0 %1653, %v2011_v2  }
  0x54   :  { %1645 = vset.pattern.permute.xlu1 %v1854_v19  ;;  %1656 = vset.pattern.permute.xlu0 %v1855_v20  ;;  %v2094_v19 = vsub.s32 6, %v61_v51 }
  0x55   :  { %222 = vperm.xlu1 %1645, %v2011_v2   ;;  %343 = vperm.xlu0 %1656, %v2011_v2  }
  0x59   :  { %1646 = vset.pattern.permute.xlu1 %v1856_v21  ;;  %1659 = vset.pattern.permute.xlu0 %v1857_v22 }
  0x5a   :  { %233 = vperm.xlu1 %1646, %v2011_v2   ;;  %376 = vperm.xlu0 %1659, %v2011_v2  }
  0x5e   :  { %1648 = vset.pattern.permute.xlu1 %v1858_v23  ;;  %1662 = vset.pattern.permute.xlu0 %v1859_v24 }
  0x5f   :  { %255 = vperm.xlu1 %1648, %v2011_v2   ;;  %409 = vperm.xlu0 %1662, %v2011_v2  }
  0x63   :  { %1649 = vset.pattern.permute.xlu1 %v1860_v25  ;;  %1665 = vset.pattern.permute.xlu0 %v1861_v26 }
  0x64   :  { %266 = vperm.xlu1 %1649, %v2011_v2   ;;  %442 = vperm.xlu0 %1665, %v2011_v2  }
  0x68   :  { %1651 = vset.pattern.permute.xlu1 %v1862_v27  ;;  %1668 = vset.pattern.permute.xlu0 %v1863_v28  ;;  %v1892_v28 = vmov 43  }
  0x69   :  { %288 = vperm.xlu1 %1651, %v2011_v2   ;;  %475 = vperm.xlu0 %1668, %v2011_v2  }
  0x6d   :  { %1652 = vset.pattern.permute.xlu1 %v1864_v29  ;;  %1671 = vset.pattern.permute.xlu0 %v1865_v30  ;;  %v129_v29 = vrot.slane %v2065_v55, %v2094_v19 }
  0x6e   :  { %299 = vperm.xlu1 %1652, %v2011_v2   ;;  %508 = vperm.xlu0 %1671, %v2011_v2  }
  0x72   :  { %1654 = vset.pattern.permute.xlu1 %v1866_v31  ;;  %1674 = vset.pattern.permute.xlu0 %v1867_v32  ;;  %v2100_v31 = vsub.s32 7, %v61_v51 }
  0x73   :  { %321 = vperm.xlu1 %1654, %v2011_v2   ;;  %541 = vperm.xlu0 %1674, %v2011_v2  }
  0x77   :  { %1655 = vset.pattern.permute.xlu1 %v1868_v33  ;;  %1677 = vset.pattern.permute.xlu0 %v1869_v34  ;;  %v2102_v33 = vld [vmem:[#allocation6 + $0x8] sm:$0xff] }
  0x78   :  { %332 = vperm.xlu1 %1655, %v2011_v2   ;;  %574 = vperm.xlu0 %1677, %v2011_v2   ;;  %v162_v49 = vrot.slane %v2102_v33, %v2072_v59 }
  0x7c   :  { %1657 = vset.pattern.permute.xlu1 %v1870_v35  ;;  %1680 = vset.pattern.permute.xlu0 %v1871_v36 }
  0x7d   :  { %354 = vperm.xlu1 %1657, %v2011_v2   ;;  %607 = vperm.xlu0 %1680, %v2011_v2  }
  0x81   :  { %1658 = vset.pattern.permute.xlu1 %v1872_v37  ;;  %1683 = vset.pattern.permute.xlu0 %v1873_v38  ;;  %v1893_v38 = vmov 83  }
  0x82   :  { %365 = vperm.xlu1 %1658, %v2011_v2   ;;  %640 = vperm.xlu0 %1683, %v2011_v2  }
  0x86   :  { %1660 = vset.pattern.permute.xlu1 %v1874_v39  ;;  %1686 = vset.pattern.permute.xlu0 %v1875_v40  ;;  %v1894_v39 = vmov 45   ;;  %v140_v40 = vrot.slane %v2065_v55, %v2100_v31 }
  0x87   :  { %387 = vperm.xlu1 %1660, %v2011_v2   ;;  %673 = vperm.xlu0 %1686, %v2011_v2  }
  0x8b   :  { %1661 = vset.pattern.permute.xlu1 %v1876_v41  ;;  %1689 = vset.pattern.permute.xlu0 %v1877_v42  ;;  %v151_v41 = vrot.slane %v2102_v33, %v2063_v53 }
  0x8c   :  { %398 = vperm.xlu1 %1661, %v2011_v2   ;;  %706 = vperm.xlu0 %1689, %v2011_v2  }
  0x90   :  { %1663 = vset.pattern.permute.xlu1 %v1878_v43  ;;  %1692 = vset.pattern.permute.xlu0 %v1879_v44 }
  0x91   :  { %420 = vperm.xlu1 %1663, %v2011_v2   ;;  %739 = vperm.xlu0 %1692, %v2011_v2  }
  0x95   :  { %1664 = vset.pattern.permute.xlu1 %v1880_v45  ;;  %1695 = vset.pattern.permute.xlu0 %v1881_v46 }
  0x96   :  { %431 = vperm.xlu1 %1664, %v2011_v2   ;;  %772 = vperm.xlu0 %1695, %v2011_v2  }
  0x9a   :  { %1666 = vset.pattern.permute.xlu1 %v1882_v47  ;;  %1698 = vset.pattern.permute.xlu0 %v1883_v48  ;;  %v1895_v48 = vmov 46  }
  0x9b   :  { %453 = vperm.xlu1 %1666, %v2011_v2   ;;  %805 = vperm.xlu0 %1698, %v2011_v2  }
  0x9f   :  { %1667 = vset.pattern.permute.xlu1 %v1884_v50  ;;  %1701 = vset.pattern.permute.xlu0 %v1885_v52 }
  0xa0   :  { %464 = vperm.xlu1 %1667, %v2011_v2   ;;  %838 = vperm.xlu0 %1701, %v2011_v2  }
  0xa4   :  { %1669 = vset.pattern.permute.xlu1 %v1886_v54  ;;  %1704 = vset.pattern.permute.xlu0 %v1887_v56 }
  0xa5   :  { %486 = vperm.xlu1 %1669, %v2011_v2   ;;  %871 = vperm.xlu0 %1704, %v2011_v2  }
  0xa7   :  { %v80_v60 = vpop.permute.xlu1 %79  ;;  %v58_v61 = vpop.permute.xlu0 %57 }
  0xa8   :  { %v64_v0 = vadd.f32 %v63_v58, %v58_v61  ;;  %v86_v10 = vadd.f32 %v85_v63, %v80_v60  ;;  %v1896_v58 = vmov 86   ;;  %v1897_v60 = vmov 48  }
  0xa9   :  { %1670 = vset.pattern.permute.xlu1 %v1888_v1  ;;  %1707 = vset.pattern.permute.xlu0 %v1889_v4  ;;  %v173_v61 = vrot.slane %v2102_v33, %v2068_v57  ;;  %v184_v63 = vrot.slane %v2102_v33, %v2075_v62 }
  0xaa   :  { %497 = vperm.xlu1 %1670, %v2011_v2   ;;  %904 = vperm.xlu0 %1707, %v2011_v2   ;;  %v65_v11 = vmax.f32 %v64_v0, 0.0  ;;  %v87_v20 = vmax.f32 %v86_v10, 0.0  ;;  %v195_v10 = vrot.slane %v2102_v33, %v2082_v5 }
  0xac   :  { %v91_v8 = vpop.permute.xlu1 %90  ;;  %v69_v9 = vpop.permute.xlu0 %68 }
  0xad   :  { %v75_v12 = vadd.f32 %v74_v3, %v69_v9  ;;  %v97_v17 = vadd.f32 %v96_v7, %v91_v8  ;;  %v1898_v9 = vmov 49  }
  0xae   :  { %1672 = vset.pattern.permute.xlu1 %v1890_v13  ;;  %1710 = vset.pattern.permute.xlu0 %v1891_v16 }
  0xaf   :  { %v76_v18 = vmax.f32 %v75_v12, 0.0  ;;  %519 = vperm.xlu1 %1672, %v2011_v2   ;;  %937 = vperm.xlu0 %1710, %v2011_v2   ;;  %v98_v26 = vmax.f32 %v97_v17, 0.0  ;;  %v1899_v17 = vmov 89  }
  0xb1   :  { %v77_v21 = vadd.f32 %v76_v18, %v65_v11  ;;  %v102_v22 = vpop.permute.xlu1 %101  ;;  %v113_v23 = vpop.permute.xlu0 %112  ;;  %v1900_v18 = vmov 51  }
  0xb2   :  { %v108_v24 = vadd.f32 %v107_v14, %v102_v22  ;;  %v119_v25 = vadd.f32 %v118_v15, %v113_v23 }
  0xb3   :  { %v88_v27 = vadd.f32 %v87_v20, %v77_v21  ;;  %1673 = vset.pattern.permute.xlu1 %v1892_v28  ;;  %1713 = vset.pattern.permute.xlu0 %v1893_v38  ;;  %v206_v20 = vrot.slane %v2102_v33, %v2084_v6  ;;  %v217_v21 = vrot.slane %v2102_v33, %v2094_v19  ;;  %v1901_v28 = vmov 52  }
  0xb4   :  { %v109_v30 = vmax.f32 %v108_v24, 0.0  ;;  %530 = vperm.xlu1 %1673, %v2011_v2   ;;  %v120_v34 = vmax.f32 %v119_v25, 0.0  ;;  %970 = vperm.xlu0 %1713, %v2011_v2  }
  0xb5   :  { %v99_v32 = vadd.f32 %v98_v26, %v88_v27 }
  0xb6   :  { %v124_v35 = vpop.permute.xlu1 %123  ;;  %v146_v42 = vpop.permute.xlu0 %145 }
  0xb7   :  { %v110_v36 = vadd.f32 %v109_v30, %v99_v32  ;;  %v130_v37 = vadd.f32 %v129_v29, %v124_v35  ;;  %v152_v47 = vadd.f32 %v151_v41, %v146_v42  ;;  %v228_v29 = vrot.slane %v2102_v33, %v2100_v31 }
  0xb8   :  { %1675 = vset.pattern.permute.xlu1 %v1894_v39  ;;  %1716 = vset.pattern.permute.xlu0 %v1896_v58  ;;  %v1902_v39 = vmov 92   ;;  %v1905_v58 = vmov 95  }
  0xb9   :  { %552 = vperm.xlu1 %1675, %v2011_v2   ;;  %v121_v43 = vadd.f32 %v120_v34, %v110_v36  ;;  %v131_v44 = vmax.f32 %v130_v37, 0.0  ;;  %v153_v54 = vmax.f32 %v152_v47, 0.0  ;;  %1003 = vperm.xlu0 %1716, %v2011_v2   ;;  %v2131_v34 = vld [vmem:[#allocation6 + $0x10] sm:$0xff] }
  0xba   :  { %v239_v41 = vrot.slane %v2131_v34, %v2063_v53  ;;  %v250_v33 = vrot.slane %v2131_v34, %v2072_v59 }
  0xbb   :  { %v135_v45 = vpop.permute.xlu1 %134  ;;  %v132_v50 = vadd.f32 %v131_v44, %v121_v43  ;;  %v179_v0 = vpop.permute.xlu0 %178 }
  0xbc   :  { %v141_v46 = vadd.f32 %v140_v40, %v135_v45  ;;  %v185_v8 = vadd.f32 %v184_v63, %v179_v0  ;;  %v1903_v40 = vmov 54   ;;  %v283_v63 = vrot.slane %v2131_v34, %v2082_v5 }
  0xbd   :  { %1676 = vset.pattern.permute.xlu1 %v1895_v48  ;;  %1719 = vset.pattern.permute.xlu0 %v1899_v17  ;;  %v1904_v48 = vmov 55   ;;  %v1908_v17 = vmov 98  }
  0xbe   :  { %v142_v51 = vmax.f32 %v141_v46, 0.0  ;;  %563 = vperm.xlu1 %1676, %v2011_v2   ;;  %v186_v14 = vmax.f32 %v185_v8, 0.0  ;;  %1036 = vperm.xlu0 %1719, %v2011_v2  }
  0xc0   :  { %v143_v52 = vadd.f32 %v142_v51, %v132_v50  ;;  %v157_v55 = vpop.permute.xlu1 %156  ;;  %v212_v22 = vpop.permute.xlu0 %211 }
  0xc1   :  { %v163_v56 = vadd.f32 %v162_v49, %v157_v55  ;;  %v218_v27 = vadd.f32 %v217_v21, %v212_v22  ;;  %v261_v49 = vrot.slane %v2131_v34, %v2068_v57  ;;  %v316_v21 = vrot.slane %v2131_v34, %v2100_v31 }
  0xc2   :  { %1678 = vset.pattern.permute.xlu1 %v1897_v60  ;;  %v154_v1 = vadd.f32 %v153_v54, %v143_v52  ;;  %1722 = vset.pattern.permute.xlu0 %v1902_v39  ;;  %v1906_v60 = vmov 57   ;;  %v1911_v39 = vmov 101  }
  0xc3   :  { %585 = vperm.xlu1 %1678, %v2011_v2   ;;  %v164_v3 = vmax.f32 %v163_v56, 0.0  ;;  %v219_v36 = vmax.f32 %v218_v27, 0.0  ;;  %1069 = vperm.xlu0 %1722, %v2011_v2  }
  0xc5   :  { %v168_v4 = vpop.permute.xlu1 %167  ;;  %v165_v11 = vadd.f32 %v164_v3, %v154_v1  ;;  %v245_v42 = vpop.permute.xlu0 %244 }
  0xc6   :  { %v174_v7 = vadd.f32 %v173_v61, %v168_v4  ;;  %v251_v47 = vadd.f32 %v250_v33, %v245_v42  ;;  %v272_v61 = vrot.slane %v2131_v34, %v2075_v62 }
  0xc7   :  { %1679 = vset.pattern.permute.xlu1 %v1898_v9  ;;  %1725 = vset.pattern.permute.xlu0 %v1905_v58  ;;  %v1907_v9 = vmov 58  }
  0xc8   :  { %v175_v12 = vmax.f32 %v174_v7, 0.0  ;;  %596 = vperm.xlu1 %1679, %v2011_v2   ;;  %v252_v54 = vmax.f32 %v251_v47, 0.0  ;;  %1102 = vperm.xlu0 %1725, %v2011_v2  }
  0xca   :  { %v176_v13 = vadd.f32 %v175_v12, %v165_v11  ;;  %v190_v15 = vpop.permute.xlu1 %189  ;;  %v278_v0 = vpop.permute.xlu0 %277 }
  0xcb   :  { %v196_v16 = vadd.f32 %v195_v10, %v190_v15  ;;  %v284_v8 = vadd.f32 %v283_v63, %v278_v0  ;;  %v294_v10 = vrot.slane %v2131_v34, %v2084_v6  ;;  %v1915_v63 = vmov 66  }
  0xcc   :  { %1681 = vset.pattern.permute.xlu1 %v1900_v18  ;;  %v187_v23 = vadd.f32 %v186_v14, %v176_v13  ;;  %1728 = vset.pattern.permute.xlu0 %v1908_v17  ;;  %v1909_v18 = vmov 60  }
  0xcd   :  { %618 = vperm.xlu1 %1681, %v2011_v2   ;;  %v197_v24 = vmax.f32 %v196_v16, 0.0  ;;  %v285_v14 = vmax.f32 %v284_v8, 0.0  ;;  %1135 = vperm.xlu0 %1728, %v2011_v2  }
  0xcf   :  { %v201_v25 = vpop.permute.xlu1 %200  ;;  %v198_v30 = vadd.f32 %v197_v24, %v187_v23  ;;  %v311_v22 = vpop.permute.xlu0 %310 }
  0xd0   :  { %v207_v26 = vadd.f32 %v206_v20, %v201_v25  ;;  %v305_v20 = vrot.slane %v2131_v34, %v2094_v19  ;;  %v2157_v25 = vld [vmem:[#allocation6 + $0x18] sm:$0xff] }
  0xd1   :  { %1682 = vset.pattern.permute.xlu1 %v1901_v28  ;;  %v317_v28 = vadd.f32 %v316_v21, %v311_v22  ;;  %1731 = vset.pattern.permute.xlu0 %v1911_v39  ;;  %v349_v33 = vrot.slane %v2157_v25, %v2068_v57  ;;  %v371_v0 = vrot.slane %v2157_v25, %v2082_v5  ;;  %v1917_v21 = vmov 107  }
  0xd2   :  { %v208_v32 = vmax.f32 %v207_v26, 0.0  ;;  %629 = vperm.xlu1 %1682, %v2011_v2   ;;  %1168 = vperm.xlu0 %1731, %v2011_v2   ;;  %v1920_v39 = vmov 110  }
  0xd4   :  { %v209_v35 = vadd.f32 %v208_v32, %v198_v30  ;;  %v223_v37 = vpop.permute.xlu1 %222  ;;  %v327_v30 = vrot.slane %v2157_v25, %v2063_v53  ;;  %v344_v42 = vpop.permute.xlu0 %343 }
  0xd5   :  { %v229_v38 = vadd.f32 %v228_v29, %v223_v37  ;;  %v1910_v29 = vmov 61   ;;  %v350_v47 = vadd.f32 %v349_v33, %v344_v42 }
  0xd6   :  { %1684 = vset.pattern.permute.xlu1 %v1903_v40  ;;  %v220_v43 = vadd.f32 %v219_v36, %v209_v35  ;;  %v318_v36 = vmax.f32 %v317_v28, 0.0  ;;  %v1912_v40 = vmov 63  }
  0xd7   :  { %651 = vperm.xlu1 %1684, %v2011_v2   ;;  %v230_v44 = vmax.f32 %v229_v38, 0.0 }
  0xd9   :  { %v234_v45 = vpop.permute.xlu1 %233  ;;  %v231_v50 = vadd.f32 %v230_v44, %v220_v43 }
  0xda   :  { %v240_v46 = vadd.f32 %v239_v41, %v234_v45  ;;  %v338_v41 = vrot.slane %v2157_v25, %v2072_v59 }
  0xdb   :  { %1685 = vset.pattern.permute.xlu1 %v1904_v48  ;;  %v1913_v48 = vmov 64  }
  0xdc   :  { %v241_v51 = vmax.f32 %v240_v46, 0.0  ;;  %662 = vperm.xlu1 %1685, %v2011_v2  }
  0xde   :  { %v242_v52 = vadd.f32 %v241_v51, %v231_v50  ;;  %v256_v55 = vpop.permute.xlu1 %255 }
  0xdf   :  { %v262_v56 = vadd.f32 %v261_v49, %v256_v55  ;;  %v360_v49 = vrot.slane %v2157_v25, %v2075_v62 }
  0xe0   :  { %1687 = vset.pattern.permute.xlu1 %v1906_v60  ;;  %v253_v1 = vadd.f32 %v252_v54, %v242_v52  ;;  %v351_v54 = vmax.f32 %v350_v47, 0.0  ;;  %v377_v60 = vpop.permute.xlu0 %376 }
  0xe1   :  { %684 = vperm.xlu1 %1687, %v2011_v2   ;;  %v263_v3 = vmax.f32 %v262_v56, 0.0  ;;  %v382_v56 = vrot.slane %v2157_v25, %v2084_v6 }
  0xe3   :  { %v267_v4 = vpop.permute.xlu1 %266  ;;  %v264_v11 = vadd.f32 %v263_v3, %v253_v1 }
  0xe4   :  { %v273_v7 = vadd.f32 %v272_v61, %v267_v4  ;;  %v1914_v61 = vmov 104   ;;  %v383_v4 = vadd.f32 %v382_v56, %v377_v60  ;;  %v1924_v60 = vmov 75  }
  0xe5   :  { %1688 = vset.pattern.permute.xlu1 %v1907_v9  ;;  %1734 = vset.pattern.permute.xlu0 %v1914_v61  ;;  %v1916_v9 = vmov 67  }
  0xe6   :  { %v274_v12 = vmax.f32 %v273_v7, 0.0  ;;  %695 = vperm.xlu1 %1688, %v2011_v2   ;;  %1201 = vperm.xlu0 %1734, %v2011_v2  }
  0xe8   :  { %v275_v13 = vadd.f32 %v274_v12, %v264_v11  ;;  %v289_v15 = vpop.permute.xlu1 %288  ;;  %v2179_v11 = vld [vmem:[#allocation6 + $0x20] sm:$0xff] }
  0xe9   :  { %v295_v16 = vadd.f32 %v294_v10, %v289_v15  ;;  %v393_v10 = vrot.slane %v2157_v25, %v2094_v19  ;;  %v415_v17 = vrot.slane %v2179_v11, %v2063_v53  ;;  %v437_v33 = vrot.slane %v2179_v11, %v2068_v57 }
  0xea   :  { %1690 = vset.pattern.permute.xlu1 %v1909_v18  ;;  %v286_v23 = vadd.f32 %v285_v14, %v275_v13  ;;  %v384_v14 = vmax.f32 %v383_v4, 0.0  ;;  %1737 = vset.pattern.permute.xlu0 %v1917_v21  ;;  %v448_v42 = vrot.slane %v2179_v11, %v2075_v62  ;;  %v470_v61 = vrot.slane %v2179_v11, %v2084_v6 }
  0xeb   :  { %717 = vperm.xlu1 %1690, %v2011_v2   ;;  %v296_v24 = vmax.f32 %v295_v16, 0.0  ;;  %1234 = vperm.xlu0 %1737, %v2011_v2   ;;  %v1927_v21 = vmov 78  }
  0xed   :  { %v300_v26 = vpop.permute.xlu1 %299  ;;  %v297_v32 = vadd.f32 %v296_v24, %v286_v23  ;;  %v1918_v23 = vmov 69   ;;  %v404_v24 = vrot.slane %v2157_v25, %v2100_v31 }
  0xee   :  { %v306_v27 = vadd.f32 %v305_v20, %v300_v26  ;;  %v410_v20 = vpop.permute.xlu0 %409 }
  0xef   :  { %1691 = vset.pattern.permute.xlu1 %v1910_v29  ;;  %1740 = vset.pattern.permute.xlu0 %v1920_v39  ;;  %v1929_v39 = vmov 119  }
  0xf0   :  { %v307_v35 = vmax.f32 %v306_v27, 0.0  ;;  %728 = vperm.xlu1 %1691, %v2011_v2   ;;  %v416_v27 = vadd.f32 %v415_v17, %v410_v20  ;;  %1267 = vperm.xlu0 %1740, %v2011_v2   ;;  %v1926_v20 = vmov 116  }
  0xf2   :  { %v308_v34 = vadd.f32 %v307_v35, %v297_v32  ;;  %v322_v37 = vpop.permute.xlu1 %321  ;;  %v1919_v32 = vmov 70   ;;  %v426_v35 = vrot.slane %v2179_v11, %v2072_v59 }
  0xf3   :  { %v328_v38 = vadd.f32 %v327_v30, %v322_v37 }
  0xf4   :  { %1693 = vset.pattern.permute.xlu1 %v1912_v40  ;;  %v319_v43 = vadd.f32 %v318_v36, %v308_v34  ;;  %v417_v36 = vmax.f32 %v416_v27, 0.0 }
  0xf5   :  { %750 = vperm.xlu1 %1693, %v2011_v2   ;;  %v329_v44 = vmax.f32 %v328_v38, 0.0 }
  0xf7   :  { %v333_v45 = vpop.permute.xlu1 %332  ;;  %v330_v50 = vadd.f32 %v329_v44, %v319_v43  ;;  %v443_v44 = vpop.permute.xlu0 %442 }
  0xf8   :  { %v339_v46 = vadd.f32 %v338_v41, %v333_v45  ;;  %v1921_v41 = vmov 72  }
  0xf9   :  { %1694 = vset.pattern.permute.xlu1 %v1913_v48  ;;  %v449_v48 = vadd.f32 %v448_v42, %v443_v44 }
  0xfa   :  { %v340_v51 = vmax.f32 %v339_v46, 0.0  ;;  %761 = vperm.xlu1 %1694, %v2011_v2  }
  0xfc   :  { %v341_v52 = vadd.f32 %v340_v51, %v330_v50  ;;  %v355_v55 = vpop.permute.xlu1 %354  ;;  %v459_v50 = vrot.slane %v2179_v11, %v2082_v5 }
  0xfd   :  { %v361_v58 = vadd.f32 %v360_v49, %v355_v55  ;;  %v1922_v49 = vmov 73  }
  0xfe   :  { %1696 = vset.pattern.permute.xlu1 %v1915_v63  ;;  %v352_v1 = vadd.f32 %v351_v54, %v341_v52  ;;  %v450_v54 = vmax.f32 %v449_v48, 0.0  ;;  %v481_v63 = vrot.slane %v2179_v11, %v2094_v19  ;;  %v1931_v48 = vmov 82  }
  0xff   :  { %783 = vperm.xlu1 %1696, %v2011_v2   ;;  %v362_v3 = vmax.f32 %v361_v58, 0.0  ;;  %v1923_v58 = vmov 113  }
 0x100   :  { %1743 = vset.pattern.permute.xlu0 %v1923_v58  ;;  %v1932_v58 = vmov 122  }
 0x101   :  { %v366_v7 = vpop.permute.xlu1 %365  ;;  %v363_v12 = vadd.f32 %v362_v3, %v352_v1  ;;  %1300 = vperm.xlu0 %1743, %v2011_v2  }
 0x102   :  { %v372_v8 = vadd.f32 %v371_v0, %v366_v7  ;;  %v476_v0 = vpop.permute.xlu0 %475 }
 0x103   :  { %1697 = vset.pattern.permute.xlu1 %v1916_v9  ;;  %v1925_v9 = vmov 76  }
 0x104   :  { %v373_v13 = vmax.f32 %v372_v8, 0.0  ;;  %794 = vperm.xlu1 %1697, %v2011_v2   ;;  %v482_v8 = vadd.f32 %v481_v63, %v476_v0 }
 0x105   :  { %1746 = vset.pattern.permute.xlu0 %v1926_v20  ;;  %v1935_v20 = vmov 125  }
 0x106   :  { %v374_v15 = vadd.f32 %v373_v13, %v363_v12  ;;  %v388_v16 = vpop.permute.xlu1 %387  ;;  %1333 = vperm.xlu0 %1746, %v2011_v2  }
 0x107   :  { %v394_v18 = vadd.f32 %v393_v10, %v388_v16  ;;  %v492_v10 = vrot.slane %v2179_v11, %v2100_v31  ;;  %v483_v16 = vmax.f32 %v482_v8, 0.0 }
 0x108   :  { %v385_v22 = vadd.f32 %v384_v14, %v374_v15  ;;  %1699 = vset.pattern.permute.xlu1 %v1918_v23  ;;  %v2209_v14 = vld [vmem:[#allocation6 + $0x28] sm:$0xff]  ;;  %v509_v23 = vpop.permute.xlu0 %508 }
 0x109   :  { %v395_v26 = vmax.f32 %v394_v18, 0.0  ;;  %816 = vperm.xlu1 %1699, %v2011_v2   ;;  %v514_v11 = vrot.slane %v2209_v14, %v2072_v59  ;;  %v580_v63 = vrot.slane %v2209_v14, %v2100_v31 }
 0x10a   :  { %1749 = vset.pattern.permute.xlu0 %v1929_v39 }
 0x10b   :  { %v396_v28 = vadd.f32 %v395_v26, %v385_v22  ;;  %v399_v29 = vpop.permute.xlu1 %398  ;;  %v503_v22 = vrot.slane %v2209_v14, %v2063_v53  ;;  %1366 = vperm.xlu0 %1749, %v2011_v2  }
 0x10c   :  { %v405_v30 = vadd.f32 %v404_v24, %v399_v29  ;;  %v515_v29 = vadd.f32 %v514_v11, %v509_v23  ;;  %v542_v42 = vpop.permute.xlu0 %541 }
 0x10d   :  { %1700 = vset.pattern.permute.xlu1 %v1919_v32  ;;  %v525_v32 = vrot.slane %v2209_v14, %v2068_v57 }
 0x10e   :  { %v406_v34 = vmax.f32 %v405_v30, 0.0  ;;  %827 = vperm.xlu1 %1700, %v2011_v2   ;;  %v1928_v30 = vmov 79  }
 0x10f   :  { %1752 = vset.pattern.permute.xlu0 %v1932_v58 }
 0x110   :  { %v407_v37 = vadd.f32 %v406_v34, %v396_v28  ;;  %v421_v25 = vpop.permute.xlu1 %420  ;;  %v575_v0 = vpop.permute.xlu0 %574 }
 0x111   :  { %v427_v38 = vadd.f32 %v426_v35, %v421_v25 }
 0x112   :  { %v418_v40 = vadd.f32 %v417_v36, %v407_v37  ;;  %1702 = vset.pattern.permute.xlu1 %v1921_v41  ;;  %v516_v37 = vmax.f32 %v515_v29, 0.0  ;;  %v536_v41 = vrot.slane %v2209_v14, %v2075_v62 }
 0x113   :  { %v428_v43 = vmax.f32 %v427_v38, 0.0  ;;  %849 = vperm.xlu1 %1702, %v2011_v2  }
 0x114   :  { %v608_v23 = vpop.permute.xlu0 %607 }
 0x115   :  { %v429_v45 = vadd.f32 %v428_v43, %v418_v40  ;;  %v432_v46 = vpop.permute.xlu1 %431  ;;  %v1930_v40 = vmov 81  }
 0x116   :  { %v438_v47 = vadd.f32 %v437_v33, %v432_v46  ;;  %v547_v33 = vrot.slane %v2209_v14, %v2082_v5 }
 0x117   :  { %1703 = vset.pattern.permute.xlu1 %v1922_v49  ;;  %v558_v49 = vrot.slane %v2209_v14, %v2084_v6 }
 0x118   :  { %v439_v51 = vmax.f32 %v438_v47, 0.0  ;;  %860 = vperm.xlu1 %1703, %v2011_v2   ;;  %v548_v47 = vadd.f32 %v547_v33, %v542_v42  ;;  %v641_v42 = vpop.permute.xlu0 %640 }
 0x11a   :  { %v440_v52 = vadd.f32 %v439_v51, %v429_v45  ;;  %v454_v55 = vpop.permute.xlu1 %453 }
 0x11b   :  { %v460_v56 = vadd.f32 %v459_v50, %v454_v55  ;;  %v549_v55 = vmax.f32 %v548_v47, 0.0 }
 0x11c   :  { %1705 = vset.pattern.permute.xlu1 %v1924_v60  ;;  %v451_v1 = vadd.f32 %v450_v54, %v440_v52  ;;  %v2228_v52 = vld [vmem:[#allocation3] sm:$0xff]  ;;  %v1933_v60 = vmov 84  }
 0x11d   :  { %882 = vperm.xlu1 %1705, %v2011_v2   ;;  %v461_v3 = vmax.f32 %v460_v56, 0.0  ;;  %1399 = vperm.xlu0 %1752, %v2228_v52  }
 0x11f   :  { %v465_v4 = vpop.permute.xlu1 %464  ;;  %v462_v12 = vadd.f32 %v461_v3, %v451_v1 }
 0x120   :  { %v471_v7 = vadd.f32 %v470_v61, %v465_v4  ;;  %v569_v61 = vrot.slane %v2209_v14, %v2094_v19  ;;  %v2237_v4 = vld [vmem:[#allocation6 + $0x30] sm:$0xff] }
 0x121   :  { %1706 = vset.pattern.permute.xlu1 %v1925_v9  ;;  %v581_v9 = vadd.f32 %v580_v63, %v575_v0  ;;  %1755 = vset.pattern.permute.xlu0 %v1935_v20  ;;  %v613_v11 = vrot.slane %v2237_v4, %v2068_v57  ;;  %v646_v33 = vrot.slane %v2237_v4, %v2084_v6  ;;  %v674_v0 = vpop.permute.xlu0 %673 }
 0x122   :  { %v472_v13 = vmax.f32 %v471_v7, 0.0  ;;  %893 = vperm.xlu1 %1706, %v2011_v2   ;;  %1432 = vperm.xlu0 %1755, %v2228_v52  }
 0x123   :  { %v614_v29 = vadd.f32 %v613_v11, %v608_v23  ;;  %v647_v47 = vadd.f32 %v646_v33, %v641_v42 }
 0x124   :  { %v473_v15 = vadd.f32 %v472_v13, %v462_v12  ;;  %v487_v17 = vpop.permute.xlu1 %486  ;;  %v591_v12 = vrot.slane %v2237_v4, %v2063_v53 }
 0x125   :  { %v493_v18 = vadd.f32 %v492_v10, %v487_v17  ;;  %v1934_v10 = vmov 85  }
 0x126   :  { %1708 = vset.pattern.permute.xlu1 %v1927_v21  ;;  %v484_v24 = vadd.f32 %v483_v16, %v473_v15  ;;  %v582_v16 = vmax.f32 %v581_v9, 0.0  ;;  %v1936_v21 = vmov 87  }
 0x127   :  { %915 = vperm.xlu1 %1708, %v2011_v2   ;;  %v494_v26 = vmax.f32 %v493_v18, 0.0 }
 0x129   :  { %v498_v27 = vpop.permute.xlu1 %497  ;;  %v495_v35 = vadd.f32 %v494_v26, %v484_v24 }
 0x12a   :  { %v504_v28 = vadd.f32 %v503_v22, %v498_v27  ;;  %v602_v22 = vrot.slane %v2237_v4, %v2072_v59 }
 0x12b   :  { %1709 = vset.pattern.permute.xlu1 %v1928_v30  ;;  %v1937_v30 = vmov 88  }
 0x12c   :  { %v505_v34 = vmax.f32 %v504_v28, 0.0  ;;  %926 = vperm.xlu1 %1709, %v2011_v2  }
 0x12e   :  { %v506_v36 = vadd.f32 %v505_v34, %v495_v35  ;;  %v520_v25 = vpop.permute.xlu1 %519 }
 0x12f   :  { %v526_v38 = vadd.f32 %v525_v32, %v520_v25  ;;  %v624_v32 = vrot.slane %v2237_v4, %v2075_v62  ;;  %v615_v25 = vmax.f32 %v614_v29, 0.0 }
 0x130   :  { %1711 = vset.pattern.permute.xlu1 %v1930_v40  ;;  %v517_v43 = vadd.f32 %v516_v37, %v506_v36  ;;  %v1938_v36 = vmov 127   ;;  %v1939_v40 = vmov 90  }
 0x131   :  { %948 = vperm.xlu1 %1711, %v2011_v2   ;;  %v527_v44 = vmax.f32 %v526_v38, 0.0  ;;  %1758 = vset.pattern.permute.xlu0 %v1938_v36 }
 0x133   :  { %v531_v45 = vpop.permute.xlu1 %530  ;;  %v528_v50 = vadd.f32 %v527_v44, %v517_v43 }
 0x134   :  { %v537_v46 = vadd.f32 %v536_v41, %v531_v45  ;;  %v635_v41 = vrot.slane %v2237_v4, %v2082_v5 }
 0x135   :  { %1712 = vset.pattern.permute.xlu1 %v1931_v48  ;;  %v1940_v48 = vmov 91  }
 0x136   :  { %v538_v51 = vmax.f32 %v537_v46, 0.0  ;;  %959 = vperm.xlu1 %1712, %v2228_v52  }
 0x138   :  { %v539_v54 = vadd.f32 %v538_v51, %v528_v50  ;;  %v553_v2 = vpop.permute.xlu1 %552 }
 0x139   :  { %v559_v56 = vadd.f32 %v558_v49, %v553_v2  ;;  %v657_v49 = vrot.slane %v2237_v4, %v2094_v19  ;;  %v648_v2 = vmax.f32 %v647_v47, 0.0 }
 0x13a   :  { %1714 = vset.pattern.permute.xlu1 %v1933_v60  ;;  %v550_v1 = vadd.f32 %v549_v55, %v539_v54  ;;  %v2260_v54 = vld [vmem:[#allocation6 + $0x38] sm:$0xff]  ;;  %v1941_v60 = vmov 93  }
 0x13b   :  { %981 = vperm.xlu1 %1714, %v2228_v52   ;;  %v560_v3 = vmax.f32 %v559_v56, 0.0  ;;  %v679_v63 = vrot.slane %v2260_v54, %v2063_v53  ;;  %v701_v20 = vrot.slane %v2260_v54, %v2068_v57  ;;  %v723_v29 = vrot.slane %v2260_v54, %v2082_v5 }
 0x13c   :  { %v756_v47 = vrot.slane %v2260_v54, %v2100_v31 }
 0x13d   :  { %v564_v7 = vpop.permute.xlu1 %563  ;;  %v561_v13 = vadd.f32 %v560_v3, %v550_v1  ;;  %v680_v9 = vadd.f32 %v679_v63, %v674_v0 }
 0x13e   :  { %v570_v8 = vadd.f32 %v569_v61, %v564_v7  ;;  %v668_v61 = vrot.slane %v2237_v4, %v2100_v31 }
 0x13f   :  { %1715 = vset.pattern.permute.xlu1 %v1934_v10  ;;  %v1942_v10 = vmov 94  }
 0x140   :  { %v571_v15 = vmax.f32 %v570_v8, 0.0  ;;  %992 = vperm.xlu1 %1715, %v2228_v52  }
 0x142   :  { %v572_v14 = vadd.f32 %v571_v15, %v561_v13  ;;  %v586_v17 = vpop.permute.xlu1 %585 }
 0x143   :  { %v592_v18 = vadd.f32 %v591_v12, %v586_v17  ;;  %v690_v12 = vrot.slane %v2260_v54, %v2072_v59 }
 0x144   :  { %1717 = vset.pattern.permute.xlu1 %v1936_v21  ;;  %v583_v24 = vadd.f32 %v582_v16, %v572_v14  ;;  %v681_v14 = vmax.f32 %v680_v9, 0.0  ;;  %v712_v21 = vrot.slane %v2260_v54, %v2075_v62 }
 0x145   :  { %1014 = vperm.xlu1 %1717, %v2228_v52   ;;  %v593_v26 = vmax.f32 %v592_v18, 0.0  ;;  %v1943_v18 = vmov 96  }
 0x147   :  { %v597_v27 = vpop.permute.xlu1 %596  ;;  %v594_v35 = vadd.f32 %v593_v26, %v583_v24 }
 0x148   :  { %v603_v28 = vadd.f32 %v602_v22, %v597_v27  ;;  %v707_v22 = vpop.permute.xlu0 %706 }
 0x149   :  { %1718 = vset.pattern.permute.xlu1 %v1937_v30  ;;  %v713_v27 = vadd.f32 %v712_v21, %v707_v22 }
 0x14a   :  { %v604_v34 = vmax.f32 %v603_v28, 0.0  ;;  %1025 = vperm.xlu1 %1718, %v2228_v52   ;;  %v1944_v28 = vmov 97  }
 0x14c   :  { %v605_v37 = vadd.f32 %v604_v34, %v594_v35  ;;  %v619_v38 = vpop.permute.xlu1 %618  ;;  %v714_v34 = vmax.f32 %v713_v27, 0.0 }
 0x14d   :  { %v625_v39 = vadd.f32 %v624_v32, %v619_v38  ;;  %v1945_v38 = vmov 99  }
 0x14e   :  { %1720 = vset.pattern.permute.xlu1 %v1939_v40  ;;  %v616_v43 = vadd.f32 %v615_v25, %v605_v37  ;;  %v745_v40 = vrot.slane %v2260_v54, %v2094_v19 }
 0x14f   :  { %1047 = vperm.xlu1 %1720, %v2228_v52   ;;  %v626_v44 = vmax.f32 %v625_v39, 0.0  ;;  %v734_v39 = vrot.slane %v2260_v54, %v2084_v6 }
 0x151   :  { %v630_v45 = vpop.permute.xlu1 %629  ;;  %v627_v50 = vadd.f32 %v626_v44, %v616_v43 }
 0x152   :  { %v636_v46 = vadd.f32 %v635_v41, %v630_v45  ;;  %v740_v41 = vpop.permute.xlu0 %739 }
 0x153   :  { %1721 = vset.pattern.permute.xlu1 %v1940_v48  ;;  %v746_v45 = vadd.f32 %v745_v40, %v740_v41 }
 0x154   :  { %v637_v51 = vmax.f32 %v636_v46, 0.0  ;;  %1058 = vperm.xlu1 %1721, %v2228_v52   ;;  %v1946_v46 = vmov 100  }
 0x156   :  { %v638_v55 = vadd.f32 %v637_v51, %v627_v50  ;;  %v652_v56 = vpop.permute.xlu1 %651  ;;  %v47_v50 = vld [vmem:[#allocation6 + $0x40] sm:$0xff]  ;;  %v773_v63 = vpop.permute.xlu0 %772 }
 0x157   :  { %v658_v58 = vadd.f32 %v657_v49, %v652_v56  ;;  %v789_v9 = vrot.slane %v47_v50, %v2068_v57  ;;  %v822_v27 = vrot.slane %v47_v50, %v2084_v6 }
 0x158   :  { %1723 = vset.pattern.permute.xlu1 %v1941_v60  ;;  %v649_v1 = vadd.f32 %v648_v2, %v638_v55  ;;  %v747_v55 = vmax.f32 %v746_v45, 0.0  ;;  %v767_v60 = vrot.slane %v47_v50, %v2063_v53  ;;  %v1952_v45 = vmov 109  }
 0x159   :  { %1080 = vperm.xlu1 %1723, %v2228_v52   ;;  %v659_v3 = vmax.f32 %v658_v58, 0.0  ;;  %v1947_v58 = vmov 102  }
 0x15b   :  { %v663_v7 = vpop.permute.xlu1 %662  ;;  %v660_v13 = vadd.f32 %v659_v3, %v649_v1 }
 0x15c   :  { %v669_v8 = vadd.f32 %v668_v61, %v663_v7  ;;  %v778_v61 = vrot.slane %v47_v50, %v2072_v59 }
 0x15d   :  { %1724 = vset.pattern.permute.xlu1 %v1942_v10 }
 0x15e   :  { %v670_v15 = vmax.f32 %v669_v8, 0.0  ;;  %1091 = vperm.xlu1 %1724, %v2228_v52   ;;  %v779_v7 = vadd.f32 %v778_v61, %v773_v63  ;;  %v1948_v8 = vmov 103  }
 0x160   :  { %v671_v4 = vadd.f32 %v670_v15, %v660_v13  ;;  %v685_v16 = vpop.permute.xlu1 %684  ;;  %v780_v15 = vmax.f32 %v779_v7, 0.0 }
 0x161   :  { %v691_v17 = vadd.f32 %v690_v12, %v685_v16  ;;  %v1949_v16 = vmov 105  }
 0x162   :  { %1726 = vset.pattern.permute.xlu1 %v1943_v18  ;;  %v682_v11 = vadd.f32 %v681_v14, %v671_v4  ;;  %v811_v18 = vrot.slane %v47_v50, %v2082_v5 }
 0x163   :  { %1113 = vperm.xlu1 %1726, %v2228_v52   ;;  %v692_v23 = vmax.f32 %v691_v17, 0.0  ;;  %v800_v17 = vrot.slane %v47_v50, %v2075_v62 }
 0x165   :  { %v696_v24 = vpop.permute.xlu1 %695  ;;  %v693_v30 = vadd.f32 %v692_v23, %v682_v11 }
 0x166   :  { %v702_v26 = vadd.f32 %v701_v20, %v696_v24  ;;  %v806_v20 = vpop.permute.xlu0 %805 }
 0x167   :  { %1727 = vset.pattern.permute.xlu1 %v1944_v28  ;;  %v812_v24 = vadd.f32 %v811_v18, %v806_v20 }
 0x168   :  { %v703_v32 = vmax.f32 %v702_v26, 0.0  ;;  %1124 = vperm.xlu1 %1727, %v2228_v52   ;;  %v1950_v26 = vmov 106  }
 0x16a   :  { %v704_v35 = vadd.f32 %v703_v32, %v693_v30  ;;  %v718_v37 = vpop.permute.xlu1 %717  ;;  %v813_v32 = vmax.f32 %v812_v24, 0.0 }
 0x16b   :  { %v724_v25 = vadd.f32 %v723_v29, %v718_v37  ;;  %v1951_v37 = vmov 108  }
 0x16c   :  { %1729 = vset.pattern.permute.xlu1 %v1945_v38  ;;  %v715_v33 = vadd.f32 %v714_v34, %v704_v35  ;;  %v844_v38 = vrot.slane %v47_v50, %v2100_v31 }
 0x16d   :  { %1146 = vperm.xlu1 %1729, %v2228_v52   ;;  %v725_v42 = vmax.f32 %v724_v25, 0.0  ;;  %v833_v25 = vrot.slane %v47_v50, %v2094_v19 }
 0x16f   :  { %v729_v43 = vpop.permute.xlu1 %728  ;;  %v726_v48 = vadd.f32 %v725_v42, %v715_v33  ;;  %v2299_v33 = vld [vmem:[#allocation6 + $0x48] sm:$0xff] }
 0x170   :  { %v735_v44 = vadd.f32 %v734_v39, %v729_v43  ;;  %v839_v39 = vpop.permute.xlu0 %838  ;;  %v888_v7 = vrot.slane %v2299_v33, %v2075_v62  ;;  %v921_v24 = vrot.slane %v2299_v33, %v2094_v19 }
 0x171   :  { %1730 = vset.pattern.permute.xlu1 %v1946_v46  ;;  %v855_v46 = vrot.slane %v2299_v33, %v2063_v53 }
 0x172   :  { %v736_v49 = vmax.f32 %v735_v44, 0.0  ;;  %1157 = vperm.xlu1 %1730, %v2228_v52   ;;  %v845_v44 = vadd.f32 %v844_v38, %v839_v39 }
 0x174   :  { %v737_v51 = vadd.f32 %v736_v49, %v726_v48  ;;  %v751_v2 = vpop.permute.xlu1 %750  ;;  %v846_v50 = vmax.f32 %v845_v44, 0.0  ;;  %v1958_v44 = vmov 118  }
 0x175   :  { %v757_v56 = vadd.f32 %v756_v47, %v751_v2  ;;  %v1953_v2 = vmov 111  }
 0x176   :  { %1732 = vset.pattern.permute.xlu1 %v1947_v58  ;;  %v748_v0 = vadd.f32 %v747_v55, %v737_v51  ;;  %v877_v58 = vrot.slane %v2299_v33, %v2068_v57 }
 0x177   :  { %1179 = vperm.xlu1 %1732, %v2228_v52   ;;  %v758_v54 = vmax.f32 %v757_v56, 0.0  ;;  %v866_v56 = vrot.slane %v2299_v33, %v2072_v59 }
 0x179   :  { %v762_v1 = vpop.permute.xlu1 %761  ;;  %v759_v10 = vadd.f32 %v758_v54, %v748_v0 }
 0x17a   :  { %v768_v3 = vadd.f32 %v767_v60, %v762_v1  ;;  %v872_v60 = vpop.permute.xlu0 %871 }
 0x17b   :  { %1733 = vset.pattern.permute.xlu1 %v1948_v8  ;;  %v878_v1 = vadd.f32 %v877_v58, %v872_v60 }
 0x17c   :  { %v769_v12 = vmax.f32 %v768_v3, 0.0  ;;  %1190 = vperm.xlu1 %1733, %v2228_v52   ;;  %v1954_v3 = vmov 112  }
 0x17e   :  { %v770_v13 = vadd.f32 %v769_v12, %v759_v10  ;;  %v784_v4 = vpop.permute.xlu1 %783  ;;  %v879_v12 = vmax.f32 %v878_v1, 0.0 }
 0x17f   :  { %v790_v14 = vadd.f32 %v789_v9, %v784_v4  ;;  %v1955_v4 = vmov 114  }
 0x180   :  { %1735 = vset.pattern.permute.xlu1 %v1949_v16  ;;  %v781_v21 = vadd.f32 %v780_v15, %v770_v13  ;;  %v910_v16 = vrot.slane %v2299_v33, %v2084_v6 }
 0x181   :  { %1212 = vperm.xlu1 %1735, %v2228_v52   ;;  %v791_v22 = vmax.f32 %v790_v14, 0.0  ;;  %v899_v14 = vrot.slane %v2299_v33, %v2082_v5 }
 0x183   :  { %v795_v11 = vpop.permute.xlu1 %794  ;;  %v792_v28 = vadd.f32 %v791_v22, %v781_v21 }
 0x184   :  { %v801_v23 = vadd.f32 %v800_v17, %v795_v11  ;;  %v905_v17 = vpop.permute.xlu0 %904 }
 0x185   :  { %1736 = vset.pattern.permute.xlu1 %v1950_v26  ;;  %v911_v11 = vadd.f32 %v910_v16, %v905_v17 }
 0x186   :  { %v802_v29 = vmax.f32 %v801_v23, 0.0  ;;  %1223 = vperm.xlu1 %1736, %v2228_v52   ;;  %v1956_v23 = vmov 115  }
 0x188   :  { %v803_v30 = vadd.f32 %v802_v29, %v792_v28  ;;  %v817_v35 = vpop.permute.xlu1 %816  ;;  %v2320_v28 = vld [vmem:[#allocation6 + $0x50] sm:$0xff]  ;;  %v938_v38 = vpop.permute.xlu0 %937 }
 0x189   :  { %v823_v34 = vadd.f32 %v822_v27, %v817_v35  ;;  %v987_v1 = vrot.slane %v2320_v28, %v2082_v5 }
 0x18a   :  { %1738 = vset.pattern.permute.xlu1 %v1951_v37  ;;  %v814_v40 = vadd.f32 %v813_v32, %v803_v30  ;;  %v912_v30 = vmax.f32 %v911_v11, 0.0  ;;  %v932_v37 = vrot.slane %v2299_v33, %v2100_v31  ;;  %v1020_v11 = vrot.slane %v2320_v28, %v2100_v31 }
 0x18b   :  { %1245 = vperm.xlu1 %1738, %v2228_v52   ;;  %v824_v41 = vmax.f32 %v823_v34, 0.0  ;;  %v1957_v34 = vmov 117  }
 0x18d   :  { %v828_v42 = vpop.permute.xlu1 %827  ;;  %v825_v47 = vadd.f32 %v824_v41, %v814_v40 }
 0x18e   :  { %v834_v43 = vadd.f32 %v833_v25, %v828_v42  ;;  %v943_v25 = vrot.slane %v2320_v28, %v2063_v53 }
 0x18f   :  { %1739 = vset.pattern.permute.xlu1 %v1952_v45  ;;  %v954_v45 = vrot.slane %v2320_v28, %v2072_v59 }
 0x190   :  { %v835_v48 = vmax.f32 %v834_v43, 0.0  ;;  %1256 = vperm.xlu1 %1739, %v2228_v52   ;;  %v944_v43 = vadd.f32 %v943_v25, %v938_v38 }
 0x192   :  { %v836_v49 = vadd.f32 %v835_v48, %v825_v47  ;;  %v850_v51 = vpop.permute.xlu1 %849  ;;  %v945_v48 = vmax.f32 %v944_v43, 0.0 }
 0x193   :  { %v856_v55 = vadd.f32 %v855_v46, %v850_v51  ;;  %v1959_v51 = vmov 120  }
 0x194   :  { %1741 = vset.pattern.permute.xlu1 %v1953_v2  ;;  %v847_v61 = vadd.f32 %v846_v50, %v836_v49  ;;  %v976_v2 = vrot.slane %v2320_v28, %v2075_v62 }
 0x195   :  { %1278 = vperm.xlu1 %1741, %v2228_v52   ;;  %v857_v63 = vmax.f32 %v856_v55, 0.0  ;;  %v965_v55 = vrot.slane %v2320_v28, %v2068_v57 }
 0x197   :  { %v861_v0 = vpop.permute.xlu1 %860  ;;  %v858_v8 = vadd.f32 %v857_v63, %v847_v61 }
 0x198   :  { %v867_v54 = vadd.f32 %v866_v56, %v861_v0  ;;  %v971_v56 = vpop.permute.xlu0 %970 }
 0x199   :  { %1742 = vset.pattern.permute.xlu1 %v1954_v3  ;;  %v977_v0 = vadd.f32 %v976_v2, %v971_v56 }
 0x19a   :  { %v868_v9 = vmax.f32 %v867_v54, 0.0  ;;  %1289 = vperm.xlu1 %1742, %v2228_v52   ;;  %v1960_v54 = vmov 121  }
 0x19c   :  { %v869_v10 = vadd.f32 %v868_v9, %v858_v8  ;;  %v883_v13 = vpop.permute.xlu1 %882  ;;  %v978_v9 = vmax.f32 %v977_v0, 0.0 }
 0x19d   :  { %v889_v15 = vadd.f32 %v888_v7, %v883_v13  ;;  %v1961_v13 = vmov 123  }
 0x19e   :  { %1744 = vset.pattern.permute.xlu1 %v1955_v4  ;;  %v880_v18 = vadd.f32 %v879_v12, %v869_v10  ;;  %v1009_v4 = vrot.slane %v2320_v28, %v2094_v19 }
 0x19f   :  { %1311 = vperm.xlu1 %1744, %v2228_v52   ;;  %v890_v20 = vmax.f32 %v889_v15, 0.0  ;;  %v998_v15 = vrot.slane %v2320_v28, %v2084_v6 }
 0x1a1   :  { %v894_v21 = vpop.permute.xlu1 %893  ;;  %v891_v26 = vadd.f32 %v890_v20, %v880_v18 }
 0x1a2   :  { %v900_v22 = vadd.f32 %v899_v14, %v894_v21  ;;  %v1004_v14 = vpop.permute.xlu0 %1003 }
 0x1a3   :  { %1745 = vset.pattern.permute.xlu1 %v1956_v23  ;;  %v1010_v21 = vadd.f32 %v1009_v4, %v1004_v14 }
 0x1a4   :  { %v901_v27 = vmax.f32 %v900_v22, 0.0  ;;  %1322 = vperm.xlu1 %1745, %v2228_v52   ;;  %v1962_v22 = vmov 124  }
 0x1a6   :  { %v902_v29 = vadd.f32 %v901_v27, %v891_v26  ;;  %v916_v32 = vpop.permute.xlu1 %915  ;;  %v50_v26 = vld [vmem:[#allocation6 + $0x58] sm:$0xff]  ;;  %v1037_v25 = vpop.permute.xlu0 %1036 }
 0x1a7   :  { %v922_v35 = vadd.f32 %v921_v24, %v916_v32 }
 0x1a8   :  { %1747 = vset.pattern.permute.xlu1 %v1957_v34  ;;  %v913_v39 = vadd.f32 %v912_v30, %v902_v29  ;;  %v1011_v29 = vmax.f32 %v1010_v21, 0.0  ;;  %v1031_v34 = vrot.slane %v50_v26, %v2063_v53 }
 0x1a9   :  { %1344 = vperm.xlu1 %1747, %v2228_v52   ;;  %v923_v40 = vmax.f32 %v922_v35, 0.0  ;;  %v1963_v35 = vmov 126  }
 0x1ab   :  { %v927_v41 = vpop.permute.xlu1 %926  ;;  %v924_v46 = vadd.f32 %v923_v40, %v913_v39 }
 0x1ac   :  { %v933_v42 = vadd.f32 %v932_v37, %v927_v41  ;;  %v1042_v37 = vrot.slane %v50_v26, %v2072_v59 }
 0x1ad   :  { %1748 = vset.pattern.permute.xlu1 %v1958_v44 }
 0x1ae   :  { %v934_v47 = vmax.f32 %v933_v42, 0.0  ;;  %1355 = vperm.xlu1 %1748, %v2228_v52   ;;  %v1043_v41 = vadd.f32 %v1042_v37, %v1037_v25  ;;  %v1053_v42 = vrot.slane %v50_v26, %v2068_v57 }
 0x1b0   :  { %v935_v33 = vadd.f32 %v934_v47, %v924_v46  ;;  %v949_v49 = vpop.permute.xlu1 %948  ;;  %v1044_v46 = vmax.f32 %v1043_v41, 0.0 }
 0x1b1   :  { %v955_v50 = vadd.f32 %v954_v45, %v949_v49  ;;  %v1075_v49 = vrot.slane %v50_v26, %v2082_v5 }
 0x1b2   :  { %1750 = vset.pattern.permute.xlu1 %v1959_v51  ;;  %v946_v58 = vadd.f32 %v945_v48, %v935_v33  ;;  %v1064_v48 = vrot.slane %v50_v26, %v2075_v62 }
 0x1b3   :  { %1377 = vperm.xlu1 %1750, %v2228_v52   ;;  %v956_v60 = vmax.f32 %v955_v50, 0.0  ;;  %v1070_v50 = vpop.permute.xlu0 %1069 }
 0x1b5   :  { %v960_v61 = vpop.permute.xlu1 %959  ;;  %v957_v3 = vadd.f32 %v956_v60, %v946_v58  ;;  %v1086_v58 = vrot.slane %v50_v26, %v2084_v6 }
 0x1b6   :  { %v966_v63 = vadd.f32 %v965_v55, %v960_v61 }
 0x1b7   :  { %1751 = vset.pattern.permute.xlu1 %v1960_v54 }
 0x1b8   :  { %v967_v7 = vmax.f32 %v966_v63, 0.0  ;;  %1388 = vperm.xlu1 %1751, %v2228_v52  }
 0x1ba   :  { %v968_v8 = vadd.f32 %v967_v7, %v957_v3  ;;  %v982_v10 = vpop.permute.xlu1 %981  ;;  %v1108_v3 = vrot.slane %v50_v26, %v2100_v31  ;;  %v1103_v7 = vpop.permute.xlu0 %1102 }
 0x1bb   :  { %v988_v12 = vadd.f32 %v987_v1, %v982_v10  ;;  %v1097_v1 = vrot.slane %v50_v26, %v2094_v19  ;;  %v51_v10 = vld [vmem:[#allocation6 + $0x60] sm:$0xff] }
 0x1bc   :  { %1753 = vset.pattern.permute.xlu1 %v1961_v13  ;;  %v979_v16 = vadd.f32 %v978_v9, %v968_v8  ;;  %v1119_v4 = vrot.slane %v51_v10, %v2063_v53 }
 0x1bd   :  { %1410 = vperm.xlu1 %1753, %v2228_v52   ;;  %v989_v17 = vmax.f32 %v988_v12, 0.0 }
 0x1bf   :  { %v993_v18 = vpop.permute.xlu1 %992  ;;  %v990_v23 = vadd.f32 %v989_v17, %v979_v16 }
 0x1c0   :  { %v999_v20 = vadd.f32 %v998_v15, %v993_v18  ;;  %v1109_v15 = vadd.f32 %v1108_v3, %v1103_v7 }
 0x1c1   :  { %1754 = vset.pattern.permute.xlu1 %v1962_v22  ;;  %v1130_v22 = vrot.slane %v51_v10, %v2072_v59 }
 0x1c2   :  { %v1000_v24 = vmax.f32 %v999_v20, 0.0  ;;  %1421 = vperm.xlu1 %1754, %v2228_v52   ;;  %v1110_v18 = vmax.f32 %v1109_v15, 0.0 }
 0x1c4   :  { %v1001_v27 = vadd.f32 %v1000_v24, %v990_v23  ;;  %v1015_v30 = vpop.permute.xlu1 %1014  ;;  %v1136_v23 = vpop.permute.xlu0 %1135 }
 0x1c5   :  { %v1021_v32 = vadd.f32 %v1020_v11, %v1015_v30  ;;  %v1141_v11 = vrot.slane %v51_v10, %v2068_v57 }
 0x1c6   :  { %1756 = vset.pattern.permute.xlu1 %v1963_v35  ;;  %v1012_v38 = vadd.f32 %v1011_v29, %v1001_v27 }
 0x1c7   :  { %1443 = vperm.xlu1 %1756, %v2228_v52   ;;  %v1022_v28 = vmax.f32 %v1021_v32, 0.0  ;;  %v1142_v30 = vadd.f32 %v1141_v11, %v1136_v23  ;;  %v1152_v32 = vrot.slane %v51_v10, %v2075_v62 }
 0x1c8   :  { %v1169_v41 = vpop.permute.xlu0 %1168 }
 0x1c9   :  { %v1026_v39 = vpop.permute.xlu1 %1025  ;;  %v1023_v43 = vadd.f32 %v1022_v28, %v1012_v38  ;;  %v1143_v25 = vmax.f32 %v1142_v30, 0.0 }
 0x1ca   :  { %v1032_v40 = vadd.f32 %v1031_v34, %v1026_v39  ;;  %v1163_v39 = vrot.slane %v51_v10, %v2082_v5 }
 0x1cb   :  { %1757 = vset.pattern.permute.xlu1 %v1938_v36  ;;  %v1076_v36 = vadd.f32 %v1075_v49, %v1070_v50  ;;  %v52_v49 = vld [vmem:[#allocation6 + $0x68] sm:$0xff] }
 0x1cc   :  { %v1033_v44 = vmax.f32 %v1032_v40, 0.0  ;;  %1454 = vperm.xlu1 %1757, %v2228_v52   ;;  %v1174_v40 = vrot.slane %v51_v10, %v2084_v6 }
 0x1cd   :  { %v1077_v52 = vmax.f32 %v1076_v36, 0.0  ;;  %v1207_v36 = vrot.slane %v52_v49, %v2063_v53 }
 0x1ce   :  { %v1034_v45 = vadd.f32 %v1033_v44, %v1023_v43  ;;  %v1048_v47 = vpop.permute.xlu1 %1047 }
 0x1cf   :  { %v1054_v33 = vadd.f32 %v1053_v42, %v1048_v47  ;;  %v1185_v47 = vrot.slane %v51_v10, %v2094_v19 }
 0x1d0   :  { %v1045_v51 = vadd.f32 %v1044_v46, %v1034_v45  ;;  %v1175_v46 = vadd.f32 %v1174_v40, %v1169_v41  ;;  %v53_v40 = vld [vmem:[#allocation6 + $0x70] sm:$0xff] }
 0x1d1   :  { %v1055_v55 = vmax.f32 %v1054_v33, 0.0 }
 0x1d3   :  { %v1059_v2 = vpop.permute.xlu1 %1058  ;;  %v1056_v60 = vadd.f32 %v1055_v55, %v1045_v51  ;;  %v1176_v51 = vmax.f32 %v1175_v46, 0.0  ;;  %v1306_v46 = vrot.slane %v53_v40, %v2072_v59 }
 0x1d4   :  { %v1065_v56 = vadd.f32 %v1064_v48, %v1059_v2 }
 0x1d6   :  { %v1066_v61 = vmax.f32 %v1065_v56, 0.0  ;;  %v1196_v56 = vrot.slane %v51_v10, %v2100_v31  ;;  %v1240_v10 = vrot.slane %v52_v49, %v2075_v62 }
 0x1d8   :  { %v1067_v63 = vadd.f32 %v1066_v61, %v1056_v60  ;;  %v1081_v0 = vpop.permute.xlu1 %1080 }
 0x1d9   :  { %v1087_v54 = vadd.f32 %v1086_v58, %v1081_v0  ;;  %v1202_v58 = vpop.permute.xlu0 %1201 }
 0x1da   :  { %v1078_v8 = vadd.f32 %v1077_v52, %v1067_v63  ;;  %v1208_v0 = vadd.f32 %v1207_v36, %v1202_v58 }
 0x1db   :  { %v1088_v9 = vmax.f32 %v1087_v54, 0.0  ;;  %v1218_v54 = vrot.slane %v52_v49, %v2072_v59 }
 0x1dd   :  { %v1092_v12 = vpop.permute.xlu1 %1091  ;;  %v1089_v14 = vadd.f32 %v1088_v9, %v1078_v8  ;;  %v1209_v8 = vmax.f32 %v1208_v0, 0.0  ;;  %v1235_v15 = vpop.permute.xlu0 %1234 }
 0x1de   :  { %v1098_v13 = vadd.f32 %v1097_v1, %v1092_v12 }
 0x1e0   :  { %v1099_v16 = vmax.f32 %v1098_v13, 0.0  ;;  %v1229_v13 = vrot.slane %v52_v49, %v2068_v57 }
 0x1e1   :  { %v1268_v30 = vpop.permute.xlu0 %1267 }
 0x1e2   :  { %v1100_v17 = vadd.f32 %v1099_v16, %v1089_v14  ;;  %v1114_v20 = vpop.permute.xlu1 %1113 }
 0x1e3   :  { %v1120_v21 = vadd.f32 %v1119_v4, %v1114_v20  ;;  %v1251_v20 = vrot.slane %v52_v49, %v2082_v5 }
 0x1e4   :  { %v1111_v24 = vadd.f32 %v1110_v18, %v1100_v17  ;;  %v1241_v18 = vadd.f32 %v1240_v10, %v1235_v15 }
 0x1e5   :  { %v1121_v26 = vmax.f32 %v1120_v21, 0.0 }
 0x1e6   :  { %v1242_v23 = vmax.f32 %v1241_v18, 0.0 }
 0x1e7   :  { %v1125_v27 = vpop.permute.xlu1 %1124  ;;  %v1122_v35 = vadd.f32 %v1121_v26, %v1111_v24 }
 0x1e8   :  { %v1131_v29 = vadd.f32 %v1130_v22, %v1125_v27  ;;  %v1262_v27 = vrot.slane %v52_v49, %v2084_v6 }
 0x1ea   :  { %v1132_v34 = vmax.f32 %v1131_v29, 0.0  ;;  %v1273_v29 = vrot.slane %v52_v49, %v2094_v19 }
 0x1ec   :  { %v1133_v37 = vadd.f32 %v1132_v34, %v1122_v35  ;;  %v1147_v38 = vpop.permute.xlu1 %1146 }
 0x1ed   :  { %v1153_v28 = vadd.f32 %v1152_v32, %v1147_v38  ;;  %v1284_v38 = vrot.slane %v52_v49, %v2100_v31 }
 0x1ee   :  { %v1144_v42 = vadd.f32 %v1143_v25, %v1133_v37  ;;  %v1274_v25 = vadd.f32 %v1273_v29, %v1268_v30 }
 0x1ef   :  { %v1154_v43 = vmax.f32 %v1153_v28, 0.0 }
 0x1f1   :  { %v1158_v44 = vpop.permute.xlu1 %1157  ;;  %v1155_v33 = vadd.f32 %v1154_v43, %v1144_v42  ;;  %v1275_v42 = vmax.f32 %v1274_v25, 0.0 }
 0x1f2   :  { %v1164_v45 = vadd.f32 %v1163_v39, %v1158_v44 }
 0x1f4   :  { %v1165_v48 = vmax.f32 %v1164_v45, 0.0  ;;  %v1295_v45 = vrot.slane %v53_v40, %v2063_v53 }
 0x1f6   :  { %v1166_v50 = vadd.f32 %v1165_v48, %v1155_v33  ;;  %v1180_v55 = vpop.permute.xlu1 %1179 }
 0x1f7   :  { %v1186_v2 = vadd.f32 %v1185_v47, %v1180_v55  ;;  %v1301_v47 = vpop.permute.xlu0 %1300 }
 0x1f8   :  { %v1177_v60 = vadd.f32 %v1176_v51, %v1166_v50  ;;  %v1307_v55 = vadd.f32 %v1306_v46, %v1301_v47 }
 0x1f9   :  { %v1187_v61 = vmax.f32 %v1186_v2, 0.0  ;;  %v1317_v2 = vrot.slane %v53_v40, %v2068_v57 }
 0x1fa   :  { %v1308_v58 = vmax.f32 %v1307_v55, 0.0 }
 0x1fb   :  { %v1191_v63 = vpop.permute.xlu1 %1190  ;;  %v1188_v1 = vadd.f32 %v1187_v61, %v1177_v60  ;;  %v1334_v0 = vpop.permute.xlu0 %1333 }
 0x1fc   :  { %v1197_v52 = vadd.f32 %v1196_v56, %v1191_v63  ;;  %v1328_v63 = vrot.slane %v53_v40, %v2075_v62 }
 0x1fe   :  { %v1198_v3 = vmax.f32 %v1197_v52, 0.0  ;;  %v1339_v52 = vrot.slane %v53_v40, %v2082_v5 }
 0x1ff   :  { %v1367_v18 = vpop.permute.xlu0 %1366 }
 0x200   :  { %v1199_v7 = vadd.f32 %v1198_v3, %v1188_v1  ;;  %v1213_v9 = vpop.permute.xlu1 %1212 }
 0x201   :  { %v1219_v12 = vadd.f32 %v1218_v54, %v1213_v9  ;;  %v1350_v9 = vrot.slane %v53_v40, %v2084_v6 }
 0x202   :  { %v1210_v4 = vadd.f32 %v1209_v8, %v1199_v7  ;;  %v1340_v8 = vadd.f32 %v1339_v52, %v1334_v0 }
 0x203   :  { %v1220_v14 = vmax.f32 %v1219_v12, 0.0 }
 0x204   :  { %v1341_v15 = vmax.f32 %v1340_v8, 0.0 }
 0x205   :  { %v1224_v16 = vpop.permute.xlu1 %1223  ;;  %v1221_v21 = vadd.f32 %v1220_v14, %v1210_v4 }
 0x206   :  { %v1230_v17 = vadd.f32 %v1229_v13, %v1224_v16  ;;  %v1361_v16 = vrot.slane %v53_v40, %v2094_v19 }
 0x208   :  { %v1231_v22 = vmax.f32 %v1230_v17, 0.0  ;;  %v1372_v17 = vrot.slane %v53_v40, %v2100_v31 }
 0x20a   :  { %v1232_v11 = vadd.f32 %v1231_v22, %v1221_v21  ;;  %v1246_v24 = vpop.permute.xlu1 %1245  ;;  %v54_v22 = vld [vmem:[#allocation6 + $0x78] sm:$0xff] }
 0x20b   :  { %v1252_v26 = vadd.f32 %v1251_v20, %v1246_v24  ;;  %v1373_v24 = vadd.f32 %v1372_v17, %v1367_v18  ;;  %v1405_v25 = vrot.slane %v54_v22, %v2068_v57  ;;  %v1460_v52 = vrot.slane %v54_v22, %v2100_v31 }
 0x20c   :  { %v1243_v32 = vadd.f32 %v1242_v23, %v1232_v11 }
 0x20d   :  { %v1253_v35 = vmax.f32 %v1252_v26, 0.0  ;;  %v1383_v26 = vrot.slane %v54_v22, %v2063_v53 }
 0x20f   :  { %v1257_v34 = vpop.permute.xlu1 %1256  ;;  %v1254_v28 = vadd.f32 %v1253_v35, %v1243_v32  ;;  %v1374_v32 = vmax.f32 %v1373_v24, 0.0 }
 0x210   :  { %v1263_v37 = vadd.f32 %v1262_v27, %v1257_v34 }
 0x212   :  { %v1264_v39 = vmax.f32 %v1263_v37, 0.0  ;;  %v1394_v37 = vrot.slane %v54_v22, %v2072_v59  ;;  %v1438_v59 = vrot.slane %v54_v22, %v2084_v6 }
 0x214   :  { %v1265_v41 = vadd.f32 %v1264_v39, %v1254_v28  ;;  %v1279_v43 = vpop.permute.xlu1 %1278 }
 0x215   :  { %v1285_v44 = vadd.f32 %v1284_v38, %v1279_v43  ;;  %v1400_v38 = vpop.permute.xlu0 %1399  ;;  %v1416_v43 = vrot.slane %v54_v22, %v2075_v62 }
 0x216   :  { %v1276_v33 = vadd.f32 %v1275_v42, %v1265_v41  ;;  %v1406_v42 = vadd.f32 %v1405_v25, %v1400_v38 }
 0x217   :  { %v1286_v48 = vmax.f32 %v1285_v44, 0.0 }
 0x218   :  { %v1407_v46 = vmax.f32 %v1406_v42, 0.0 }
 0x219   :  { %v1290_v50 = vpop.permute.xlu1 %1289  ;;  %v1287_v49 = vadd.f32 %v1286_v48, %v1276_v33  ;;  %v1427_v48 = vrot.slane %v54_v22, %v2082_v5 }
 0x21a   :  { %v1296_v51 = vadd.f32 %v1295_v45, %v1290_v50  ;;  %v1433_v50 = vpop.permute.xlu0 %1432 }
 0x21c   :  { %v1297_v56 = vmax.f32 %v1296_v51, 0.0 }
 0x21e   :  { %v1298_v36 = vadd.f32 %v1297_v56, %v1287_v49  ;;  %v1312_v60 = vpop.permute.xlu1 %1311  ;;  %v1439_v49 = vadd.f32 %v1438_v59, %v1433_v50  ;;  %v1449_v56 = vrot.slane %v54_v22, %v2094_v19 }
 0x21f   :  { %v1318_v61 = vadd.f32 %v1317_v2, %v1312_v60 }
 0x220   :  { %v1309_v54 = vadd.f32 %v1308_v58, %v1298_v36  ;;  %v1440_v60 = vmax.f32 %v1439_v49, 0.0 }
 0x221   :  { %v1319_v1 = vmax.f32 %v1318_v61, 0.0 }
 0x223   :  { %v1323_v3 = vpop.permute.xlu1 %1322  ;;  %v1320_v12 = vadd.f32 %v1319_v1, %v1309_v54 }
 0x224   :  { %v1329_v7 = vadd.f32 %v1328_v63, %v1323_v3 }
 0x226   :  { %v1330_v13 = vmax.f32 %v1329_v7, 0.0 }
 0x228   :  { %v1331_v10 = vadd.f32 %v1330_v13, %v1320_v12  ;;  %v1345_v4 = vpop.permute.xlu1 %1344 }
 0x229   :  { %v1351_v14 = vadd.f32 %v1350_v9, %v1345_v4 }
 0x22a   :  { %v1342_v20 = vadd.f32 %v1341_v15, %v1331_v10 }
 0x22b   :  { %v1352_v21 = vmax.f32 %v1351_v14, 0.0 }
 0x22d   :  { %v1356_v11 = vpop.permute.xlu1 %1355  ;;  %v1353_v27 = vadd.f32 %v1352_v21, %v1342_v20 }
 0x22e   :  { %v1362_v23 = vadd.f32 %v1361_v16, %v1356_v11 }
 0x230   :  { %v1363_v29 = vmax.f32 %v1362_v23, 0.0 }
 0x232   :  { %v1364_v30 = vadd.f32 %v1363_v29, %v1353_v27  ;;  %v1378_v35 = vpop.permute.xlu1 %1377 }
 0x233   :  { %v1384_v34 = vadd.f32 %v1383_v26, %v1378_v35 }
 0x234   :  { %v1375_v28 = vadd.f32 %v1374_v32, %v1364_v30 }
 0x235   :  { %v1385_v39 = vmax.f32 %v1384_v34, 0.0 }
 0x237   :  { %v1389_v40 = vpop.permute.xlu1 %1388  ;;  %v1386_v44 = vadd.f32 %v1385_v39, %v1375_v28 }
 0x238   :  { %v1395_v41 = vadd.f32 %v1394_v37, %v1389_v40 }
 0x23a   :  { %v1396_v53 = vmax.f32 %v1395_v41, 0.0 }
 0x23c   :  { %v1397_v45 = vadd.f32 %v1396_v53, %v1386_v44  ;;  %v1411_v47 = vpop.permute.xlu1 %1410 }
 0x23d   :  { %v1417_v33 = vadd.f32 %v1416_v43, %v1411_v47 }
 0x23e   :  { %v1408_v57 = vadd.f32 %v1407_v46, %v1397_v45 }
 0x23f   :  { %v1418_v51 = vmax.f32 %v1417_v33, 0.0 }
 0x241   :  { %v1422_v55 = vpop.permute.xlu1 %1421  ;;  %v1419_v36 = vadd.f32 %v1418_v51, %v1408_v57 }
 0x242   :  { %v1428_v2 = vadd.f32 %v1427_v48, %v1422_v55 }
 0x244   :  { %v1429_v62 = vmax.f32 %v1428_v2, 0.0 }
 0x246   :  { %v1430_v58 = vadd.f32 %v1429_v62, %v1419_v36  ;;  %v1444_v61 = vpop.permute.xlu1 %1443 }
 0x247   :  { %v1450_v63 = vadd.f32 %v1449_v56, %v1444_v61 }
 0x248   :  { %v1441_v0 = vadd.f32 %v1440_v60, %v1430_v58 }
 0x249   :  { %v1451_v5 = vmax.f32 %v1450_v63, 0.0 }
 0x24b   :  { %v1455_v54 = vpop.permute.xlu1 %1454  ;;  %v1452_v1 = vadd.f32 %v1451_v5, %v1441_v0 }
 0x24c   :  { %v1461_v6 = vadd.f32 %v1460_v52, %v1455_v54 }
 0x24e   :  { %v1462_v3 = vmax.f32 %v1461_v6, 0.0 }
 0x250   :  { %v1463_v7 = vadd.f32 %v1462_v3, %v1452_v1 }
 0x252   :  { %1480 = vst [vmem:[#allocation8] sm:$0xff] %v1463_v7 }
 0x253   :  { %1815 = shalt.err (!%p1812_p6)
}
 0x254   :  { %s1816_s10 = scalar_lea.hbm %s2403_s2, 128 }
 0x255   :  { %p1817_p7 = scmp.ne.s32.totalorder %s2403_s2, %s1816_s10  ;;  %p1820_p8 = scmp.lt.u32.totalorder %s1816_s10, %s2403_s2 }
 0x257   :  { %p1822_p9 = pnand %p1820_p8, %p1817_p7 }
 0x259   :  { %1825 = shalt.err (!%p1822_p9)
}
 0x25a   :  { %1490 = dma.vmem_to_hbm [thread:$0]  %s1488_s6, 128, %s2403_s2, [#allocation5]  }
 0x25b   :  { %1830 = dma.done.wait [#allocation5], 128  }
 0x25c   :  { %1831 = vsyncadd [#allocation5], 4294967168 }
 0x25d   :  { %1494 = vsyncpa [#allocation4], 1 }
 0x25e   :  { %1495 = vsyncpa [#allocation7], 1 }
 0x25f   :  { %1496 = vsyncpa [#allocation5], 1 }

</bundles_post_ra>
